<compile_context>
chip_gen: v7x
topology: tpu7x:2x2x1
jax: 0.10.0
libtpu: 0.0.40
codegen_flags: <defaults>
</compile_context>

<pallas_src>
import functools

import jax
import jax.numpy as jnp
from jax.experimental import pallas as pl
from jax.experimental.pallas import tpu as pltpu


# ----------------------------------------------------------------------------
# Pallas single-pass matmul + bias + (optional) ReLU kernel
# ----------------------------------------------------------------------------
def _matmul_bias_act_kernel(a_ref, b_ref, bias_ref, o_ref, *, apply_relu):
    # a_ref: (tm, K) bf16, b_ref: (K, N) bf16, bias_ref: (1, N) f32.
    acc = jnp.dot(a_ref[...], b_ref[...], preferred_element_type=jnp.float32)
    out = acc + bias_ref[...]  # (1, N) broadcasts over rows
    if apply_relu:
        out = jnp.maximum(out, 0.0)
    o_ref[...] = out.astype(o_ref.dtype)


def _round_up(x, m):
    return (x + m - 1) // m * m


def matmul_bias_act(a, b, bias, *, apply_relu, out_dtype=jnp.bfloat16, tm_max=512):
    """out = act(a @ b + bias).

    a: (M, K), b: (K, N), bias: (N,).  a/b are cast to bf16 (f32 accumulation
    inside the kernel), bias/epilogue stay f32, output is `out_dtype`.
    Single pass over K (K kept resident in VMEM), N kept full-extent, only M
    is tiled/padded (to a multiple of 16 rows).
    """
    M, K = a.shape
    K2, N = b.shape
    assert K == K2
    a = a.astype(jnp.bfloat16)
    b = b.astype(jnp.bfloat16)
    bias2d = bias.astype(jnp.float32).reshape(1, N)

    # Choose the M tile: as large as possible (mem-bound regime) while the
    # whole (tm x K) A tile + resident (K x N) B + output tile fit comfortably
    # in scoped VMEM (v7x has only 64 MiB physical per TC; stay well under).
    Mp = _round_up(M, 16)
    tm = min(tm_max, Mp)

    def _footprint(tm_):
        # 2x for double buffering of A and the output; B/bias are revisited.
        return 2 * (tm_ * K * 2) + K * N * 2 + N * 4 + 2 * (tm_ * N * 4)

    while tm > 16 and _footprint(tm) > 24 * 1024 * 1024:
        tm //= 2
    Mp = _round_up(Mp, tm)
    if Mp != M:
        a = jnp.pad(a, ((0, Mp - M), (0, 0)))

    grid = (Mp // tm,)
    kernel = functools.partial(_matmul_bias_act_kernel, apply_relu=apply_relu)

    out = pl.pallas_call(
        kernel,
        out_shape=jax.ShapeDtypeStruct((Mp, N), out_dtype),
        grid=grid,
        in_specs=[
            pl.BlockSpec((tm, K), lambda i: (i, 0)),   # A: stream M tiles
            pl.BlockSpec((K, N), lambda i: (0, 0)),    # B: resident in VMEM
            pl.BlockSpec((1, N), lambda i: (0, 0)),    # bias: resident
        ],
        out_specs=pl.BlockSpec((tm, N), lambda i: (i, 0)),
        compiler_params=pltpu.CompilerParams(
            dimension_semantics=("parallel",),          # shard M tiles across TCs
            vmem_limit_bytes=64 * 1024 * 1024,          # v5e scoped default is 16 MiB
        ),
    )(a, b, bias2d)

    return out[:M, :] if Mp != M else out


# ----------------------------------------------------------------------------
# VGG building blocks (glue around the Pallas matmul kernel)
# ----------------------------------------------------------------------------
def conv3x3_relu(x_nhwc, w, b):
    """3x3 conv, padding=1, stride=1, + ReLU.  w: (3,3,Cin,Cout), b: (Cout,).

    NOTE: if loading real PyTorch VGG weights (Cout,Cin,kh,kw), permute them to
    (kh,kw,Cin,Cout) first.
    """
    # TODO(synk): fully fuse the 3x3 halo extraction into the Pallas kernel
    # (manual halo-row DMA / tap-reduction grid axis) to avoid materializing
    # the 9x im2col matrix in HBM; currently it is built once in bf16 as a
    # single fused XLA pass and consumed directly by the kernel (no K/N pads).
    N, H, W, C = x_nhwc.shape
    Cout = w.shape[-1]
    x_bf = x_nhwc.astype(jnp.bfloat16)
    xp = jnp.pad(x_bf, ((0, 0), (1, 1), (1, 1), (0, 0)))
    # im2col: (N, H, W, 9*Cin), patch order (dy, dx, cin) matching w.reshape below.
    patches = jnp.concatenate(
        [xp[:, dy:dy + H, dx:dx + W, :] for dy in range(3) for dx in range(3)],
        axis=-1,
    )
    a = patches.reshape(N * H * W, 9 * C)
    wm = w.reshape(9 * C, Cout)
    out = matmul_bias_act(a, wm, b, apply_relu=True, out_dtype=jnp.bfloat16)
    return out.reshape(N, H, W, Cout)


def maxpool2x2(x_nhwc):
    # TODO(synk): could be fused into the following layer's patch extraction;
    # XLA already fuses this reshape/max with the next conv's pad+concat pass.
    N, H, W, C = x_nhwc.shape
    x = x_nhwc[:, : (H // 2) * 2, : (W // 2) * 2, :]  # PyTorch floor behavior
    return x.reshape(N, H // 2, 2, W // 2, 2, C).max(axis=(2, 4))


# ----------------------------------------------------------------------------
# Model definition (scaled-down VGG-16: 13 convs, 5 maxpools, 3 FC layers)
# ----------------------------------------------------------------------------
# Full-size VGG-16 would be [64,64,M,128,128,M,256,256,256,M,512,512,512,M,512,512,512,M]
CONV_CFG = [8, 8, "M", 16, 16, "M", 32, 32, 32, "M", 32, 32, 32, "M", 32, 32, 32, "M"]
IN_CHANNELS = 3
FC_HIDDEN = 64
NUM_CLASSES = 100   # logits are (N x 100), per the module docstring


def init_params(key, spatial):
    """Params contain ONLY arrays (jit-friendly pytree); layer structure
    (conv vs pool) lives statically in CONV_CFG."""
    conv_params = []
    c_in = IN_CHANNELS
    s = spatial
    for item in CONV_CFG:
        if item == "M":
            s //= 2
        else:
            c_out = item
            key, kw = jax.random.split(key)
            w = jax.random.normal(kw, (3, 3, c_in, c_out), jnp.float32) * 0.05
            b = jnp.zeros((c_out,), jnp.float32)
            conv_params.append({"w": w, "b": b})
            c_in = c_out
    feat_dim = c_in * s * s
    dims = [feat_dim, FC_HIDDEN, FC_HIDDEN, NUM_CLASSES]
    fcs = []
    for li in range(3):
        key, kw = jax.random.split(key)
        w = jax.random.normal(kw, (dims[li], dims[li + 1]), jnp.float32) * 0.05
        b = jnp.zeros((dims[li + 1],), jnp.float32)
        fcs.append({"w": w, "b": b})
    return {"conv": conv_params, "classifier": fcs}


def vggnet_modified_forward(x_nchw, params, freeze_at_layer_l=True):
    """Returns (midlevel_act [NCHW, f32], logits [N, NUM_CLASSES, f32])."""
    x = jnp.transpose(x_nchw, (0, 2, 3, 1)).astype(jnp.bfloat16)  # NCHW -> NHWC

    # --- VGGTruncatedConv ---
    conv_iter = iter(params["conv"])
    for item in CONV_CFG:                      # static structure, arrays traced
        if item == "M":
            x = maxpool2x2(x)
        else:
            layer = next(conv_iter)
            x = conv3x3_relu(x, layer["w"], layer["b"])

    midlevel_nchw = jnp.transpose(x, (0, 3, 1, 2))  # back to NCHW (N x C x h x w)

    # clamp_grad_to_zero(): gradient-only op, identity in the forward pass.
    del freeze_at_layer_l
    h = midlevel_nchw

    # --- VGGTruncatedClassifier ---
    n = h.shape[0]
    feat = h.reshape(n, -1)  # flatten in NCHW order, like PyTorch x.view(N, -1)
    fc = params["classifier"]
    feat = matmul_bias_act(feat, fc[0]["w"], fc[0]["b"],
                           apply_relu=True, out_dtype=jnp.bfloat16)
    # TODO(synk): dropout is identity here (eval-mode semantics); training-mode dropout not modeled.
    feat = matmul_bias_act(feat, fc[1]["w"], fc[1]["b"],
                           apply_relu=True, out_dtype=jnp.bfloat16)
    logits = matmul_bias_act(feat, fc[2]["w"], fc[2]["b"],
                             apply_relu=False, out_dtype=jnp.float32)

    return midlevel_nchw.astype(jnp.float32), logits


if __name__ == "__main__":
    key = jax.random.PRNGKey(0)
    k_x, k_p = jax.random.split(key)

    N, C, H, W = 2, 3, 32, 32  # small stand-in for (64, 3, 224, 224)
    x = jax.random.normal(k_x, (N, C, H, W), jnp.float32)
    params = init_params(k_p, spatial=H)

    fwd = jax.jit(functools.partial(vggnet_modified_forward, freeze_at_layer_l=True))
    midlevel_act, logits = fwd(x, params)
    jax.block_until_ready((midlevel_act, logits))

    last_conv_channels = [c for c in CONV_CFG if c != "M"][-1]
    n_pools = CONV_CFG.count("M")
    assert midlevel_act.shape == (N, last_conv_channels, H >> n_pools, W >> n_pools)
    assert logits.shape == (N, NUM_CLASSES)
    print("KERNEL_OK")
</pallas_src>

<mosaic_0001>
module attributes {stable_mosaic.version = 11 : i64} {
  func.func @_matmul_bias_act_kernel(%arg0: i32, %arg1: memref<512x27xbf16, #tpu.memory_space<vmem>>, %arg2: memref<27x8xbf16, #tpu.memory_space<vmem>>, %arg3: memref<1x8xf32, #tpu.memory_space<vmem>>, %arg4: memref<512x8xbf16, #tpu.memory_space<vmem>>) attributes {dimension_semantics = [#tpu.dimension_semantics<parallel>], iteration_bounds = array<i64: 4>, scalar_prefetch = 0 : i64, scratch_operands = 0 : i64, tpu.core_type = #tpu.core_type<tc>, window_params = [{transform_indices = @transform_0, window_bounds = array<i64: 512, 27>}, {pipeline_mode = #tpu.pipeline_mode<synchronous>, transform_indices = @transform_1, window_bounds = array<i64: 27, 8>}, {pipeline_mode = #tpu.pipeline_mode<synchronous>, transform_indices = @transform_2, window_bounds = array<i64: 1, 8>}, {transform_indices = @transform_3, window_bounds = array<i64: 512, 8>}]} {
    %c0 = arith.constant 0 : index
    %c0_0 = arith.constant 0 : index
    %0 = vector.load %arg1[%c0, %c0_0] : memref<512x27xbf16, #tpu.memory_space<vmem>>, vector<512x27xbf16>
    %c0_1 = arith.constant 0 : index
    %c0_2 = arith.constant 0 : index
    %1 = vector.load %arg2[%c0_1, %c0_2] : memref<27x8xbf16, #tpu.memory_space<vmem>>, vector<27x8xbf16>
    %cst = arith.constant dense<0.000000e+00> : vector<512x8xf32>
    %2 = tpu.matmul %0, %1, %cst {dimension_numbers = #tpu.dot_dimension_numbers<[1], [0], [0], [1], [0, 0, 1, 1], [], []>} : vector<512x27xbf16>, vector<27x8xbf16>, vector<512x8xf32> -> vector<512x8xf32>
    %c0_3 = arith.constant 0 : index
    %c0_4 = arith.constant 0 : index
    %3 = vector.load %arg3[%c0_3, %c0_4] : memref<1x8xf32, #tpu.memory_space<vmem>>, vector<1x8xf32>
    %4 = vector.broadcast %3 : vector<1x8xf32> to vector<512x8xf32>
    %5 = arith.addf %2, %4 : vector<512x8xf32>
    %cst_5 = arith.constant 0.000000e+00 : f32
    %6 = vector.broadcast %cst_5 : f32 to vector<512x8xf32>
    %7 = arith.maximumf %5, %6 : vector<512x8xf32>
    %8 = arith.truncf %7 : vector<512x8xf32> to vector<512x8xbf16>
    %c0_6 = arith.constant 0 : index
    %c0_7 = arith.constant 0 : index
    %9 = vector.load %arg4[%c0_6, %c0_7] : memref<512x8xbf16, #tpu.memory_space<vmem>>, vector<512x8xbf16>
    tpu.vector_store %arg4[%c0_6, %c0_7], %8 {strides = array<i32>} : memref<512x8xbf16, #tpu.memory_space<vmem>>, vector<512x8xbf16>,
    return
  }
  func.func @transform_0(%arg0: i32) -> (i32, i32) {
    %c0_i32 = arith.constant 0 : i32
    %c0_i32_0 = arith.constant 0 : i32
    return %arg0, %c0_i32 : i32, i32
  }
  func.func @transform_1(%arg0: i32) -> (i32, i32) {
    %c0_i32 = arith.constant 0 : i32
    %c0_i32_0 = arith.constant 0 : i32
    %c0_i32_1 = arith.constant 0 : i32
    return %c0_i32, %c0_i32_0 : i32, i32
  }
  func.func @transform_2(%arg0: i32) -> (i32, i32) {
    %c0_i32 = arith.constant 0 : i32
    %c0_i32_0 = arith.constant 0 : i32
    %c0_i32_1 = arith.constant 0 : i32
    return %c0_i32, %c0_i32_0 : i32, i32
  }
  func.func @transform_3(%arg0: i32) -> (i32, i32) {
    %c0_i32 = arith.constant 0 : i32
    %c0_i32_0 = arith.constant 0 : i32
    return %arg0, %c0_i32 : i32, i32
  }
}

module attributes {stable_mosaic.version = 11 : i64} {
  func.func @_matmul_bias_act_kernel(%arg0: i32, %arg1: memref<512x72xbf16, #tpu.memory_space<vmem>>, %arg2: memref<72x8xbf16, #tpu.memory_space<vmem>>, %arg3: memref<1x8xf32, #tpu.memory_space<vmem>>, %arg4: memref<512x8xbf16, #tpu.memory_space<vmem>>) attributes {dimension_semantics = [#tpu.dimension_semantics<parallel>], iteration_bounds = array<i64: 4>, scalar_prefetch = 0 : i64, scratch_operands = 0 : i64, tpu.core_type = #tpu.core_type<tc>, window_params = [{transform_indices = @transform_0, window_bounds = array<i64: 512, 72>}, {pipeline_mode = #tpu.pipeline_mode<synchronous>, transform_indices = @transform_1, window_bounds = array<i64: 72, 8>}, {pipeline_mode = #tpu.pipeline_mode<synchronous>, transform_indices = @transform_2, window_bounds = array<i64: 1, 8>}, {transform_indices = @transform_3, window_bounds = array<i64: 512, 8>}]} {
    %c0 = arith.constant 0 : index
    %c0_0 = arith.constant 0 : index
    %0 = vector.load %arg1[%c0, %c0_0] : memref<512x72xbf16, #tpu.memory_space<vmem>>, vector<512x72xbf16>
    %c0_1 = arith.constant 0 : index
    %c0_2 = arith.constant 0 : index
    %1 = vector.load %arg2[%c0_1, %c0_2] : memref<72x8xbf16, #tpu.memory_space<vmem>>, vector<72x8xbf16>
    %cst = arith.constant dense<0.000000e+00> : vector<512x8xf32>
    %2 = tpu.matmul %0, %1, %cst {dimension_numbers = #tpu.dot_dimension_numbers<[1], [0], [0], [1], [0, 0, 1, 1], [], []>} : vector<512x72xbf16>, vector<72x8xbf16>, vector<512x8xf32> -> vector<512x8xf32>
    %c0_3 = arith.constant 0 : index
    %c0_4 = arith.constant 0 : index
    %3 = vector.load %arg3[%c0_3, %c0_4] : memref<1x8xf32, #tpu.memory_space<vmem>>, vector<1x8xf32>
    %4 = vector.broadcast %3 : vector<1x8xf32> to vector<512x8xf32>
    %5 = arith.addf %2, %4 : vector<512x8xf32>
    %cst_5 = arith.constant 0.000000e+00 : f32
    %6 = vector.broadcast %cst_5 : f32 to vector<512x8xf32>
    %7 = arith.maximumf %5, %6 : vector<512x8xf32>
    %8 = arith.truncf %7 : vector<512x8xf32> to vector<512x8xbf16>
    %c0_6 = arith.constant 0 : index
    %c0_7 = arith.constant 0 : index
    %9 = vector.load %arg4[%c0_6, %c0_7] : memref<512x8xbf16, #tpu.memory_space<vmem>>, vector<512x8xbf16>
    tpu.vector_store %arg4[%c0_6, %c0_7], %8 {strides = array<i32>} : memref<512x8xbf16, #tpu.memory_space<vmem>>, vector<512x8xbf16>,
    return
  }
  func.func @transform_0(%arg0: i32) -> (i32, i32) {
    %c0_i32 = arith.constant 0 : i32
    %c0_i32_0 = arith.constant 0 : i32
    return %arg0, %c0_i32 : i32, i32
  }
  func.func @transform_1(%arg0: i32) -> (i32, i32) {
    %c0_i32 = arith.constant 0 : i32
    %c0_i32_0 = arith.constant 0 : i32
    %c0_i32_1 = arith.constant 0 : i32
    return %c0_i32, %c0_i32_0 : i32, i32
  }
  func.func @transform_2(%arg0: i32) -> (i32, i32) {
    %c0_i32 = arith.constant 0 : i32
    %c0_i32_0 = arith.constant 0 : i32
    %c0_i32_1 = arith.constant 0 : i32
    return %c0_i32, %c0_i32_0 : i32, i32
  }
  func.func @transform_3(%arg0: i32) -> (i32, i32) {
    %c0_i32 = arith.constant 0 : i32
    %c0_i32_0 = arith.constant 0 : i32
    return %arg0, %c0_i32 : i32, i32
  }
}

module attributes {stable_mosaic.version = 11 : i64} {
  func.func @_matmul_bias_act_kernel(%arg0: i32, %arg1: memref<512x72xbf16, #tpu.memory_space<vmem>>, %arg2: memref<72x16xbf16, #tpu.memory_space<vmem>>, %arg3: memref<1x16xf32, #tpu.memory_space<vmem>>, %arg4: memref<512x16xbf16, #tpu.memory_space<vmem>>) attributes {dimension_semantics = [#tpu.dimension_semantics<parallel>], iteration_bounds = array<i64: 1>, scalar_prefetch = 0 : i64, scratch_operands = 0 : i64, tpu.core_type = #tpu.core_type<tc>, window_params = [{transform_indices = @transform_0, window_bounds = array<i64: 512, 72>}, {pipeline_mode = #tpu.pipeline_mode<synchronous>, transform_indices = @transform_1, window_bounds = array<i64: 72, 16>}, {pipeline_mode = #tpu.pipeline_mode<synchronous>, transform_indices = @transform_2, window_bounds = array<i64: 1, 16>}, {transform_indices = @transform_3, window_bounds = array<i64: 512, 16>}]} {
    %c0 = arith.constant 0 : index
    %c0_0 = arith.constant 0 : index
    %0 = vector.load %arg1[%c0, %c0_0] : memref<512x72xbf16, #tpu.memory_space<vmem>>, vector<512x72xbf16>
    %c0_1 = arith.constant 0 : index
    %c0_2 = arith.constant 0 : index
    %1 = vector.load %arg2[%c0_1, %c0_2] : memref<72x16xbf16, #tpu.memory_space<vmem>>, vector<72x16xbf16>
    %cst = arith.constant dense<0.000000e+00> : vector<512x16xf32>
    %2 = tpu.matmul %0, %1, %cst {dimension_numbers = #tpu.dot_dimension_numbers<[1], [0], [0], [1], [0, 0, 1, 1], [], []>} : vector<512x72xbf16>, vector<72x16xbf16>, vector<512x16xf32> -> vector<512x16xf32>
    %c0_3 = arith.constant 0 : index
    %c0_4 = arith.constant 0 : index
    %3 = vector.load %arg3[%c0_3, %c0_4] : memref<1x16xf32, #tpu.memory_space<vmem>>, vector<1x16xf32>
    %4 = vector.broadcast %3 : vector<1x16xf32> to vector<512x16xf32>
    %5 = arith.addf %2, %4 : vector<512x16xf32>
    %cst_5 = arith.constant 0.000000e+00 : f32
    %6 = vector.broadcast %cst_5 : f32 to vector<512x16xf32>
    %7 = arith.maximumf %5, %6 : vector<512x16xf32>
    %8 = arith.truncf %7 : vector<512x16xf32> to vector<512x16xbf16>
    %c0_6 = arith.constant 0 : index
    %c0_7 = arith.constant 0 : index
    %9 = vector.load %arg4[%c0_6, %c0_7] : memref<512x16xbf16, #tpu.memory_space<vmem>>, vector<512x16xbf16>
    tpu.vector_store %arg4[%c0_6, %c0_7], %8 {strides = array<i32>} : memref<512x16xbf16, #tpu.memory_space<vmem>>, vector<512x16xbf16>,
    return
  }
  func.func @transform_0(%arg0: i32) -> (i32, i32) {
    %c0_i32 = arith.constant 0 : i32
    %c0_i32_0 = arith.constant 0 : i32
    return %arg0, %c0_i32 : i32, i32
  }
  func.func @transform_1(%arg0: i32) -> (i32, i32) {
    %c0_i32 = arith.constant 0 : i32
    %c0_i32_0 = arith.constant 0 : i32
    %c0_i32_1 = arith.constant 0 : i32
    return %c0_i32, %c0_i32_0 : i32, i32
  }
  func.func @transform_2(%arg0: i32) -> (i32, i32) {
    %c0_i32 = arith.constant 0 : i32
    %c0_i32_0 = arith.constant 0 : i32
    %c0_i32_1 = arith.constant 0 : i32
    return %c0_i32, %c0_i32_0 : i32, i32
  }
  func.func @transform_3(%arg0: i32) -> (i32, i32) {
    %c0_i32 = arith.constant 0 : i32
    %c0_i32_0 = arith.constant 0 : i32
    return %arg0, %c0_i32 : i32, i32
  }
}

module attributes {stable_mosaic.version = 11 : i64} {
  func.func @_matmul_bias_act_kernel(%arg0: i32, %arg1: memref<512x144xbf16, #tpu.memory_space<vmem>>, %arg2: memref<144x16xbf16, #tpu.memory_space<vmem>>, %arg3: memref<1x16xf32, #tpu.memory_space<vmem>>, %arg4: memref<512x16xbf16, #tpu.memory_space<vmem>>) attributes {dimension_semantics = [#tpu.dimension_semantics<parallel>], iteration_bounds = array<i64: 1>, scalar_prefetch = 0 : i64, scratch_operands = 0 : i64, tpu.core_type = #tpu.core_type<tc>, window_params = [{transform_indices = @transform_0, window_bounds = array<i64: 512, 144>}, {pipeline_mode = #tpu.pipeline_mode<synchronous>, transform_indices = @transform_1, window_bounds = array<i64: 144, 16>}, {pipeline_mode = #tpu.pipeline_mode<synchronous>, transform_indices = @transform_2, window_bounds = array<i64: 1, 16>}, {transform_indices = @transform_3, window_bounds = array<i64: 512, 16>}]} {
    %c0 = arith.constant 0 : index
    %c0_0 = arith.constant 0 : index
    %0 = vector.load %arg1[%c0, %c0_0] : memref<512x144xbf16, #tpu.memory_space<vmem>>, vector<512x144xbf16>
    %c0_1 = arith.constant 0 : index
    %c0_2 = arith.constant 0 : index
    %1 = vector.load %arg2[%c0_1, %c0_2] : memref<144x16xbf16, #tpu.memory_space<vmem>>, vector<144x16xbf16>
    %cst = arith.constant dense<0.000000e+00> : vector<512x16xf32>
    %2 = tpu.matmul %0, %1, %cst {dimension_numbers = #tpu.dot_dimension_numbers<[1], [0], [0], [1], [0, 0, 1, 1], [], []>} : vector<512x144xbf16>, vector<144x16xbf16>, vector<512x16xf32> -> vector<512x16xf32>
    %c0_3 = arith.constant 0 : index
    %c0_4 = arith.constant 0 : index
    %3 = vector.load %arg3[%c0_3, %c0_4] : memref<1x16xf32, #tpu.memory_space<vmem>>, vector<1x16xf32>
    %4 = vector.broadcast %3 : vector<1x16xf32> to vector<512x16xf32>
    %5 = arith.addf %2, %4 : vector<512x16xf32>
    %cst_5 = arith.constant 0.000000e+00 : f32
    %6 = vector.broadcast %cst_5 : f32 to vector<512x16xf32>
    %7 = arith.maximumf %5, %6 : vector<512x16xf32>
    %8 = arith.truncf %7 : vector<512x16xf32> to vector<512x16xbf16>
    %c0_6 = arith.constant 0 : index
    %c0_7 = arith.constant 0 : index
    %9 = vector.load %arg4[%c0_6, %c0_7] : memref<512x16xbf16, #tpu.memory_space<vmem>>, vector<512x16xbf16>
    tpu.vector_store %arg4[%c0_6, %c0_7], %8 {strides = array<i32>} : memref<512x16xbf16, #tpu.memory_space<vmem>>, vector<512x16xbf16>,
    return
  }
  func.func @transform_0(%arg0: i32) -> (i32, i32) {
    %c0_i32 = arith.constant 0 : i32
    %c0_i32_0 = arith.constant 0 : i32
    return %arg0, %c0_i32 : i32, i32
  }
  func.func @transform_1(%arg0: i32) -> (i32, i32) {
    %c0_i32 = arith.constant 0 : i32
    %c0_i32_0 = arith.constant 0 : i32
    %c0_i32_1 = arith.constant 0 : i32
    return %c0_i32, %c0_i32_0 : i32, i32
  }
  func.func @transform_2(%arg0: i32) -> (i32, i32) {
    %c0_i32 = arith.constant 0 : i32
    %c0_i32_0 = arith.constant 0 : i32
    %c0_i32_1 = arith.constant 0 : i32
    return %c0_i32, %c0_i32_0 : i32, i32
  }
  func.func @transform_3(%arg0: i32) -> (i32, i32) {
    %c0_i32 = arith.constant 0 : i32
    %c0_i32_0 = arith.constant 0 : i32
    return %arg0, %c0_i32 : i32, i32
  }
}

module attributes {stable_mosaic.version = 11 : i64} {
  func.func @_matmul_bias_act_kernel(%arg0: i32, %arg1: memref<128x144xbf16, #tpu.memory_space<vmem>>, %arg2: memref<144x32xbf16, #tpu.memory_space<vmem>>, %arg3: memref<1x32xf32, #tpu.memory_space<vmem>>, %arg4: memref<128x32xbf16, #tpu.memory_space<vmem>>) attributes {dimension_semantics = [#tpu.dimension_semantics<parallel>], iteration_bounds = array<i64: 1>, scalar_prefetch = 0 : i64, scratch_operands = 0 : i64, tpu.core_type = #tpu.core_type<tc>, window_params = [{transform_indices = @transform_0, window_bounds = array<i64: 128, 144>}, {pipeline_mode = #tpu.pipeline_mode<synchronous>, transform_indices = @transform_1, window_bounds = array<i64: 144, 32>}, {pipeline_mode = #tpu.pipeline_mode<synchronous>, transform_indices = @transform_2, window_bounds = array<i64: 1, 32>}, {transform_indices = @transform_3, window_bounds = array<i64: 128, 32>}]} {
    %c0 = arith.constant 0 : index
    %c0_0 = arith.constant 0 : index
    %0 = vector.load %arg1[%c0, %c0_0] : memref<128x144xbf16, #tpu.memory_space<vmem>>, vector<128x144xbf16>
    %c0_1 = arith.constant 0 : index
    %c0_2 = arith.constant 0 : index
    %1 = vector.load %arg2[%c0_1, %c0_2] : memref<144x32xbf16, #tpu.memory_space<vmem>>, vector<144x32xbf16>
    %cst = arith.constant dense<0.000000e+00> : vector<128x32xf32>
    %2 = tpu.matmul %0, %1, %cst {dimension_numbers = #tpu.dot_dimension_numbers<[1], [0], [0], [1], [0, 0, 1, 1], [], []>} : vector<128x144xbf16>, vector<144x32xbf16>, vector<128x32xf32> -> vector<128x32xf32>
    %c0_3 = arith.constant 0 : index
    %c0_4 = arith.constant 0 : index
    %3 = vector.load %arg3[%c0_3, %c0_4] : memref<1x32xf32, #tpu.memory_space<vmem>>, vector<1x32xf32>
    %4 = vector.broadcast %3 : vector<1x32xf32> to vector<128x32xf32>
    %5 = arith.addf %2, %4 : vector<128x32xf32>
    %cst_5 = arith.constant 0.000000e+00 : f32
    %6 = vector.broadcast %cst_5 : f32 to vector<128x32xf32>
    %7 = arith.maximumf %5, %6 : vector<128x32xf32>
    %8 = arith.truncf %7 : vector<128x32xf32> to vector<128x32xbf16>
    %c0_6 = arith.constant 0 : index
    %c0_7 = arith.constant 0 : index
    %9 = vector.load %arg4[%c0_6, %c0_7] : memref<128x32xbf16, #tpu.memory_space<vmem>>, vector<128x32xbf16>
    tpu.vector_store %arg4[%c0_6, %c0_7], %8 {strides = array<i32>} : memref<128x32xbf16, #tpu.memory_space<vmem>>, vector<128x32xbf16>,
    return
  }
  func.func @transform_0(%arg0: i32) -> (i32, i32) {
    %c0_i32 = arith.constant 0 : i32
    %c0_i32_0 = arith.constant 0 : i32
    return %arg0, %c0_i32 : i32, i32
  }
  func.func @transform_1(%arg0: i32) -> (i32, i32) {
    %c0_i32 = arith.constant 0 : i32
    %c0_i32_0 = arith.constant 0 : i32
    %c0_i32_1 = arith.constant 0 : i32
    return %c0_i32, %c0_i32_0 : i32, i32
  }
  func.func @transform_2(%arg0: i32) -> (i32, i32) {
    %c0_i32 = arith.constant 0 : i32
    %c0_i32_0 = arith.constant 0 : i32
    %c0_i32_1 = arith.constant 0 : i32
    return %c0_i32, %c0_i32_0 : i32, i32
  }
  func.func @transform_3(%arg0: i32) -> (i32, i32) {
    %c0_i32 = arith.constant 0 : i32
    %c0_i32_0 = arith.constant 0 : i32
    return %arg0, %c0_i32 : i32, i32
  }
}

module attributes {stable_mosaic.version = 11 : i64} {
  func.func @_matmul_bias_act_kernel(%arg0: i32, %arg1: memref<128x288xbf16, #tpu.memory_space<vmem>>, %arg2: memref<288x32xbf16, #tpu.memory_space<vmem>>, %arg3: memref<1x32xf32, #tpu.memory_space<vmem>>, %arg4: memref<128x32xbf16, #tpu.memory_space<vmem>>) attributes {dimension_semantics = [#tpu.dimension_semantics<parallel>], iteration_bounds = array<i64: 1>, scalar_prefetch = 0 : i64, scratch_operands = 0 : i64, tpu.core_type = #tpu.core_type<tc>, window_params = [{transform_indices = @transform_0, window_bounds = array<i64: 128, 288>}, {pipeline_mode = #tpu.pipeline_mode<synchronous>, transform_indices = @transform_1, window_bounds = array<i64: 288, 32>}, {pipeline_mode = #tpu.pipeline_mode<synchronous>, transform_indices = @transform_2, window_bounds = array<i64: 1, 32>}, {transform_indices = @transform_3, window_bounds = array<i64: 128, 32>}]} {
    %c0 = arith.constant 0 : index
    %c0_0 = arith.constant 0 : index
    %0 = vector.load %arg1[%c0, %c0_0] : memref<128x288xbf16, #tpu.memory_space<vmem>>, vector<128x288xbf16>
    %c0_1 = arith.constant 0 : index
    %c0_2 = arith.constant 0 : index
    %1 = vector.load %arg2[%c0_1, %c0_2] : memref<288x32xbf16, #tpu.memory_space<vmem>>, vector<288x32xbf16>
    %cst = arith.constant dense<0.000000e+00> : vector<128x32xf32>
    %2 = tpu.matmul %0, %1, %cst {dimension_numbers = #tpu.dot_dimension_numbers<[1], [0], [0], [1], [0, 0, 1, 1], [], []>} : vector<128x288xbf16>, vector<288x32xbf16>, vector<128x32xf32> -> vector<128x32xf32>
    %c0_3 = arith.constant 0 : index
    %c0_4 = arith.constant 0 : index
    %3 = vector.load %arg3[%c0_3, %c0_4] : memref<1x32xf32, #tpu.memory_space<vmem>>, vector<1x32xf32>
    %4 = vector.broadcast %3 : vector<1x32xf32> to vector<128x32xf32>
    %5 = arith.addf %2, %4 : vector<128x32xf32>
    %cst_5 = arith.constant 0.000000e+00 : f32
    %6 = vector.broadcast %cst_5 : f32 to vector<128x32xf32>
    %7 = arith.maximumf %5, %6 : vector<128x32xf32>
    %8 = arith.truncf %7 : vector<128x32xf32> to vector<128x32xbf16>
    %c0_6 = arith.constant 0 : index
    %c0_7 = arith.constant 0 : index
    %9 = vector.load %arg4[%c0_6, %c0_7] : memref<128x32xbf16, #tpu.memory_space<vmem>>, vector<128x32xbf16>
    tpu.vector_store %arg4[%c0_6, %c0_7], %8 {strides = array<i32>} : memref<128x32xbf16, #tpu.memory_space<vmem>>, vector<128x32xbf16>,
    return
  }
  func.func @transform_0(%arg0: i32) -> (i32, i32) {
    %c0_i32 = arith.constant 0 : i32
    %c0_i32_0 = arith.constant 0 : i32
    return %arg0, %c0_i32 : i32, i32
  }
  func.func @transform_1(%arg0: i32) -> (i32, i32) {
    %c0_i32 = arith.constant 0 : i32
    %c0_i32_0 = arith.constant 0 : i32
    %c0_i32_1 = arith.constant 0 : i32
    return %c0_i32, %c0_i32_0 : i32, i32
  }
  func.func @transform_2(%arg0: i32) -> (i32, i32) {
    %c0_i32 = arith.constant 0 : i32
    %c0_i32_0 = arith.constant 0 : i32
    %c0_i32_1 = arith.constant 0 : i32
    return %c0_i32, %c0_i32_0 : i32, i32
  }
  func.func @transform_3(%arg0: i32) -> (i32, i32) {
    %c0_i32 = arith.constant 0 : i32
    %c0_i32_0 = arith.constant 0 : i32
    return %arg0, %c0_i32 : i32, i32
  }
}

module attributes {stable_mosaic.version = 11 : i64} {
  func.func @_matmul_bias_act_kernel(%arg0: i32, %arg1: memref<32x288xbf16, #tpu.memory_space<vmem>>, %arg2: memref<288x32xbf16, #tpu.memory_space<vmem>>, %arg3: memref<1x32xf32, #tpu.memory_space<vmem>>, %arg4: memref<32x32xbf16, #tpu.memory_space<vmem>>) attributes {dimension_semantics = [#tpu.dimension_semantics<parallel>], iteration_bounds = array<i64: 1>, scalar_prefetch = 0 : i64, scratch_operands = 0 : i64, tpu.core_type = #tpu.core_type<tc>, window_params = [{transform_indices = @transform_0, window_bounds = array<i64: 32, 288>}, {pipeline_mode = #tpu.pipeline_mode<synchronous>, transform_indices = @transform_1, window_bounds = array<i64: 288, 32>}, {pipeline_mode = #tpu.pipeline_mode<synchronous>, transform_indices = @transform_2, window_bounds = array<i64: 1, 32>}, {transform_indices = @transform_3, window_bounds = array<i64: 32, 32>}]} {
    %c0 = arith.constant 0 : index
    %c0_0 = arith.constant 0 : index
    %0 = vector.load %arg1[%c0, %c0_0] : memref<32x288xbf16, #tpu.memory_space<vmem>>, vector<32x288xbf16>
    %c0_1 = arith.constant 0 : index
    %c0_2 = arith.constant 0 : index
    %1 = vector.load %arg2[%c0_1, %c0_2] : memref<288x32xbf16, #tpu.memory_space<vmem>>, vector<288x32xbf16>
    %cst = arith.constant dense<0.000000e+00> : vector<32x32xf32>
    %2 = tpu.matmul %0, %1, %cst {dimension_numbers = #tpu.dot_dimension_numbers<[1], [0], [0], [1], [0, 0, 1, 1], [], []>} : vector<32x288xbf16>, vector<288x32xbf16>, vector<32x32xf32> -> vector<32x32xf32>
    %c0_3 = arith.constant 0 : index
    %c0_4 = arith.constant 0 : index
    %3 = vector.load %arg3[%c0_3, %c0_4] : memref<1x32xf32, #tpu.memory_space<vmem>>, vector<1x32xf32>
    %4 = vector.broadcast %3 : vector<1x32xf32> to vector<32x32xf32>
    %5 = arith.addf %2, %4 : vector<32x32xf32>
    %cst_5 = arith.constant 0.000000e+00 : f32
    %6 = vector.broadcast %cst_5 : f32 to vector<32x32xf32>
    %7 = arith.maximumf %5, %6 : vector<32x32xf32>
    %8 = arith.truncf %7 : vector<32x32xf32> to vector<32x32xbf16>
    %c0_6 = arith.constant 0 : index
    %c0_7 = arith.constant 0 : index
    %9 = vector.load %arg4[%c0_6, %c0_7] : memref<32x32xbf16, #tpu.memory_space<vmem>>, vector<32x32xbf16>
    tpu.vector_store %arg4[%c0_6, %c0_7], %8 {strides = array<i32>} : memref<32x32xbf16, #tpu.memory_space<vmem>>, vector<32x32xbf16>,
    return
  }
  func.func @transform_0(%arg0: i32) -> (i32, i32) {
    %c0_i32 = arith.constant 0 : i32
    %c0_i32_0 = arith.constant 0 : i32
    return %arg0, %c0_i32 : i32, i32
  }
  func.func @transform_1(%arg0: i32) -> (i32, i32) {
    %c0_i32 = arith.constant 0 : i32
    %c0_i32_0 = arith.constant 0 : i32
    %c0_i32_1 = arith.constant 0 : i32
    return %c0_i32, %c0_i32_0 : i32, i32
  }
  func.func @transform_2(%arg0: i32) -> (i32, i32) {
    %c0_i32 = arith.constant 0 : i32
    %c0_i32_0 = arith.constant 0 : i32
    %c0_i32_1 = arith.constant 0 : i32
    return %c0_i32, %c0_i32_0 : i32, i32
  }
  func.func @transform_3(%arg0: i32) -> (i32, i32) {
    %c0_i32 = arith.constant 0 : i32
    %c0_i32_0 = arith.constant 0 : i32
    return %arg0, %c0_i32 : i32, i32
  }
}

module attributes {stable_mosaic.version = 11 : i64} {
  func.func @_matmul_bias_act_kernel(%arg0: i32, %arg1: memref<16x288xbf16, #tpu.memory_space<vmem>>, %arg2: memref<288x32xbf16, #tpu.memory_space<vmem>>, %arg3: memref<1x32xf32, #tpu.memory_space<vmem>>, %arg4: memref<16x32xbf16, #tpu.memory_space<vmem>>) attributes {dimension_semantics = [#tpu.dimension_semantics<parallel>], iteration_bounds = array<i64: 1>, scalar_prefetch = 0 : i64, scratch_operands = 0 : i64, tpu.core_type = #tpu.core_type<tc>, window_params = [{transform_indices = @transform_0, window_bounds = array<i64: 16, 288>}, {pipeline_mode = #tpu.pipeline_mode<synchronous>, transform_indices = @transform_1, window_bounds = array<i64: 288, 32>}, {pipeline_mode = #tpu.pipeline_mode<synchronous>, transform_indices = @transform_2, window_bounds = array<i64: 1, 32>}, {transform_indices = @transform_3, window_bounds = array<i64: 16, 32>}]} {
    %c0 = arith.constant 0 : index
    %c0_0 = arith.constant 0 : index
    %0 = vector.load %arg1[%c0, %c0_0] : memref<16x288xbf16, #tpu.memory_space<vmem>>, vector<16x288xbf16>
    %c0_1 = arith.constant 0 : index
    %c0_2 = arith.constant 0 : index
    %1 = vector.load %arg2[%c0_1, %c0_2] : memref<288x32xbf16, #tpu.memory_space<vmem>>, vector<288x32xbf16>
    %cst = arith.constant dense<0.000000e+00> : vector<16x32xf32>
    %2 = tpu.matmul %0, %1, %cst {dimension_numbers = #tpu.dot_dimension_numbers<[1], [0], [0], [1], [0, 0, 1, 1], [], []>} : vector<16x288xbf16>, vector<288x32xbf16>, vector<16x32xf32> -> vector<16x32xf32>
    %c0_3 = arith.constant 0 : index
    %c0_4 = arith.constant 0 : index
    %3 = vector.load %arg3[%c0_3, %c0_4] : memref<1x32xf32, #tpu.memory_space<vmem>>, vector<1x32xf32>
    %4 = vector.broadcast %3 : vector<1x32xf32> to vector<16x32xf32>
    %5 = arith.addf %2, %4 : vector<16x32xf32>
    %cst_5 = arith.constant 0.000000e+00 : f32
    %6 = vector.broadcast %cst_5 : f32 to vector<16x32xf32>
    %7 = arith.maximumf %5, %6 : vector<16x32xf32>
    %8 = arith.truncf %7 : vector<16x32xf32> to vector<16x32xbf16>
    %c0_6 = arith.constant 0 : index
    %c0_7 = arith.constant 0 : index
    %9 = vector.load %arg4[%c0_6, %c0_7] : memref<16x32xbf16, #tpu.memory_space<vmem>>, vector<16x32xbf16>
    tpu.vector_store %arg4[%c0_6, %c0_7], %8 {strides = array<i32>} : memref<16x32xbf16, #tpu.memory_space<vmem>>, vector<16x32xbf16>,
    return
  }
  func.func @transform_0(%arg0: i32) -> (i32, i32) {
    %c0_i32 = arith.constant 0 : i32
    %c0_i32_0 = arith.constant 0 : i32
    return %arg0, %c0_i32 : i32, i32
  }
  func.func @transform_1(%arg0: i32) -> (i32, i32) {
    %c0_i32 = arith.constant 0 : i32
    %c0_i32_0 = arith.constant 0 : i32
    %c0_i32_1 = arith.constant 0 : i32
    return %c0_i32, %c0_i32_0 : i32, i32
  }
  func.func @transform_2(%arg0: i32) -> (i32, i32) {
    %c0_i32 = arith.constant 0 : i32
    %c0_i32_0 = arith.constant 0 : i32
    %c0_i32_1 = arith.constant 0 : i32
    return %c0_i32, %c0_i32_0 : i32, i32
  }
  func.func @transform_3(%arg0: i32) -> (i32, i32) {
    %c0_i32 = arith.constant 0 : i32
    %c0_i32_0 = arith.constant 0 : i32
    return %arg0, %c0_i32 : i32, i32
  }
}

module attributes {stable_mosaic.version = 11 : i64} {
  func.func @_matmul_bias_act_kernel(%arg0: i32, %arg1: memref<16x32xbf16, #tpu.memory_space<vmem>>, %arg2: memref<32x64xbf16, #tpu.memory_space<vmem>>, %arg3: memref<1x64xf32, #tpu.memory_space<vmem>>, %arg4: memref<16x64xbf16, #tpu.memory_space<vmem>>) attributes {dimension_semantics = [#tpu.dimension_semantics<parallel>], iteration_bounds = array<i64: 1>, scalar_prefetch = 0 : i64, scratch_operands = 0 : i64, tpu.core_type = #tpu.core_type<tc>, window_params = [{transform_indices = @transform_0, window_bounds = array<i64: 16, 32>}, {pipeline_mode = #tpu.pipeline_mode<synchronous>, transform_indices = @transform_1, window_bounds = array<i64: 32, 64>}, {pipeline_mode = #tpu.pipeline_mode<synchronous>, transform_indices = @transform_2, window_bounds = array<i64: 1, 64>}, {transform_indices = @transform_3, window_bounds = array<i64: 16, 64>}]} {
    %c0 = arith.constant 0 : index
    %c0_0 = arith.constant 0 : index
    %0 = vector.load %arg1[%c0, %c0_0] : memref<16x32xbf16, #tpu.memory_space<vmem>>, vector<16x32xbf16>
    %c0_1 = arith.constant 0 : index
    %c0_2 = arith.constant 0 : index
    %1 = vector.load %arg2[%c0_1, %c0_2] : memref<32x64xbf16, #tpu.memory_space<vmem>>, vector<32x64xbf16>
    %cst = arith.constant dense<0.000000e+00> : vector<16x64xf32>
    %2 = tpu.matmul %0, %1, %cst {dimension_numbers = #tpu.dot_dimension_numbers<[1], [0], [0], [1], [0, 0, 1, 1], [], []>} : vector<16x32xbf16>, vector<32x64xbf16>, vector<16x64xf32> -> vector<16x64xf32>
    %c0_3 = arith.constant 0 : index
    %c0_4 = arith.constant 0 : index
    %3 = vector.load %arg3[%c0_3, %c0_4] : memref<1x64xf32, #tpu.memory_space<vmem>>, vector<1x64xf32>
    %4 = vector.broadcast %3 : vector<1x64xf32> to vector<16x64xf32>
    %5 = arith.addf %2, %4 : vector<16x64xf32>
    %cst_5 = arith.constant 0.000000e+00 : f32
    %6 = vector.broadcast %cst_5 : f32 to vector<16x64xf32>
    %7 = arith.maximumf %5, %6 : vector<16x64xf32>
    %8 = arith.truncf %7 : vector<16x64xf32> to vector<16x64xbf16>
    %c0_6 = arith.constant 0 : index
    %c0_7 = arith.constant 0 : index
    %9 = vector.load %arg4[%c0_6, %c0_7] : memref<16x64xbf16, #tpu.memory_space<vmem>>, vector<16x64xbf16>
    tpu.vector_store %arg4[%c0_6, %c0_7], %8 {strides = array<i32>} : memref<16x64xbf16, #tpu.memory_space<vmem>>, vector<16x64xbf16>,
    return
  }
  func.func @transform_0(%arg0: i32) -> (i32, i32) {
    %c0_i32 = arith.constant 0 : i32
    %c0_i32_0 = arith.constant 0 : i32
    return %arg0, %c0_i32 : i32, i32
  }
  func.func @transform_1(%arg0: i32) -> (i32, i32) {
    %c0_i32 = arith.constant 0 : i32
    %c0_i32_0 = arith.constant 0 : i32
    %c0_i32_1 = arith.constant 0 : i32
    return %c0_i32, %c0_i32_0 : i32, i32
  }
  func.func @transform_2(%arg0: i32) -> (i32, i32) {
    %c0_i32 = arith.constant 0 : i32
    %c0_i32_0 = arith.constant 0 : i32
    %c0_i32_1 = arith.constant 0 : i32
    return %c0_i32, %c0_i32_0 : i32, i32
  }
  func.func @transform_3(%arg0: i32) -> (i32, i32) {
    %c0_i32 = arith.constant 0 : i32
    %c0_i32_0 = arith.constant 0 : i32
    return %arg0, %c0_i32 : i32, i32
  }
}

module attributes {stable_mosaic.version = 11 : i64} {
  func.func @_matmul_bias_act_kernel(%arg0: i32, %arg1: memref<16x64xbf16, #tpu.memory_space<vmem>>, %arg2: memref<64x64xbf16, #tpu.memory_space<vmem>>, %arg3: memref<1x64xf32, #tpu.memory_space<vmem>>, %arg4: memref<16x64xbf16, #tpu.memory_space<vmem>>) attributes {dimension_semantics = [#tpu.dimension_semantics<parallel>], iteration_bounds = array<i64: 1>, scalar_prefetch = 0 : i64, scratch_operands = 0 : i64, tpu.core_type = #tpu.core_type<tc>, window_params = [{transform_indices = @transform_0, window_bounds = array<i64: 16, 64>}, {pipeline_mode = #tpu.pipeline_mode<synchronous>, transform_indices = @transform_1, window_bounds = array<i64: 64, 64>}, {pipeline_mode = #tpu.pipeline_mode<synchronous>, transform_indices = @transform_2, window_bounds = array<i64: 1, 64>}, {transform_indices = @transform_3, window_bounds = array<i64: 16, 64>}]} {
    %c0 = arith.constant 0 : index
    %c0_0 = arith.constant 0 : index
    %0 = vector.load %arg1[%c0, %c0_0] : memref<16x64xbf16, #tpu.memory_space<vmem>>, vector<16x64xbf16>
    %c0_1 = arith.constant 0 : index
    %c0_2 = arith.constant 0 : index
    %1 = vector.load %arg2[%c0_1, %c0_2] : memref<64x64xbf16, #tpu.memory_space<vmem>>, vector<64x64xbf16>
    %cst = arith.constant dense<0.000000e+00> : vector<16x64xf32>
    %2 = tpu.matmul %0, %1, %cst {dimension_numbers = #tpu.dot_dimension_numbers<[1], [0], [0], [1], [0, 0, 1, 1], [], []>} : vector<16x64xbf16>, vector<64x64xbf16>, vector<16x64xf32> -> vector<16x64xf32>
    %c0_3 = arith.constant 0 : index
    %c0_4 = arith.constant 0 : index
    %3 = vector.load %arg3[%c0_3, %c0_4] : memref<1x64xf32, #tpu.memory_space<vmem>>, vector<1x64xf32>
    %4 = vector.broadcast %3 : vector<1x64xf32> to vector<16x64xf32>
    %5 = arith.addf %2, %4 : vector<16x64xf32>
    %cst_5 = arith.constant 0.000000e+00 : f32
    %6 = vector.broadcast %cst_5 : f32 to vector<16x64xf32>
    %7 = arith.maximumf %5, %6 : vector<16x64xf32>
    %8 = arith.truncf %7 : vector<16x64xf32> to vector<16x64xbf16>
    %c0_6 = arith.constant 0 : index
    %c0_7 = arith.constant 0 : index
    %9 = vector.load %arg4[%c0_6, %c0_7] : memref<16x64xbf16, #tpu.memory_space<vmem>>, vector<16x64xbf16>
    tpu.vector_store %arg4[%c0_6, %c0_7], %8 {strides = array<i32>} : memref<16x64xbf16, #tpu.memory_space<vmem>>, vector<16x64xbf16>,
    return
  }
  func.func @transform_0(%arg0: i32) -> (i32, i32) {
    %c0_i32 = arith.constant 0 : i32
    %c0_i32_0 = arith.constant 0 : i32
    return %arg0, %c0_i32 : i32, i32
  }
  func.func @transform_1(%arg0: i32) -> (i32, i32) {
    %c0_i32 = arith.constant 0 : i32
    %c0_i32_0 = arith.constant 0 : i32
    %c0_i32_1 = arith.constant 0 : i32
    return %c0_i32, %c0_i32_0 : i32, i32
  }
  func.func @transform_2(%arg0: i32) -> (i32, i32) {
    %c0_i32 = arith.constant 0 : i32
    %c0_i32_0 = arith.constant 0 : i32
    %c0_i32_1 = arith.constant 0 : i32
    return %c0_i32, %c0_i32_0 : i32, i32
  }
  func.func @transform_3(%arg0: i32) -> (i32, i32) {
    %c0_i32 = arith.constant 0 : i32
    %c0_i32_0 = arith.constant 0 : i32
    return %arg0, %c0_i32 : i32, i32
  }
}

module attributes {stable_mosaic.version = 11 : i64} {
  func.func @_matmul_bias_act_kernel(%arg0: i32, %arg1: memref<16x64xbf16, #tpu.memory_space<vmem>>, %arg2: memref<64x100xbf16, #tpu.memory_space<vmem>>, %arg3: memref<1x100xf32, #tpu.memory_space<vmem>>, %arg4: memref<16x100xf32, #tpu.memory_space<vmem>>) attributes {dimension_semantics = [#tpu.dimension_semantics<parallel>], iteration_bounds = array<i64: 1>, scalar_prefetch = 0 : i64, scratch_operands = 0 : i64, tpu.core_type = #tpu.core_type<tc>, window_params = [{transform_indices = @transform_0, window_bounds = array<i64: 16, 64>}, {pipeline_mode = #tpu.pipeline_mode<synchronous>, transform_indices = @transform_1, window_bounds = array<i64: 64, 100>}, {pipeline_mode = #tpu.pipeline_mode<synchronous>, transform_indices = @transform_2, window_bounds = array<i64: 1, 100>}, {transform_indices = @transform_3, window_bounds = array<i64: 16, 100>}]} {
    %c0 = arith.constant 0 : index
    %c0_0 = arith.constant 0 : index
    %0 = vector.load %arg1[%c0, %c0_0] : memref<16x64xbf16, #tpu.memory_space<vmem>>, vector<16x64xbf16>
    %c0_1 = arith.constant 0 : index
    %c0_2 = arith.constant 0 : index
    %1 = vector.load %arg2[%c0_1, %c0_2] : memref<64x100xbf16, #tpu.memory_space<vmem>>, vector<64x100xbf16>
    %cst = arith.constant dense<0.000000e+00> : vector<16x100xf32>
    %2 = tpu.matmul %0, %1, %cst {dimension_numbers = #tpu.dot_dimension_numbers<[1], [0], [0], [1], [0, 0, 1, 1], [], []>} : vector<16x64xbf16>, vector<64x100xbf16>, vector<16x100xf32> -> vector<16x100xf32>
    %c0_3 = arith.constant 0 : index
    %c0_4 = arith.constant 0 : index
    %3 = vector.load %arg3[%c0_3, %c0_4] : memref<1x100xf32, #tpu.memory_space<vmem>>, vector<1x100xf32>
    %4 = vector.broadcast %3 : vector<1x100xf32> to vector<16x100xf32>
    %5 = arith.addf %2, %4 : vector<16x100xf32>
    %c0_5 = arith.constant 0 : index
    %c0_6 = arith.constant 0 : index
    %6 = vector.load %arg4[%c0_5, %c0_6] : memref<16x100xf32, #tpu.memory_space<vmem>>, vector<16x100xf32>
    tpu.vector_store %arg4[%c0_5, %c0_6], %5 {strides = array<i32>} : memref<16x100xf32, #tpu.memory_space<vmem>>, vector<16x100xf32>,
    return
  }
  func.func @transform_0(%arg0: i32) -> (i32, i32) {
    %c0_i32 = arith.constant 0 : i32
    %c0_i32_0 = arith.constant 0 : i32
    return %arg0, %c0_i32 : i32, i32
  }
  func.func @transform_1(%arg0: i32) -> (i32, i32) {
    %c0_i32 = arith.constant 0 : i32
    %c0_i32_0 = arith.constant 0 : i32
    %c0_i32_1 = arith.constant 0 : i32
    return %c0_i32, %c0_i32_0 : i32, i32
  }
  func.func @transform_2(%arg0: i32) -> (i32, i32) {
    %c0_i32 = arith.constant 0 : i32
    %c0_i32_0 = arith.constant 0 : i32
    %c0_i32_1 = arith.constant 0 : i32
    return %c0_i32, %c0_i32_0 : i32, i32
  }
  func.func @transform_3(%arg0: i32) -> (i32, i32) {
    %c0_i32 = arith.constant 0 : i32
    %c0_i32_0 = arith.constant 0 : i32
    return %arg0, %c0_i32 : i32, i32
  }
}

</mosaic_0001>

<bundles_post_ra>
// kernel: vggnet_modified_forward.16
= control target key start
LH: loop header
LB: loop body
LE: loop exit
PB: predicated region body
PF: predicated region fallthrough
CT: control target
= control target key end

     0   :  { %8 = vsyncpa [#allocation3], 0  ;;  %s2462_s0 = inlined_call_operand.hbm [shape: bf16[2048,27], index: 0, kind: input, shape index: {}]   ;;  %s2463_s1 = inlined_call_operand.hbm [shape: bf16[27,8], index: 1, kind: input, shape index: {}]   ;;  %s2464_s2 = inlined_call_operand.hbm [shape: f32[1,8], index: 2, kind: input, shape index: {}]   ;;  %s2465_s3 = inlined_call_operand.hbm [shape: bf16[2048,8], index: 3, kind: output, shape index: {}]  }
   0x1   :  { %10 = vsyncpa [#allocation3 + $0x1], 0 }
   0x2   :  { %11 = vsyncpa [#allocation6], 0 }
   0x3   :  { %12 = vsyncpa [#allocation4], 0 }
   0x4   :  { %14 = vsyncpa [#allocation4 + $0x1], 0  ;;  %s1963_s12 = smov 0   ;;  %s1965_s13 = smov 0  }
   0x5   :  { %s1967_s14 = smov 0   ;;  %s1969_s15 = smov 0  }
   0x6 LB: > { %s1984_s16 = sadd.s32 4294967295, %s1932_s15   ;;  %s1349_s17 = sadd.s32 4294967294, %s1932_s15   ;;  %s1932_s15 = sphi %s1969_s15, %s2484_s15   ;;  %s1928_s14 = sphi %s1967_s14, %s2483_s14   ;;  %s1924_s13 = sphi %s1965_s13, %s2482_s13   ;;  %s1920_s12 = sphi %s1963_s12, %s2481_s12  }
   0x7   : > { %p40_p0 = scmp.ne.s32.totalorder %s1924_s13, %s1920_s12  ;;  %p2466_p1 = scmp.eq.s32.totalorder %s1984_s16, 0 }
   0x8   : > { %p112_p3 = scmp.eq.s32.totalorder %s1349_s17, 3  ;;  %p1350_p5 = scmp.ge.s32.totalorder %s1932_s15, 1 }
   0x9   : > { %p1993_p4 = por %p2466_p1, %p40_p0  ;;  %p119_p7 = scmp.lt.s32.totalorder %s1932_s15, 5 }
   0xa   : > { %p1998_p6 = por %p112_p3, %p40_p0  ;;  %s1934_s21 = smov [#allocation5]  }
   0xb   : > { %s2469_s18 = scalar_select %p1993_p4, 1, 0 }
   0xc   : > { %s2470_s19 = scalar_select %p1998_p6, 1, 0 }
   0xd   : > { %p2003_p8 = pnand %p1350_p5, %p119_p7  ;;  %s131_s22 = sshll.u32 %s1934_s21, 4  ;;  %s132_s22 = int_to_ptr.vmem [resolvable:$true] %s131_s22 }
   0xe   : > { %s1935_s24 = smov [#allocation7]   ;;  %s1776_s28 = scalar_lea.hbm %s2463_s1, 256 }
   0xf   : > { %s2471_s20 = scalar_select %p2003_p8, 1, 0 }
  0x10   : > { %p1682_p9 = pneg %p2003_p8  ;;  %s145_s25 = sshll.u32 %s1935_s24, 4  ;;  %s2015_s25 = int_to_ptr.vmem [resolvable:$true] %s145_s25 }
  0x11   : > { %p1777_p11 = scmp.ne.s32.totalorder %s2463_s1, %s1776_s28  ;;  %p1783_p3 = scmp.lt.u32.totalorder %s1776_s28, %s2463_s1 }
  0x12   : > { %p2011_p10 = pnand %p1682_p9, %p2466_p1 }
  0x14   : > { %p1778_p12 = pneg %p2011_p10 }
  0x16   : > { %p1779_p13 = pnand %p1778_p12, %p1777_p11 }
  0x18   : > { %p1780_p0 = pneg %p1779_p13 }
  0x1a   : > { %p1785_p5 = pnand %p1783_p3, %p1780_p0 }
  0x1c   : > { %1788 = shalt.err (!%p1785_p5)
}
  0x1d   : > { %s1789_s6 = scalar_lea.vmem %s132_s22, 256  ;;  %p1797_p2 = scmp.lt.s32.totalorder %s132_s22, %s132_s22 }
  0x1e   : > { %p1790_p7 = scmp.ne.s32.totalorder %s132_s22, %s1789_s6  ;;  %p1798_p6 = scmp.lt.s32.totalorder %s1789_s6, %s1789_s6 }
  0x20   : > { %p1792_p9 = pnand %p1790_p7, %p1778_p12  ;;  %p1799_p4 = por %p1798_p6, %p1797_p2 }
  0x22   : > { %p1793_p1 = pneg %p1792_p9 }
  0x24   : > { %p1800_p8 = pnand %p1799_p4, %p1793_p1 }
  0x26   : > { %1803 = shalt.err (!%p1800_p8)
}
  0x27   : > { %s1936_s7 = smov 64   ;;  %s1937_s8 = smov 4  }
  0x28   : > { %1685 = dma.hbm_to_vmem [thread:$0]  (!%p2011_p10), %s2463_s1, 256, %s132_s22, [#allocation6], %s1936_s7, %s1936_s7, %s1937_s8  }
  0x29   : > { %s1804_s21 = scalar_lea.hbm %s2464_s2, 16 }
  0x2a   : > { %p1805_p1 = scmp.ne.s32.totalorder %s2464_s2, %s1804_s21  ;;  %p1811_p6 = scmp.lt.u32.totalorder %s1804_s21, %s2464_s2 }
  0x2c   : > { %p1807_p2 = pnand %p1805_p1, %p1778_p12 }
  0x2e   : > { %p1808_p4 = pneg %p1807_p2 }
  0x30   : > { %p1813_p8 = pnand %p1811_p6, %p1808_p4 }
  0x32   : > { %1816 = shalt.err (!%p1813_p8)
}
  0x33   : > { %s1817_s22 = scalar_lea.vmem %s2015_s25, 16  ;;  %s1824_s29 = scalar_lea.vmem %s2015_s25, 32 }
  0x34   : > { %p1818_p11 = scmp.ne.s32.totalorder %s2015_s25, %s1817_s22  ;;  %p1825_p3 = scmp.lt.s32.totalorder %s2015_s25, %s2015_s25 }
  0x35   : > { %p1826_p5 = scmp.lt.s32.totalorder %s1824_s29, %s1817_s22 }
  0x36   : > { %p1820_p13 = pnand %p1818_p11, %p1778_p12 }
  0x37   : > { %p1827_p7 = por %p1826_p5, %p1825_p3 }
  0x38   : > { %p1821_p0 = pneg %p1820_p13 }
  0x3a   : > { %p1828_p9 = pnand %p1827_p7, %p1821_p0 }
  0x3c   : > { %1831 = shalt.err (!%p1828_p9)
}
  0x3d   : > { %1688 = dma.hbm_to_vmem [thread:$0]  (!%p2011_p10), %s2464_s2, 16, %s2015_s25, [#allocation6]  }
  0x3e   : > { %s2069_s5 = sadd.s32 1, %s1932_s15   ;;  %s27_s23 = sadd.s32 1, %s1928_s14 }
  0x3f   : > { %s24_s6 = ssub.s32 %s1932_s15, %s2069_s5  ;;  %p34_p12 = scmp.ne.s32.totalorder %s1928_s14, %s1924_s13 }
  0x40   : > { %p25_p1 = scmp.eq.s32.totalorder %s24_s6, 0  ;;  %p35_p2 = scmp.eq.s32.totalorder %s1932_s15, 0 }
  0x41   : > { %p2473_p4 = scmp.eq.s32.totalorder %s1984_s16, 3  ;;  %p1699_p8 = scmp.lt.s32.totalorder %s1932_s15, 4 }
  0x42   : > { %s2085_s10 = scalar_select %p25_p1, %s1928_s14, %s27_s23  }
  0x43   : > { %p2079_p6 = por %p2473_p4, %p34_p12  ;;  %p36_p11 = por %p35_p2, %p34_p12 }
  0x44   : > { %s156_s11 = sand.u32 1, %s1928_s14   ;;  %s1498_s25 = sshll.u32 %s1932_s15, 12 }
  0x45   : > { %s1354_s17 = sshll.u32 %s156_s11, 8  ;;  %s2092_s26 = scalar_lea.hbm %s2462_s0, %s1498_s25 }
  0x46   : > { %s160_s27 = scalar_lea.vmem [#allocation2], %s1354_s17  ;;  %p2096_p10 = pnand %p1699_p8, %p36_p11 }
  0x47   : > { %s167_s28 = sshll.u32 %s160_s27, 4  ;;  %s2100_s29 = scalar_lea.sflag [#allocation3], %s156_s11  ;;  %s2094_s28 = int_to_ptr.vmem [resolvable:$true] %s167_s28 }
  0x48   : > { %s1832_s30 = scalar_lea.hbm %s2092_s26, 4096  ;;  %p1834_p0 = pneg %p2096_p10 }
  0x49   : > { %p1833_p13 = scmp.ne.s32.totalorder %s2092_s26, %s1832_s30  ;;  %s1837_s6 = scalar_lea.hbm %s2462_s0, 16384 }
  0x4a   : > { %p1838_p7 = scmp.lt.u32.totalorder %s2092_s26, %s2462_s0  ;;  %p1839_p9 = scmp.lt.u32.totalorder %s1837_s6, %s1832_s30 }
  0x4b   : > { %p1835_p3 = pnand %p1834_p0, %p1833_p13  ;;  %p1841_p1 = scmp.lt.u32.totalorder %s1832_s30, %s2092_s26 }
  0x4c   : > { %p1840_p12 = por %p1839_p9, %p1838_p7 }
  0x4d   : > { %p1836_p5 = pneg %p1835_p3 }
  0x4e   : > { %p1842_p2 = por %p1841_p1, %p1840_p12 }
  0x50   : > { %p1843_p4 = pnand %p1842_p2, %p1836_p5 }
  0x52   : > { %1846 = shalt.err (!%p1843_p4)
}
  0x53   : > { %s1847_s11 = scalar_lea.vmem %s2094_s28, 4096  ;;  %s1938_s21 = smov [#allocation2]  }
  0x54   : > { %p1848_p8 = scmp.ne.s32.totalorder %s2094_s28, %s1847_s11  ;;  %s1852_s24 = sshll.u32 %s1938_s21, 4  ;;  %s1853_s24 = int_to_ptr.vmem [resolvable:$false] %s1852_s24 }
  0x55   : > { %s1854_s27 = scalar_lea.vmem %s1853_s24, 8192  ;;  %p1855_p3 = scmp.lt.s32.totalorder %s2094_s28, %s1853_s24 }
  0x56   : > { %p1850_p11 = pnand %p1848_p8, %p1834_p0  ;;  %p1856_p7 = scmp.lt.s32.totalorder %s1854_s27, %s1847_s11 }
  0x58   : > { %p1851_p13 = pneg %p1850_p11  ;;  %p1857_p9 = por %p1856_p7, %p1855_p3 }
  0x5a   : > { %p1858_p12 = pnand %p1857_p9, %p1851_p13 }
  0x5c   : > { %1861 = shalt.err (!%p1858_p12)
}
  0x5d   : > { %1692 = dma.hbm_to_vmem [thread:$0]  (!%p2096_p10), %s2092_s26, 4096, %s2094_s28, %s2100_s29, %s1936_s7, %s1936_s7, %s1937_s8  }
  0x5e   : > { %p2476_p0 = scmp.ne.s32.totalorder %s2471_s20, 0 }
  0x5f   : > { %s2134_s30 = sand.u32 (!%p2476_p0), 1, %s1924_s13   ;;  %p2477_p5 = scmp.ne.s32.totalorder (!%p2476_p0), %s2469_s18, 0 }
  0x60   : > { %179 = sbr.rel (%p2476_p0) target bundleno = 408 (0x198), region = 32  ;;  %s1358_s4 = sshll.u32 (!%p2476_p0), %s2134_s30, 8 }
  0x61   : > { %s182_s23 = scalar_lea.sflag (!%p2476_p0), [#allocation3], %s2134_s30  ;;  %s2140_s22 = scalar_lea.vmem (!%p2476_p0), [#allocation2], %s1358_s4 }
  0x67   : > { %1907 = dma.done.wait (%p2477_p5), %s182_s23, 4096  }
  0x68   : > { %1909 = vsyncadd (%p2477_p5), %s182_s23, 4294963200  ;;  %p2478_p10 = scmp.eq.s32.totalorder %s1984_s16, 0 }
  0x6a   : > { %1911 = dma.done.wait (%p2478_p10), [#allocation6], 272   ;;  %p2479_p1 = pmov %p2478_p10 }
  0x6b   : > { %vm562_vm0 = vcmask 1044480   ;;  %vm563_vm1 = vcmask 1045504   ;;  %v1939_v0 = vmov 65535   ;;  %vm465_vm2 = vcmask 220160   ;;  %v1742_v2 = vld [vmem:[#allocation5] sm:$0xff]   ;;  %v1746_v8 = vld [vmem:[%s2140_s22 + $0x8] sm:$0xff]  }
  0x6c   : > { %1913 = vsyncadd (%p2479_p1), [#allocation6], 4294967024  ;;  %v564_v1 = vsel %vm562_vm0, 4294967295, %v1939_v0  ;;  %v1743_v4 = vld [vmem:[#allocation5 + $0x8] sm:$0x3f]   ;;  %1598 = vmatprep.subr.bf16.mxu0 %v1742_v2  ;;  %1666 = vmatprep.subr.bf16.mxu1 %v1742_v2  ;;  %v1744_v5 = vld [vmem:[%s2140_s22] sm:$0xff]  }
  0x6d   : > { %v565_v3 = vsel %vm563_vm1, %v564_v1, 0  ;;  %1599 = vmatpush3.bf16.msra.mxu0 %v1742_v2  ;;  %1668 = vmatpush3.bf16.msra.mxu1 %v1742_v2  ;;  %v1745_v7 = vld [vmem:[%s2140_s22 + $0x80] sm:$0xff]   ;;  %v1747_v9 = vld [vmem:[%s2140_s22 + $0x88] sm:$0xff]   ;;  %v1748_v10 = vld [vmem:[%s2140_s22 + $0x10] sm:$0xff]   ;;  %vm1178_vm3 = vcmask 60416   ;;  %s2226_s18 = scalar_lea.vmem [#allocation8], %s1358_s4 }
  0x6e   : > { %v567_v6 = vand.u32 %v1743_v4, %v565_v3  ;;  %1602 = vmatprep.mubr.msk.bf16.mxu0 %vm465_vm2, %v1744_v5  ;;  %1634 = vmatprep.mubr.msk.bf16.mxu1 %vm465_vm2, %v1745_v7  ;;  %v1749_v11 = vld [vmem:[%s2140_s22 + $0x90] sm:$0xff]   ;;  %v1750_v12 = vld [vmem:[%s2140_s22 + $0x18] sm:$0xff]   ;;  %v1752_v14 = vld [vmem:[%s2140_s22 + $0x20] sm:$0xff]   ;;  %s1563_s20 = sshll.u32 %s1984_s16, 12  ;;  %s1257_s7 = sshll.u32 %s2226_s18, 4  ;;  %s2407_s7 = int_to_ptr.vmem [resolvable:$true] %s1257_s7 }
  0x6f   : > { %v1751_v13 = vld [vmem:[%s2140_s22 + $0x98] sm:$0xff]   ;;  %v1753_v15 = vld [vmem:[%s2140_s22 + $0xa0] sm:$0xff]   ;;  %v1754_v16 = vld [vmem:[%s2140_s22 + $0x28] sm:$0xff]   ;;  %s2405_s26 = scalar_lea.hbm %s2465_s3, %s1563_s20  ;;  %s1244_s28 = scalar_lea.sflag [#allocation4], %s2134_s30 }
  0x70   : > { %1600 = vmatprep.subr.bf16.mxu0 %v567_v6  ;;  %1667 = vmatprep.subr.bf16.mxu1 %v567_v6  ;;  %v1755_v17 = vld [vmem:[%s2140_s22 + $0xa8] sm:$0xff]   ;;  %v1756_v18 = vld [vmem:[%s2140_s22 + $0x30] sm:$0xff]   ;;  %v1758_v20 = vld [vmem:[%s2140_s22 + $0x38] sm:$0xff]   ;;  %s1862_s29 = scalar_lea.vmem %s2407_s7, 4096  ;;  %s1940_s6 = smov [#allocation8]  }
  0x71   : > { %1601 = vmatpush3.bf16.msra.mxu0 %v567_v6  ;;  %1669 = vmatpush3.bf16.msra.mxu1 %v567_v6  ;;  %v1757_v19 = vld [vmem:[%s2140_s22 + $0xb0] sm:$0xff]   ;;  %v1759_v21 = vld [vmem:[%s2140_s22 + $0xb8] sm:$0xff]   ;;  %v1760_v22 = vld [vmem:[%s2140_s22 + $0x40] sm:$0xff]   ;;  %p1863_p2 = scmp.ne.s32.totalorder %s2407_s7, %s1862_s29  ;;  %s1866_s17 = sshll.u32 %s1940_s6, 4  ;;  %s1867_s17 = int_to_ptr.vmem [resolvable:$false] %s1866_s17 }
  0x72   : > { %v1761_v23 = vld [vmem:[%s2140_s22 + $0xc0] sm:$0xff]   ;;  %v1762_v24 = vld [vmem:[%s2140_s22 + $0x48] sm:$0xff]   ;;  %v1764_v26 = vld [vmem:[%s2140_s22 + $0x50] sm:$0xff]   ;;  %s1868_s25 = scalar_lea.vmem %s1867_s17, 8192  ;;  %p1869_p11 = scmp.lt.s32.totalorder %s2407_s7, %s1867_s17 }
  0x73   : > { %v1763_v25 = vld [vmem:[%s2140_s22 + $0xc8] sm:$0xff]   ;;  %v1765_v27 = vld [vmem:[%s2140_s22 + $0xd0] sm:$0xff]   ;;  %v1766_v28 = vld [vmem:[%s2140_s22 + $0x58] sm:$0xff]   ;;  %p1864_p4 = pnand %p1863_p2, %p2079_p6  ;;  %p1870_p13 = scmp.lt.s32.totalorder %s1868_s25, %s1862_s29 }
  0x74   : > { %1603 = vmatmul.mubr.msk.bf16.vlgmr.msra.gmra.mrb[0].mxu0 %vm465_vm2, %v1746_v8  ;;  %1635 = vmatmul.mubr.msk.bf16.vlgmr.msra.gmra.mrb[0].mxu1 %vm465_vm2, %v1747_v9  ;;  %v1767_v29 = vld [vmem:[%s2140_s22 + $0xd8] sm:$0xff]   ;;  %v1768_v30 = vld [vmem:[%s2140_s22 + $0x60] sm:$0xff]   ;;  %v1770_v32 = vld [vmem:[%s2140_s22 + $0x68] sm:$0xff]  }
  0x75   : > { %1606 = vmatprep.mubr.msk.bf16.mxu0 %vm465_vm2, %v1748_v10  ;;  %1638 = vmatprep.mubr.msk.bf16.mxu1 %vm465_vm2, %v1749_v11  ;;  %v1769_v31 = vld [vmem:[%s2140_s22 + $0xe0] sm:$0xff]   ;;  %v1771_v33 = vld [vmem:[%s2140_s22 + $0xe8] sm:$0xff]   ;;  %v1772_v34 = vld [vmem:[%s2140_s22 + $0x70] sm:$0xff]   ;;  %p1865_p8 = pneg %p1864_p4  ;;  %p1871_p3 = por %p1870_p13, %p1869_p11 }
  0x76   : > { %v1773_v35 = vld [vmem:[%s2140_s22 + $0xf0] sm:$0xff]   ;;  %v1774_v36 = vld [vmem:[%s2140_s22 + $0x78] sm:$0xff]  }
  0x77   : > { %v1775_v37 = vld [vmem:[%s2140_s22 + $0xf8] sm:$0xff]   ;;  %v2214_v38 = vld [vmem:[#allocation7] ss:$0 sm:$0xff]  ;;  %p1872_p7 = pnand %p1871_p3, %p1865_p8 }
  0x7c   : > { %1607 = vmatmul.mubr.msk.bf16.gmra.mrb[4].mxu0 %vm465_vm2, %v1750_v12  ;;  %1639 = vmatmul.mubr.msk.bf16.gmra.mrb[4].mxu1 %vm465_vm2, %v1751_v13 }
  0x7d   : > { %1610 = vmatprep.mubr.msk.bf16.mxu0 %vm465_vm2, %v1752_v14  ;;  %1642 = vmatprep.mubr.msk.bf16.mxu1 %vm465_vm2, %v1753_v15 }
  0x84   : > { %1611 = vmatmul.mubr.msk.bf16.gmra.mrb[8].mxu0 %vm465_vm2, %v1754_v16  ;;  %1643 = vmatmul.mubr.msk.bf16.gmra.mrb[8].mxu1 %vm465_vm2, %v1755_v17 }
  0x85   : > { %1614 = vmatprep.mubr.msk.bf16.mxu0 %vm465_vm2, %v1756_v18  ;;  %1646 = vmatprep.mubr.msk.bf16.mxu1 %vm465_vm2, %v1757_v19 }
  0x8c   : > { %1615 = vmatmul.mubr.msk.bf16.gmra.mrb[12].mxu0 %vm465_vm2, %v1758_v20  ;;  %1647 = vmatmul.mubr.msk.bf16.gmra.mrb[12].mxu1 %vm465_vm2, %v1759_v21 }
  0x8d   : > { %1618 = vmatprep.mubr.msk.bf16.mxu0 %vm465_vm2, %v1760_v22  ;;  %1650 = vmatprep.mubr.msk.bf16.mxu1 %vm465_vm2, %v1761_v23 }
  0x94   : > { %1619 = vmatmul.mubr.msk.bf16.gmra.mrb[16].mxu0 %vm465_vm2, %v1762_v24  ;;  %1651 = vmatmul.mubr.msk.bf16.gmra.mrb[16].mxu1 %vm465_vm2, %v1763_v25 }
  0x95   : > { %1622 = vmatprep.mubr.msk.bf16.mxu0 %vm465_vm2, %v1764_v26  ;;  %1654 = vmatprep.mubr.msk.bf16.mxu1 %vm465_vm2, %v1765_v27 }
  0x9c   : > { %1623 = vmatmul.mubr.msk.bf16.gmra.mrb[20].mxu0 %vm465_vm2, %v1766_v28  ;;  %1655 = vmatmul.mubr.msk.bf16.gmra.mrb[20].mxu1 %vm465_vm2, %v1767_v29 }
  0x9d   : > { %1626 = vmatprep.mubr.msk.bf16.mxu0 %vm465_vm2, %v1768_v30  ;;  %1658 = vmatprep.mubr.msk.bf16.mxu1 %vm465_vm2, %v1769_v31 }
  0xa4   : > { %1627 = vmatmul.mubr.msk.bf16.gmra.mrb[24].mxu0 %vm465_vm2, %v1770_v32  ;;  %1659 = vmatmul.mubr.msk.bf16.gmra.mrb[24].mxu1 %vm465_vm2, %v1771_v33 }
  0xa5   : > { %1630 = vmatprep.mubr.msk.bf16.mxu0 %vm465_vm2, %v1772_v34  ;;  %1662 = vmatprep.mubr.msk.bf16.mxu1 %vm465_vm2, %v1773_v35 }
  0xac   : > { %1631 = vmatmul.mubr.msk.bf16.gmra.mrb[28].mxu0 %vm465_vm2, %v1774_v36  ;;  %1663 = vmatmul.mubr.msk.bf16.gmra.mrb[28].mxu1 %vm465_vm2, %v1775_v37 }
 0x147   : > { %v1604_v39 = vpop.f32.mrb[0].mxu0  ;;  %v1636_v40 = vpop.f32.mrb[0].mxu1 }
 0x148   : > { %v612_v41 = vadd.f32 %v1604_v39, %v2214_v38  ;;  %v740_v42 = vadd.f32 %v1636_v40, %v2214_v38  ;;  %v603_v43 = vpop.f32.mrb[1].mxu0  ;;  %v731_v44 = vpop.f32.mrb[1].mxu1 }
 0x149   : > { %v604_v45 = vadd.f32 %v2214_v38, %v603_v43  ;;  %v732_v46 = vadd.f32 %v2214_v38, %v731_v44  ;;  %v1605_v47 = vpop.f32.mrb[2].mxu0  ;;  %v1637_v48 = vpop.f32.mrb[2].mxu1 }
 0x14a   : > { %v860_v49 = vmax.f32 %v612_v41, 0.0  ;;  %v892_v50 = vmax.f32 %v740_v42, 0.0  ;;  %v615_v51 = vadd.f32 %v1605_v47, %v2214_v38  ;;  %v743_v52 = vadd.f32 %v1637_v48, %v2214_v38  ;;  %v606_v53 = vpop.f32.mrb[3].mxu0  ;;  %v734_v54 = vpop.f32.mrb[3].mxu1 }
 0x14b   : > { %v858_v55 = vmax.f32 %v604_v45, 0.0  ;;  %v890_v56 = vmax.f32 %v732_v46, 0.0  ;;  %v607_v57 = vadd.f32 %v2214_v38, %v606_v53  ;;  %v735_v58 = vadd.f32 %v2214_v38, %v734_v54 }
 0x14c   : > { %v1501_v59 = vpack.c.bf16 %v860_v49, %v860_v49  ;;  %v1533_v60 = vpack.c.bf16 %v892_v50, %v892_v50  ;;  %v861_v61 = vmax.f32 %v615_v51, 0.0  ;;  %v893_v62 = vmax.f32 %v743_v52, 0.0 }
 0x14d   : > { %v1499_v63 = vpack.c.bf16 %v858_v55, %v858_v55  ;;  %v1531_v0 = vpack.c.bf16 %v890_v56, %v890_v56  ;;  %v859_v1 = vmax.f32 %v607_v57, 0.0  ;;  %v891_v2 = vmax.f32 %v735_v58, 0.0 }
 0x14e   : > { %1181 = vst.msk [vmem:[%s2226_s18 + $0x8] sm:$0xf] %vm1178_vm3, %v1501_v59  ;;  %1213 = vst.msk [vmem:[%s2226_s18 + $0x88] sm:$0xf] %vm1178_vm3, %v1533_v60  ;;  %v1502_v3 = vpack.c.bf16 %v861_v61, %v861_v61  ;;  %v1534_v4 = vpack.c.bf16 %v893_v62, %v893_v62 }
 0x14f   : > { %1179 = vst.msk [vmem:[%s2226_s18] sm:$0xf] %vm1178_vm3, %v1499_v63  ;;  %1211 = vst.msk [vmem:[%s2226_s18 + $0x80] sm:$0xf] %vm1178_vm3, %v1531_v0  ;;  %v1500_v5 = vpack.c.bf16 %v859_v1, %v859_v1  ;;  %v1532_v6 = vpack.c.bf16 %v891_v2, %v891_v2  ;;  %v1608_v7 = vpop.f32.mrb[4].mxu0  ;;  %v1640_v8 = vpop.f32.mrb[4].mxu1 }
 0x150   : > { %1182 = vst.msk [vmem:[%s2226_s18 + $0xc] sm:$0xf] %vm1178_vm3, %v1502_v3  ;;  %1214 = vst.msk [vmem:[%s2226_s18 + $0x8c] sm:$0xf] %vm1178_vm3, %v1534_v4  ;;  %v628_v9 = vadd.f32 %v1608_v7, %v2214_v38  ;;  %v756_v10 = vadd.f32 %v1640_v8, %v2214_v38  ;;  %v619_v11 = vpop.f32.mrb[5].mxu0  ;;  %v747_v12 = vpop.f32.mrb[5].mxu1 }
 0x151   : > { %1180 = vst.msk [vmem:[%s2226_s18 + $0x4] sm:$0xf] %vm1178_vm3, %v1500_v5  ;;  %1212 = vst.msk [vmem:[%s2226_s18 + $0x84] sm:$0xf] %vm1178_vm3, %v1532_v6  ;;  %v620_v13 = vadd.f32 %v2214_v38, %v619_v11  ;;  %v748_v14 = vadd.f32 %v2214_v38, %v747_v12  ;;  %v1609_v15 = vpop.f32.mrb[6].mxu0  ;;  %v1641_v16 = vpop.f32.mrb[6].mxu1 }
 0x152   : > { %v864_v17 = vmax.f32 %v628_v9, 0.0  ;;  %v896_v18 = vmax.f32 %v756_v10, 0.0  ;;  %v631_v19 = vadd.f32 %v1609_v15, %v2214_v38  ;;  %v759_v20 = vadd.f32 %v1641_v16, %v2214_v38  ;;  %v622_v21 = vpop.f32.mrb[7].mxu0  ;;  %v750_v22 = vpop.f32.mrb[7].mxu1 }
 0x153   : > { %v862_v23 = vmax.f32 %v620_v13, 0.0  ;;  %v894_v24 = vmax.f32 %v748_v14, 0.0  ;;  %v623_v25 = vadd.f32 %v2214_v38, %v622_v21  ;;  %v751_v26 = vadd.f32 %v2214_v38, %v750_v22 }
 0x154   : > { %v1505_v27 = vpack.c.bf16 %v864_v17, %v864_v17  ;;  %v1537_v28 = vpack.c.bf16 %v896_v18, %v896_v18  ;;  %v865_v29 = vmax.f32 %v631_v19, 0.0  ;;  %v897_v30 = vmax.f32 %v759_v20, 0.0 }
 0x155   : > { %v1503_v31 = vpack.c.bf16 %v862_v23, %v862_v23  ;;  %v1535_v32 = vpack.c.bf16 %v894_v24, %v894_v24  ;;  %v863_v33 = vmax.f32 %v623_v25, 0.0  ;;  %v895_v34 = vmax.f32 %v751_v26, 0.0 }
 0x156   : > { %1185 = vst.msk [vmem:[%s2226_s18 + $0x18] sm:$0xf] %vm1178_vm3, %v1505_v27  ;;  %1217 = vst.msk [vmem:[%s2226_s18 + $0x98] sm:$0xf] %vm1178_vm3, %v1537_v28  ;;  %v1506_v35 = vpack.c.bf16 %v865_v29, %v865_v29  ;;  %v1538_v36 = vpack.c.bf16 %v897_v30, %v897_v30 }
 0x157   : > { %1183 = vst.msk [vmem:[%s2226_s18 + $0x10] sm:$0xf] %vm1178_vm3, %v1503_v31  ;;  %1215 = vst.msk [vmem:[%s2226_s18 + $0x90] sm:$0xf] %vm1178_vm3, %v1535_v32  ;;  %v1504_v37 = vpack.c.bf16 %v863_v33, %v863_v33  ;;  %v1536_v39 = vpack.c.bf16 %v895_v34, %v895_v34  ;;  %v1612_v40 = vpop.f32.mrb[8].mxu0  ;;  %v1644_v41 = vpop.f32.mrb[8].mxu1 }
 0x158   : > { %1186 = vst.msk [vmem:[%s2226_s18 + $0x1c] sm:$0xf] %vm1178_vm3, %v1506_v35  ;;  %1218 = vst.msk [vmem:[%s2226_s18 + $0x9c] sm:$0xf] %vm1178_vm3, %v1538_v36  ;;  %v644_v42 = vadd.f32 %v1612_v40, %v2214_v38  ;;  %v772_v43 = vadd.f32 %v1644_v41, %v2214_v38  ;;  %v635_v44 = vpop.f32.mrb[9].mxu0  ;;  %v763_v45 = vpop.f32.mrb[9].mxu1 }
 0x159   : > { %1184 = vst.msk [vmem:[%s2226_s18 + $0x14] sm:$0xf] %vm1178_vm3, %v1504_v37  ;;  %1216 = vst.msk [vmem:[%s2226_s18 + $0x94] sm:$0xf] %vm1178_vm3, %v1536_v39  ;;  %v636_v46 = vadd.f32 %v2214_v38, %v635_v44  ;;  %v764_v47 = vadd.f32 %v2214_v38, %v763_v45  ;;  %v1613_v48 = vpop.f32.mrb[10].mxu0  ;;  %v1645_v49 = vpop.f32.mrb[10].mxu1 }
 0x15a   : > { %v868_v50 = vmax.f32 %v644_v42, 0.0  ;;  %v900_v51 = vmax.f32 %v772_v43, 0.0  ;;  %v647_v52 = vadd.f32 %v1613_v48, %v2214_v38  ;;  %v775_v53 = vadd.f32 %v1645_v49, %v2214_v38  ;;  %v638_v54 = vpop.f32.mrb[11].mxu0  ;;  %v766_v55 = vpop.f32.mrb[11].mxu1 }
 0x15b   : > { %v866_v56 = vmax.f32 %v636_v46, 0.0  ;;  %v898_v57 = vmax.f32 %v764_v47, 0.0  ;;  %v639_v58 = vadd.f32 %v2214_v38, %v638_v54  ;;  %v767_v59 = vadd.f32 %v2214_v38, %v766_v55 }
 0x15c   : > { %v1509_v60 = vpack.c.bf16 %v868_v50, %v868_v50  ;;  %v1541_v61 = vpack.c.bf16 %v900_v51, %v900_v51  ;;  %v869_v62 = vmax.f32 %v647_v52, 0.0  ;;  %v901_v63 = vmax.f32 %v775_v53, 0.0 }
 0x15d   : > { %v1507_v0 = vpack.c.bf16 %v866_v56, %v866_v56  ;;  %v1539_v1 = vpack.c.bf16 %v898_v57, %v898_v57  ;;  %v867_v2 = vmax.f32 %v639_v58, 0.0  ;;  %v899_v3 = vmax.f32 %v767_v59, 0.0 }
 0x15e   : > { %1189 = vst.msk [vmem:[%s2226_s18 + $0x28] sm:$0xf] %vm1178_vm3, %v1509_v60  ;;  %1221 = vst.msk [vmem:[%s2226_s18 + $0xa8] sm:$0xf] %vm1178_vm3, %v1541_v61  ;;  %v1510_v4 = vpack.c.bf16 %v869_v62, %v869_v62  ;;  %v1542_v5 = vpack.c.bf16 %v901_v63, %v901_v63 }
 0x15f   : > { %1187 = vst.msk [vmem:[%s2226_s18 + $0x20] sm:$0xf] %vm1178_vm3, %v1507_v0  ;;  %1219 = vst.msk [vmem:[%s2226_s18 + $0xa0] sm:$0xf] %vm1178_vm3, %v1539_v1  ;;  %v1508_v6 = vpack.c.bf16 %v867_v2, %v867_v2  ;;  %v1540_v7 = vpack.c.bf16 %v899_v3, %v899_v3  ;;  %v1616_v8 = vpop.f32.mrb[12].mxu0  ;;  %v1648_v9 = vpop.f32.mrb[12].mxu1 }
 0x160   : > { %1190 = vst.msk [vmem:[%s2226_s18 + $0x2c] sm:$0xf] %vm1178_vm3, %v1510_v4  ;;  %1222 = vst.msk [vmem:[%s2226_s18 + $0xac] sm:$0xf] %vm1178_vm3, %v1542_v5  ;;  %v660_v10 = vadd.f32 %v1616_v8, %v2214_v38  ;;  %v788_v11 = vadd.f32 %v1648_v9, %v2214_v38  ;;  %v651_v12 = vpop.f32.mrb[13].mxu0  ;;  %v779_v13 = vpop.f32.mrb[13].mxu1 }
 0x161   : > { %1188 = vst.msk [vmem:[%s2226_s18 + $0x24] sm:$0xf] %vm1178_vm3, %v1508_v6  ;;  %1220 = vst.msk [vmem:[%s2226_s18 + $0xa4] sm:$0xf] %vm1178_vm3, %v1540_v7  ;;  %v652_v14 = vadd.f32 %v2214_v38, %v651_v12  ;;  %v780_v15 = vadd.f32 %v2214_v38, %v779_v13  ;;  %v1617_v16 = vpop.f32.mrb[14].mxu0  ;;  %v1649_v17 = vpop.f32.mrb[14].mxu1 }
 0x162   : > { %v872_v18 = vmax.f32 %v660_v10, 0.0  ;;  %v904_v19 = vmax.f32 %v788_v11, 0.0  ;;  %v663_v20 = vadd.f32 %v1617_v16, %v2214_v38  ;;  %v791_v21 = vadd.f32 %v1649_v17, %v2214_v38  ;;  %v654_v22 = vpop.f32.mrb[15].mxu0  ;;  %v782_v23 = vpop.f32.mrb[15].mxu1 }
 0x163   : > { %v870_v24 = vmax.f32 %v652_v14, 0.0  ;;  %v902_v25 = vmax.f32 %v780_v15, 0.0  ;;  %v655_v26 = vadd.f32 %v2214_v38, %v654_v22  ;;  %v783_v27 = vadd.f32 %v2214_v38, %v782_v23 }
 0x164   : > { %v1513_v28 = vpack.c.bf16 %v872_v18, %v872_v18  ;;  %v1545_v29 = vpack.c.bf16 %v904_v19, %v904_v19  ;;  %v873_v30 = vmax.f32 %v663_v20, 0.0  ;;  %v905_v31 = vmax.f32 %v791_v21, 0.0 }
 0x165   : > { %v1511_v32 = vpack.c.bf16 %v870_v24, %v870_v24  ;;  %v1543_v33 = vpack.c.bf16 %v902_v25, %v902_v25  ;;  %v871_v34 = vmax.f32 %v655_v26, 0.0  ;;  %v903_v35 = vmax.f32 %v783_v27, 0.0 }
 0x166   : > { %1193 = vst.msk [vmem:[%s2226_s18 + $0x38] sm:$0xf] %vm1178_vm3, %v1513_v28  ;;  %1225 = vst.msk [vmem:[%s2226_s18 + $0xb8] sm:$0xf] %vm1178_vm3, %v1545_v29  ;;  %v1514_v36 = vpack.c.bf16 %v873_v30, %v873_v30  ;;  %v1546_v37 = vpack.c.bf16 %v905_v31, %v905_v31 }
 0x167   : > { %1191 = vst.msk [vmem:[%s2226_s18 + $0x30] sm:$0xf] %vm1178_vm3, %v1511_v32  ;;  %1223 = vst.msk [vmem:[%s2226_s18 + $0xb0] sm:$0xf] %vm1178_vm3, %v1543_v33  ;;  %v1512_v39 = vpack.c.bf16 %v871_v34, %v871_v34  ;;  %v1544_v40 = vpack.c.bf16 %v903_v35, %v903_v35  ;;  %v1620_v41 = vpop.f32.mrb[16].mxu0  ;;  %v1652_v42 = vpop.f32.mrb[16].mxu1 }
 0x168   : > { %1194 = vst.msk [vmem:[%s2226_s18 + $0x3c] sm:$0xf] %vm1178_vm3, %v1514_v36  ;;  %1226 = vst.msk [vmem:[%s2226_s18 + $0xbc] sm:$0xf] %vm1178_vm3, %v1546_v37  ;;  %v676_v43 = vadd.f32 %v1620_v41, %v2214_v38  ;;  %v804_v44 = vadd.f32 %v1652_v42, %v2214_v38  ;;  %v667_v45 = vpop.f32.mrb[17].mxu0  ;;  %v795_v46 = vpop.f32.mrb[17].mxu1 }
 0x169   : > { %1192 = vst.msk [vmem:[%s2226_s18 + $0x34] sm:$0xf] %vm1178_vm3, %v1512_v39  ;;  %1224 = vst.msk [vmem:[%s2226_s18 + $0xb4] sm:$0xf] %vm1178_vm3, %v1544_v40  ;;  %v668_v47 = vadd.f32 %v2214_v38, %v667_v45  ;;  %v796_v48 = vadd.f32 %v2214_v38, %v795_v46  ;;  %v1621_v49 = vpop.f32.mrb[18].mxu0  ;;  %v1653_v50 = vpop.f32.mrb[18].mxu1 }
 0x16a   : > { %v876_v51 = vmax.f32 %v676_v43, 0.0  ;;  %v908_v52 = vmax.f32 %v804_v44, 0.0  ;;  %v679_v53 = vadd.f32 %v1621_v49, %v2214_v38  ;;  %v807_v54 = vadd.f32 %v1653_v50, %v2214_v38  ;;  %v670_v55 = vpop.f32.mrb[19].mxu0  ;;  %v798_v56 = vpop.f32.mrb[19].mxu1 }
 0x16b   : > { %v874_v57 = vmax.f32 %v668_v47, 0.0  ;;  %v906_v58 = vmax.f32 %v796_v48, 0.0  ;;  %v671_v59 = vadd.f32 %v2214_v38, %v670_v55  ;;  %v799_v60 = vadd.f32 %v2214_v38, %v798_v56 }
 0x16c   : > { %v1517_v61 = vpack.c.bf16 %v876_v51, %v876_v51  ;;  %v1549_v62 = vpack.c.bf16 %v908_v52, %v908_v52  ;;  %v877_v63 = vmax.f32 %v679_v53, 0.0  ;;  %v909_v0 = vmax.f32 %v807_v54, 0.0 }
 0x16d   : > { %v1515_v1 = vpack.c.bf16 %v874_v57, %v874_v57  ;;  %v1547_v2 = vpack.c.bf16 %v906_v58, %v906_v58  ;;  %v875_v3 = vmax.f32 %v671_v59, 0.0  ;;  %v907_v4 = vmax.f32 %v799_v60, 0.0 }
 0x16e   : > { %1197 = vst.msk [vmem:[%s2226_s18 + $0x48] sm:$0xf] %vm1178_vm3, %v1517_v61  ;;  %1229 = vst.msk [vmem:[%s2226_s18 + $0xc8] sm:$0xf] %vm1178_vm3, %v1549_v62  ;;  %v1518_v5 = vpack.c.bf16 %v877_v63, %v877_v63  ;;  %v1550_v6 = vpack.c.bf16 %v909_v0, %v909_v0 }
 0x16f   : > { %1195 = vst.msk [vmem:[%s2226_s18 + $0x40] sm:$0xf] %vm1178_vm3, %v1515_v1  ;;  %1227 = vst.msk [vmem:[%s2226_s18 + $0xc0] sm:$0xf] %vm1178_vm3, %v1547_v2  ;;  %v1516_v7 = vpack.c.bf16 %v875_v3, %v875_v3  ;;  %v1548_v8 = vpack.c.bf16 %v907_v4, %v907_v4  ;;  %v1624_v9 = vpop.f32.mrb[20].mxu0  ;;  %v1656_v10 = vpop.f32.mrb[20].mxu1 }
 0x170   : > { %1198 = vst.msk [vmem:[%s2226_s18 + $0x4c] sm:$0xf] %vm1178_vm3, %v1518_v5  ;;  %1230 = vst.msk [vmem:[%s2226_s18 + $0xcc] sm:$0xf] %vm1178_vm3, %v1550_v6  ;;  %v692_v11 = vadd.f32 %v1624_v9, %v2214_v38  ;;  %v820_v12 = vadd.f32 %v1656_v10, %v2214_v38  ;;  %v683_v13 = vpop.f32.mrb[21].mxu0  ;;  %v811_v14 = vpop.f32.mrb[21].mxu1 }
 0x171   : > { %1196 = vst.msk [vmem:[%s2226_s18 + $0x44] sm:$0xf] %vm1178_vm3, %v1516_v7  ;;  %1228 = vst.msk [vmem:[%s2226_s18 + $0xc4] sm:$0xf] %vm1178_vm3, %v1548_v8  ;;  %v684_v15 = vadd.f32 %v2214_v38, %v683_v13  ;;  %v812_v16 = vadd.f32 %v2214_v38, %v811_v14  ;;  %v1625_v17 = vpop.f32.mrb[22].mxu0  ;;  %v1657_v18 = vpop.f32.mrb[22].mxu1 }
 0x172   : > { %v880_v19 = vmax.f32 %v692_v11, 0.0  ;;  %v912_v20 = vmax.f32 %v820_v12, 0.0  ;;  %v695_v21 = vadd.f32 %v1625_v17, %v2214_v38  ;;  %v823_v22 = vadd.f32 %v1657_v18, %v2214_v38  ;;  %v686_v23 = vpop.f32.mrb[23].mxu0  ;;  %v814_v24 = vpop.f32.mrb[23].mxu1 }
 0x173   : > { %v878_v25 = vmax.f32 %v684_v15, 0.0  ;;  %v910_v26 = vmax.f32 %v812_v16, 0.0  ;;  %v687_v27 = vadd.f32 %v2214_v38, %v686_v23  ;;  %v815_v28 = vadd.f32 %v2214_v38, %v814_v24 }
 0x174   : > { %v1521_v29 = vpack.c.bf16 %v880_v19, %v880_v19  ;;  %v1553_v30 = vpack.c.bf16 %v912_v20, %v912_v20  ;;  %v881_v31 = vmax.f32 %v695_v21, 0.0  ;;  %v913_v32 = vmax.f32 %v823_v22, 0.0 }
 0x175   : > { %v1519_v33 = vpack.c.bf16 %v878_v25, %v878_v25  ;;  %v1551_v34 = vpack.c.bf16 %v910_v26, %v910_v26  ;;  %v879_v35 = vmax.f32 %v687_v27, 0.0  ;;  %v911_v36 = vmax.f32 %v815_v28, 0.0 }
 0x176   : > { %1201 = vst.msk [vmem:[%s2226_s18 + $0x58] sm:$0xf] %vm1178_vm3, %v1521_v29  ;;  %1233 = vst.msk [vmem:[%s2226_s18 + $0xd8] sm:$0xf] %vm1178_vm3, %v1553_v30  ;;  %v1522_v37 = vpack.c.bf16 %v881_v31, %v881_v31  ;;  %v1554_v39 = vpack.c.bf16 %v913_v32, %v913_v32 }
 0x177   : > { %1199 = vst.msk [vmem:[%s2226_s18 + $0x50] sm:$0xf] %vm1178_vm3, %v1519_v33  ;;  %1231 = vst.msk [vmem:[%s2226_s18 + $0xd0] sm:$0xf] %vm1178_vm3, %v1551_v34  ;;  %v1520_v40 = vpack.c.bf16 %v879_v35, %v879_v35  ;;  %v1552_v41 = vpack.c.bf16 %v911_v36, %v911_v36  ;;  %v1628_v42 = vpop.f32.mrb[24].mxu0  ;;  %v1660_v43 = vpop.f32.mrb[24].mxu1 }
 0x178   : > { %1202 = vst.msk [vmem:[%s2226_s18 + $0x5c] sm:$0xf] %vm1178_vm3, %v1522_v37  ;;  %1234 = vst.msk [vmem:[%s2226_s18 + $0xdc] sm:$0xf] %vm1178_vm3, %v1554_v39  ;;  %v708_v44 = vadd.f32 %v1628_v42, %v2214_v38  ;;  %v836_v45 = vadd.f32 %v1660_v43, %v2214_v38  ;;  %v699_v46 = vpop.f32.mrb[25].mxu0  ;;  %v827_v47 = vpop.f32.mrb[25].mxu1 }
 0x179   : > { %1200 = vst.msk [vmem:[%s2226_s18 + $0x54] sm:$0xf] %vm1178_vm3, %v1520_v40  ;;  %1232 = vst.msk [vmem:[%s2226_s18 + $0xd4] sm:$0xf] %vm1178_vm3, %v1552_v41  ;;  %v700_v48 = vadd.f32 %v2214_v38, %v699_v46  ;;  %v828_v49 = vadd.f32 %v2214_v38, %v827_v47  ;;  %v1629_v50 = vpop.f32.mrb[26].mxu0  ;;  %v1661_v51 = vpop.f32.mrb[26].mxu1 }
 0x17a   : > { %v884_v52 = vmax.f32 %v708_v44, 0.0  ;;  %v916_v53 = vmax.f32 %v836_v45, 0.0  ;;  %v711_v54 = vadd.f32 %v1629_v50, %v2214_v38  ;;  %v839_v55 = vadd.f32 %v1661_v51, %v2214_v38  ;;  %v702_v56 = vpop.f32.mrb[27].mxu0  ;;  %v830_v57 = vpop.f32.mrb[27].mxu1 }
 0x17b   : > { %v882_v58 = vmax.f32 %v700_v48, 0.0  ;;  %v914_v59 = vmax.f32 %v828_v49, 0.0  ;;  %v703_v60 = vadd.f32 %v2214_v38, %v702_v56  ;;  %v831_v61 = vadd.f32 %v2214_v38, %v830_v57 }
 0x17c   : > { %v1525_v62 = vpack.c.bf16 %v884_v52, %v884_v52  ;;  %v1557_v63 = vpack.c.bf16 %v916_v53, %v916_v53  ;;  %v885_v0 = vmax.f32 %v711_v54, 0.0  ;;  %v917_v1 = vmax.f32 %v839_v55, 0.0 }
 0x17d   : > { %v1523_v2 = vpack.c.bf16 %v882_v58, %v882_v58  ;;  %v1555_v3 = vpack.c.bf16 %v914_v59, %v914_v59  ;;  %v883_v4 = vmax.f32 %v703_v60, 0.0  ;;  %v915_v5 = vmax.f32 %v831_v61, 0.0 }
 0x17e   : > { %1205 = vst.msk [vmem:[%s2226_s18 + $0x68] sm:$0xf] %vm1178_vm3, %v1525_v62  ;;  %1237 = vst.msk [vmem:[%s2226_s18 + $0xe8] sm:$0xf] %vm1178_vm3, %v1557_v63  ;;  %v1526_v6 = vpack.c.bf16 %v885_v0, %v885_v0  ;;  %v1558_v7 = vpack.c.bf16 %v917_v1, %v917_v1 }
 0x17f   : > { %1203 = vst.msk [vmem:[%s2226_s18 + $0x60] sm:$0xf] %vm1178_vm3, %v1523_v2  ;;  %1235 = vst.msk [vmem:[%s2226_s18 + $0xe0] sm:$0xf] %vm1178_vm3, %v1555_v3  ;;  %v1524_v8 = vpack.c.bf16 %v883_v4, %v883_v4  ;;  %v1556_v9 = vpack.c.bf16 %v915_v5, %v915_v5  ;;  %v1632_v10 = vpop.f32.mrb[28].mxu0  ;;  %v1664_v11 = vpop.f32.mrb[28].mxu1 }
 0x180   : > { %1206 = vst.msk [vmem:[%s2226_s18 + $0x6c] sm:$0xf] %vm1178_vm3, %v1526_v6  ;;  %1238 = vst.msk [vmem:[%s2226_s18 + $0xec] sm:$0xf] %vm1178_vm3, %v1558_v7  ;;  %v724_v12 = vadd.f32 %v1632_v10, %v2214_v38  ;;  %v852_v13 = vadd.f32 %v1664_v11, %v2214_v38  ;;  %v715_v14 = vpop.f32.mrb[29].mxu0  ;;  %v843_v15 = vpop.f32.mrb[29].mxu1 }
 0x181   : > { %1204 = vst.msk [vmem:[%s2226_s18 + $0x64] sm:$0xf] %vm1178_vm3, %v1524_v8  ;;  %1236 = vst.msk [vmem:[%s2226_s18 + $0xe4] sm:$0xf] %vm1178_vm3, %v1556_v9  ;;  %v716_v16 = vadd.f32 %v2214_v38, %v715_v14  ;;  %v844_v17 = vadd.f32 %v2214_v38, %v843_v15  ;;  %v1633_v18 = vpop.f32.mrb[30].mxu0  ;;  %v1665_v19 = vpop.f32.mrb[30].mxu1 }
 0x182   : > { %v888_v20 = vmax.f32 %v724_v12, 0.0  ;;  %v920_v21 = vmax.f32 %v852_v13, 0.0  ;;  %v727_v22 = vadd.f32 %v1633_v18, %v2214_v38  ;;  %v855_v23 = vadd.f32 %v1665_v19, %v2214_v38  ;;  %v718_v24 = vpop.f32.mrb[31].mxu0  ;;  %v846_v25 = vpop.f32.mrb[31].mxu1 }
 0x183   : > { %v886_v26 = vmax.f32 %v716_v16, 0.0  ;;  %v918_v27 = vmax.f32 %v844_v17, 0.0  ;;  %v719_v28 = vadd.f32 %v2214_v38, %v718_v24  ;;  %v847_v29 = vadd.f32 %v2214_v38, %v846_v25 }
 0x184   : > { %v1529_v30 = vpack.c.bf16 %v888_v20, %v888_v20  ;;  %v1561_v31 = vpack.c.bf16 %v920_v21, %v920_v21  ;;  %v889_v32 = vmax.f32 %v727_v22, 0.0  ;;  %v921_v33 = vmax.f32 %v855_v23, 0.0 }
 0x185   : > { %v1527_v34 = vpack.c.bf16 %v886_v26, %v886_v26  ;;  %v1559_v35 = vpack.c.bf16 %v918_v27, %v918_v27  ;;  %v887_v36 = vmax.f32 %v719_v28, 0.0  ;;  %v919_v37 = vmax.f32 %v847_v29, 0.0 }
 0x186   : > { %1209 = vst.msk [vmem:[%s2226_s18 + $0x78] sm:$0xf] %vm1178_vm3, %v1529_v30  ;;  %1241 = vst.msk [vmem:[%s2226_s18 + $0xf8] sm:$0xf] %vm1178_vm3, %v1561_v31  ;;  %v1530_v38 = vpack.c.bf16 %v889_v32, %v889_v32  ;;  %v1562_v39 = vpack.c.bf16 %v921_v33, %v921_v33 }
 0x187   : > { %1207 = vst.msk [vmem:[%s2226_s18 + $0x70] sm:$0xf] %vm1178_vm3, %v1527_v34  ;;  %1239 = vst.msk [vmem:[%s2226_s18 + $0xf0] sm:$0xf] %vm1178_vm3, %v1559_v35  ;;  %v1528_v40 = vpack.c.bf16 %v887_v36, %v887_v36  ;;  %v1560_v41 = vpack.c.bf16 %v919_v37, %v919_v37 }
 0x188   : > { %1210 = vst.msk [vmem:[%s2226_s18 + $0x7c] sm:$0xf] %vm1178_vm3, %v1530_v38  ;;  %1242 = vst.msk [vmem:[%s2226_s18 + $0xfc] sm:$0xf] %vm1178_vm3, %v1562_v39 }
 0x189   : > { %1208 = vst.msk [vmem:[%s2226_s18 + $0x74] sm:$0xf] %vm1178_vm3, %v1528_v40  ;;  %1240 = vst.msk [vmem:[%s2226_s18 + $0xf4] sm:$0xf] %vm1178_vm3, %v1560_v41 }
 0x18a   : > { %1875 = shalt.err (!%p1872_p7)
}
 0x18b   : > { %s1876_s11 = scalar_lea.hbm %s2405_s26, 4096  ;;  %s1880_s27 = scalar_lea.hbm %s2465_s3, 16384 }
 0x18c   : > { %p1877_p9 = scmp.ne.s32.totalorder %s2405_s26, %s1876_s11  ;;  %p1881_p5 = scmp.lt.u32.totalorder %s2405_s26, %s2465_s3 }
 0x18d   : > { %p1882_p10 = scmp.lt.u32.totalorder %s1880_s27, %s1876_s11  ;;  %p1884_p2 = scmp.lt.u32.totalorder %s1876_s11, %s2405_s26 }
 0x18e   : > { %p1878_p12 = pnand %p1877_p9, %p2079_p6 }
 0x18f   : > { %p1883_p1 = por %p1882_p10, %p1881_p5 }
 0x190   : > { %p1879_p0 = pneg %p1878_p12 }
 0x191   : > { %p1885_p4 = por %p1884_p2, %p1883_p1 }
 0x193   : > { %p1886_p8 = pnand %p1885_p4, %p1879_p0 }
 0x195   : > { %1889 = shalt.err (!%p1886_p8)
}
 0x196   : > { %s1941_s22 = smov 64   ;;  %s1942_s18 = smov 4  }
 0x197   : > { %1680 = dma.vmem_to_hbm [thread:$0]  (%p2079_p6), %s2407_s7, 4096, %s2405_s26, %s1244_s28, %s1941_s22, %s1941_s22, %s1942_s18  }
 0x198 PF: > { %p1702_p11 = scmp.ge.s32.totalorder %s1932_s15, 2  ;;  %s1272_s20 = sand.u32 1, %s1920_s12  }
 0x199   : > { %p2480_p13 = scmp.ne.s32.totalorder %s2470_s19, 0  ;;  %s1273_s16 = scalar_lea.sflag [#allocation4], %s1272_s20 }
 0x19b   : > { %p1694_p3 = pnand %p1702_p11, %p2480_p13 }
 0x19d   : > { %1915 = dma.done.wait (!%p1694_p3), %s1273_s16, 4096  }
 0x19e   : > { %1917 = vsyncadd (!%p1694_p3), %s1273_s16, 4294963200  ;;  %p17_p7 = scmp.ge.s32.totalorder %s2069_s5, 6   ;;  %s2481_s12 = smov %s1924_s13 }
 0x19f   : > { %s2482_s13 = smov %s1928_s14  ;;  %s2483_s14 = smov %s2085_s10 }
 0x1a0   : > { %s2484_s15 = smov %s2069_s5  ;;  %19 = sbr.rel (!%p17_p7) target bundleno = 6 (0x6), region = 85 }
 0x1a7   :  { %1278 = vsyncpa [#allocation3], 1 }
 0x1a8   :  { %1280 = vsyncpa [#allocation3 + $0x1], 1 }
 0x1a9   :  { %1281 = vsyncpa [#allocation6], 1 }
 0x1aa   :  { %1282 = vsyncpa [#allocation4], 1 }
 0x1ab   :  { %1284 = vsyncpa [#allocation4 + $0x1], 1 }

// kernel: vggnet_modified_forward.17
= control target key start
LH: loop header
LB: loop body
LE: loop exit
PB: predicated region body
PF: predicated region fallthrough
CT: control target
= control target key end

     0   :  { %8 = vsyncpa [#allocation3], 0  ;;  %s2501_s0 = inlined_call_operand.hbm [shape: bf16[2048,72], index: 0, kind: input, shape index: {}]   ;;  %s2502_s1 = inlined_call_operand.hbm [shape: bf16[72,8], index: 1, kind: input, shape index: {}]   ;;  %s2503_s2 = inlined_call_operand.hbm [shape: f32[1,8], index: 2, kind: input, shape index: {}]   ;;  %s2504_s3 = inlined_call_operand.hbm [shape: bf16[2048,8], index: 3, kind: output, shape index: {}]  }
   0x1   :  { %10 = vsyncpa [#allocation3 + $0x1], 0 }
   0x2   :  { %11 = vsyncpa [#allocation6], 0 }
   0x3   :  { %12 = vsyncpa [#allocation4], 0 }
   0x4   :  { %14 = vsyncpa [#allocation4 + $0x1], 0  ;;  %s2002_s12 = smov 0   ;;  %s2004_s13 = smov 0  }
   0x5   :  { %s2006_s14 = smov 0   ;;  %s2008_s15 = smov 0  }
   0x6 LB: > { %s2023_s16 = sadd.s32 4294967295, %s1972_s15   ;;  %s1367_s17 = sadd.s32 4294967294, %s1972_s15   ;;  %s1972_s15 = sphi %s2008_s15, %s2523_s15   ;;  %s1968_s14 = sphi %s2006_s14, %s2522_s14   ;;  %s1964_s13 = sphi %s2004_s13, %s2521_s13   ;;  %s1960_s12 = sphi %s2002_s12, %s2520_s12  }
   0x7   : > { %p40_p0 = scmp.ne.s32.totalorder %s1964_s13, %s1960_s12  ;;  %p2505_p1 = scmp.eq.s32.totalorder %s2023_s16, 0 }
   0x8   : > { %p112_p3 = scmp.eq.s32.totalorder %s1367_s17, 3  ;;  %p1368_p5 = scmp.ge.s32.totalorder %s1972_s15, 1 }
   0x9   : > { %p2032_p4 = por %p2505_p1, %p40_p0  ;;  %p119_p7 = scmp.lt.s32.totalorder %s1972_s15, 5 }
   0xa   : > { %p2037_p6 = por %p112_p3, %p40_p0  ;;  %s1974_s21 = smov [#allocation5]  }
   0xb   : > { %s2508_s18 = scalar_select %p2032_p4, 1, 0 }
   0xc   : > { %s2509_s19 = scalar_select %p2037_p6, 1, 0 }
   0xd   : > { %p2042_p8 = pnand %p1368_p5, %p119_p7  ;;  %s131_s22 = sshll.u32 %s1974_s21, 4  ;;  %s132_s22 = int_to_ptr.vmem [resolvable:$true] %s131_s22 }
   0xe   : > { %s1975_s24 = smov [#allocation7]   ;;  %s1816_s28 = scalar_lea.hbm %s2502_s1, 576 }
   0xf   : > { %s2510_s20 = scalar_select %p2042_p8, 1, 0 }
  0x10   : > { %p1720_p9 = pneg %p2042_p8  ;;  %s145_s25 = sshll.u32 %s1975_s24, 4  ;;  %s2054_s25 = int_to_ptr.vmem [resolvable:$true] %s145_s25 }
  0x11   : > { %p1817_p11 = scmp.ne.s32.totalorder %s2502_s1, %s1816_s28  ;;  %p1823_p3 = scmp.lt.u32.totalorder %s1816_s28, %s2502_s1 }
  0x12   : > { %p2050_p10 = pnand %p1720_p9, %p2505_p1 }
  0x14   : > { %p1818_p12 = pneg %p2050_p10 }
  0x16   : > { %p1819_p13 = pnand %p1818_p12, %p1817_p11 }
  0x18   : > { %p1820_p0 = pneg %p1819_p13 }
  0x1a   : > { %p1825_p5 = pnand %p1823_p3, %p1820_p0 }
  0x1c   : > { %1828 = shalt.err (!%p1825_p5)
}
  0x1d   : > { %s1829_s6 = scalar_lea.vmem %s132_s22, 576  ;;  %p1837_p2 = scmp.lt.s32.totalorder %s132_s22, %s132_s22 }
  0x1e   : > { %p1830_p7 = scmp.ne.s32.totalorder %s132_s22, %s1829_s6  ;;  %p1838_p6 = scmp.lt.s32.totalorder %s1829_s6, %s1829_s6 }
  0x20   : > { %p1832_p9 = pnand %p1830_p7, %p1818_p12  ;;  %p1839_p4 = por %p1838_p6, %p1837_p2 }
  0x22   : > { %p1833_p1 = pneg %p1832_p9 }
  0x24   : > { %p1840_p8 = pnand %p1839_p4, %p1833_p1 }
  0x26   : > { %1843 = shalt.err (!%p1840_p8)
}
  0x27   : > { %s1976_s7 = smov 64   ;;  %s1977_s8 = smov 4  }
  0x28   : > { %1723 = dma.hbm_to_vmem [thread:$0]  (!%p2050_p10), %s2502_s1, 576, %s132_s22, [#allocation6], %s1976_s7, %s1976_s7, %s1977_s8  }
  0x29   : > { %s1844_s21 = scalar_lea.hbm %s2503_s2, 16 }
  0x2a   : > { %p1845_p1 = scmp.ne.s32.totalorder %s2503_s2, %s1844_s21  ;;  %p1851_p6 = scmp.lt.u32.totalorder %s1844_s21, %s2503_s2 }
  0x2c   : > { %p1847_p2 = pnand %p1845_p1, %p1818_p12 }
  0x2e   : > { %p1848_p4 = pneg %p1847_p2 }
  0x30   : > { %p1853_p8 = pnand %p1851_p6, %p1848_p4 }
  0x32   : > { %1856 = shalt.err (!%p1853_p8)
}
  0x33   : > { %s1857_s22 = scalar_lea.vmem %s2054_s25, 16  ;;  %s1864_s29 = scalar_lea.vmem %s2054_s25, 32 }
  0x34   : > { %p1858_p11 = scmp.ne.s32.totalorder %s2054_s25, %s1857_s22  ;;  %p1865_p3 = scmp.lt.s32.totalorder %s2054_s25, %s2054_s25 }
  0x35   : > { %p1866_p5 = scmp.lt.s32.totalorder %s1864_s29, %s1857_s22 }
  0x36   : > { %p1860_p13 = pnand %p1858_p11, %p1818_p12 }
  0x37   : > { %p1867_p7 = por %p1866_p5, %p1865_p3 }
  0x38   : > { %p1861_p0 = pneg %p1860_p13 }
  0x3a   : > { %p1868_p9 = pnand %p1867_p7, %p1861_p0 }
  0x3c   : > { %1871 = shalt.err (!%p1868_p9)
}
  0x3d   : > { %1726 = dma.hbm_to_vmem [thread:$0]  (!%p2050_p10), %s2503_s2, 16, %s2054_s25, [#allocation6]  }
  0x3e   : > { %s2108_s5 = sadd.s32 1, %s1972_s15   ;;  %s27_s23 = sadd.s32 1, %s1968_s14 }
  0x3f   : > { %s24_s6 = ssub.s32 %s1972_s15, %s2108_s5  ;;  %p34_p12 = scmp.ne.s32.totalorder %s1968_s14, %s1964_s13 }
  0x40   : > { %p25_p1 = scmp.eq.s32.totalorder %s24_s6, 0  ;;  %p35_p2 = scmp.eq.s32.totalorder %s1972_s15, 0 }
  0x41   : > { %p2512_p4 = scmp.eq.s32.totalorder %s2023_s16, 3  ;;  %p1737_p8 = scmp.lt.s32.totalorder %s1972_s15, 4 }
  0x42   : > { %s2124_s10 = scalar_select %p25_p1, %s1968_s14, %s27_s23  }
  0x43   : > { %p2118_p6 = por %p2512_p4, %p34_p12  ;;  %p36_p11 = por %p35_p2, %p34_p12 }
  0x44   : > { %s156_s11 = sand.u32 1, %s1968_s14   ;;  %s1519_s25 = sshll.u32 %s1972_s15, 12 }
  0x45   : > { %s1372_s17 = sshll.u32 %s156_s11, 8  ;;  %s2131_s26 = scalar_lea.hbm %s2501_s0, %s1519_s25 }
  0x46   : > { %s160_s27 = scalar_lea.vmem [#allocation2], %s1372_s17  ;;  %p2135_p10 = pnand %p1737_p8, %p36_p11 }
  0x47   : > { %s167_s28 = sshll.u32 %s160_s27, 4  ;;  %s2139_s29 = scalar_lea.sflag [#allocation3], %s156_s11  ;;  %s2133_s28 = int_to_ptr.vmem [resolvable:$true] %s167_s28 }
  0x48   : > { %s1872_s30 = scalar_lea.hbm %s2131_s26, 4096  ;;  %p1874_p0 = pneg %p2135_p10 }
  0x49   : > { %p1873_p13 = scmp.ne.s32.totalorder %s2131_s26, %s1872_s30  ;;  %s1877_s6 = scalar_lea.hbm %s2501_s0, 16384 }
  0x4a   : > { %p1878_p7 = scmp.lt.u32.totalorder %s2131_s26, %s2501_s0  ;;  %p1879_p9 = scmp.lt.u32.totalorder %s1877_s6, %s1872_s30 }
  0x4b   : > { %p1875_p3 = pnand %p1874_p0, %p1873_p13  ;;  %p1881_p1 = scmp.lt.u32.totalorder %s1872_s30, %s2131_s26 }
  0x4c   : > { %p1880_p12 = por %p1879_p9, %p1878_p7 }
  0x4d   : > { %p1876_p5 = pneg %p1875_p3 }
  0x4e   : > { %p1882_p2 = por %p1881_p1, %p1880_p12 }
  0x50   : > { %p1883_p4 = pnand %p1882_p2, %p1876_p5 }
  0x52   : > { %1886 = shalt.err (!%p1883_p4)
}
  0x53   : > { %s1887_s11 = scalar_lea.vmem %s2133_s28, 4096  ;;  %s1978_s21 = smov [#allocation2]  }
  0x54   : > { %p1888_p8 = scmp.ne.s32.totalorder %s2133_s28, %s1887_s11  ;;  %s1892_s24 = sshll.u32 %s1978_s21, 4  ;;  %s1893_s24 = int_to_ptr.vmem [resolvable:$false] %s1892_s24 }
  0x55   : > { %s1894_s27 = scalar_lea.vmem %s1893_s24, 8192  ;;  %p1895_p3 = scmp.lt.s32.totalorder %s2133_s28, %s1893_s24 }
  0x56   : > { %p1890_p11 = pnand %p1888_p8, %p1874_p0  ;;  %p1896_p7 = scmp.lt.s32.totalorder %s1894_s27, %s1887_s11 }
  0x58   : > { %p1891_p13 = pneg %p1890_p11  ;;  %p1897_p9 = por %p1896_p7, %p1895_p3 }
  0x5a   : > { %p1898_p12 = pnand %p1897_p9, %p1891_p13 }
  0x5c   : > { %1901 = shalt.err (!%p1898_p12)
}
  0x5d   : > { %1730 = dma.hbm_to_vmem [thread:$0]  (!%p2135_p10), %s2131_s26, 4096, %s2133_s28, %s2139_s29, %s1976_s7, %s1976_s7, %s1977_s8  }
  0x5e   : > { %p2515_p0 = scmp.ne.s32.totalorder %s2510_s20, 0 }
  0x5f   : > { %s2173_s30 = sand.u32 (!%p2515_p0), 1, %s1964_s13   ;;  %p2516_p5 = scmp.ne.s32.totalorder (!%p2515_p0), %s2508_s18, 0 }
  0x60   : > { %179 = sbr.rel (%p2515_p0) target bundleno = 420 (0x1a4), region = 32  ;;  %s1376_s4 = sshll.u32 (!%p2515_p0), %s2173_s30, 8 }
  0x61   : > { %s182_s23 = scalar_lea.sflag (!%p2515_p0), [#allocation3], %s2173_s30  ;;  %s2179_s22 = scalar_lea.vmem (!%p2515_p0), [#allocation2], %s1376_s4 }
  0x67   : > { %1947 = dma.done.wait (%p2516_p5), %s182_s23, 4096  }
  0x68   : > { %1949 = vsyncadd (%p2516_p5), %s182_s23, 4294963200  ;;  %p2517_p10 = scmp.eq.s32.totalorder %s2023_s16, 0 }
  0x6a   : > { %1951 = dma.done.wait (%p2517_p10), [#allocation6], 592   ;;  %p2518_p1 = pmov %p2517_p10 }
  0x6b   : > { %v1779_v0 = vld [vmem:[#allocation5] sm:$0xff]   ;;  %v1780_v1 = vld [vmem:[#allocation5 + $0x8] sm:$0xff]   ;;  %v1781_v2 = vld [vmem:[#allocation5 + $0x10] sm:$0xff]   ;;  %vm486_vm0 = vcmask 588800   ;;  %vm583_vm1 = vcmask 1043456   ;;  %vm1196_vm2 = vcmask 60416  }
  0x6c   : > { %1953 = vsyncadd (%p2518_p1), [#allocation6], 4294966704  ;;  %1622 = vmatprep.subr.bf16.mxu0 %v1779_v0  ;;  %1696 = vmatprep.subr.bf16.mxu1 %v1779_v0  ;;  %v1784_v3 = vld [vmem:[%s2179_s22] sm:$0xff]   ;;  %v1782_v5 = vld [vmem:[#allocation5 + $0x18] sm:$0xff]   ;;  %s2265_s18 = scalar_lea.vmem [#allocation8], %s1376_s4  ;;  %s1584_s20 = sshll.u32 %s2023_s16, 12 }
  0x6d   : > { %1623 = vmatpush3.bf16.msra.mxu0 %v1779_v0  ;;  %1701 = vmatpush3.bf16.msra.mxu1 %v1779_v0  ;;  %v1785_v4 = vld [vmem:[%s2179_s22 + $0x80] sm:$0xff]   ;;  %v1786_v8 = vld [vmem:[%s2179_s22 + $0x8] sm:$0xff]   ;;  %v1788_v10 = vld [vmem:[%s2179_s22 + $0x10] sm:$0xff]   ;;  %s1275_s7 = sshll.u32 %s2265_s18, 4  ;;  %s2444_s26 = scalar_lea.hbm %s2504_s3, %s1584_s20  ;;  %s2446_s7 = int_to_ptr.vmem [resolvable:$true] %s1275_s7 }
  0x6e   : > { %1624 = vmatprep.subr.bf16.mxu0 %v1780_v1  ;;  %1697 = vmatprep.subr.bf16.mxu1 %v1780_v1  ;;  %v1783_v6 = vld [vmem:[#allocation5 + $0x20] ss:$0 sps:$4 sm:$0xff]   ;;  %v1787_v9 = vld [vmem:[%s2179_s22 + $0x88] sm:$0xff]   ;;  %v1789_v11 = vld [vmem:[%s2179_s22 + $0x90] sm:$0xff]   ;;  %s1262_s28 = scalar_lea.sflag [#allocation4], %s2173_s30  ;;  %s1902_s29 = scalar_lea.vmem %s2446_s7, 4096 }
  0x6f   : > { %1632 = vmatprep.mubr.msk.bf16.mxu0 %vm486_vm0, %v1784_v3  ;;  %1664 = vmatprep.mubr.msk.bf16.mxu1 %vm486_vm0, %v1785_v4  ;;  %v585_v7 = vsel %vm583_vm1, %v1783_v6, 0  ;;  %v1790_v12 = vld [vmem:[%s2179_s22 + $0x18] sm:$0xff]   ;;  %v1792_v14 = vld [vmem:[%s2179_s22 + $0x20] sm:$0xff]   ;;  %v1794_v16 = vld [vmem:[%s2179_s22 + $0x28] sm:$0xff]   ;;  %p1903_p2 = scmp.ne.s32.totalorder %s2446_s7, %s1902_s29  ;;  %s1979_s6 = smov [#allocation8]  }
  0x70   : > { %v1791_v13 = vld [vmem:[%s2179_s22 + $0x98] sm:$0xff]   ;;  %v1793_v15 = vld [vmem:[%s2179_s22 + $0xa0] sm:$0xff]   ;;  %v1795_v17 = vld [vmem:[%s2179_s22 + $0xa8] sm:$0xff]   ;;  %s1906_s17 = sshll.u32 %s1979_s6, 4  ;;  %s1907_s17 = int_to_ptr.vmem [resolvable:$false] %s1906_s17 }
  0x71   : > { %1625 = vmatpush3.bf16.msra.mxu0 %v1780_v1  ;;  %1702 = vmatpush3.bf16.msra.mxu1 %v1780_v1  ;;  %v1796_v18 = vld [vmem:[%s2179_s22 + $0x30] sm:$0xff]   ;;  %v1798_v20 = vld [vmem:[%s2179_s22 + $0x38] sm:$0xff]   ;;  %v1800_v22 = vld [vmem:[%s2179_s22 + $0x40] sm:$0xff]   ;;  %p1904_p4 = pnand %p1903_p2, %p2118_p6  ;;  %s1908_s25 = scalar_lea.vmem %s1907_s17, 8192 }
  0x72   : > { %1626 = vmatprep.subr.bf16.mxu0 %v1781_v2  ;;  %1698 = vmatprep.subr.bf16.mxu1 %v1781_v2  ;;  %v1797_v19 = vld [vmem:[%s2179_s22 + $0xb0] sm:$0xff]   ;;  %v1799_v21 = vld [vmem:[%s2179_s22 + $0xb8] sm:$0xff]   ;;  %v1801_v23 = vld [vmem:[%s2179_s22 + $0xc0] sm:$0xff]   ;;  %p1909_p11 = scmp.lt.s32.totalorder %s2446_s7, %s1907_s17  ;;  %p1910_p13 = scmp.lt.s32.totalorder %s1908_s25, %s1902_s29 }
  0x73   : > { %v1802_v24 = vld [vmem:[%s2179_s22 + $0x48] sm:$0xff]   ;;  %v1804_v26 = vld [vmem:[%s2179_s22 + $0x50] sm:$0xff]   ;;  %v1806_v28 = vld [vmem:[%s2179_s22 + $0x58] sm:$0xff]   ;;  %p1905_p8 = pneg %p1904_p4 }
  0x74   : > { %v1803_v25 = vld [vmem:[%s2179_s22 + $0xc8] sm:$0xff]   ;;  %v1805_v27 = vld [vmem:[%s2179_s22 + $0xd0] sm:$0xff]   ;;  %v1807_v29 = vld [vmem:[%s2179_s22 + $0xd8] sm:$0xff]   ;;  %p1911_p3 = por %p1910_p13, %p1909_p11 }
  0x75   : > { %1627 = vmatpush3.bf16.msra.mxu0 %v1781_v2  ;;  %1703 = vmatpush3.bf16.msra.mxu1 %v1781_v2  ;;  %v1808_v30 = vld [vmem:[%s2179_s22 + $0x60] sm:$0xff]   ;;  %v1810_v32 = vld [vmem:[%s2179_s22 + $0x68] sm:$0xff]   ;;  %v1812_v34 = vld [vmem:[%s2179_s22 + $0x70] sm:$0xff]  }
  0x76   : > { %1628 = vmatprep.subr.bf16.mxu0 %v1782_v5  ;;  %1699 = vmatprep.subr.bf16.mxu1 %v1782_v5  ;;  %v1809_v31 = vld [vmem:[%s2179_s22 + $0xe0] sm:$0xff]   ;;  %v1811_v33 = vld [vmem:[%s2179_s22 + $0xe8] sm:$0xff]   ;;  %v1813_v35 = vld [vmem:[%s2179_s22 + $0xf0] sm:$0xff]   ;;  %p1912_p7 = pnand %p1911_p3, %p1905_p8 }
  0x77   : > { %v1814_v36 = vld [vmem:[%s2179_s22 + $0x78] sm:$0xff]   ;;  %v2253_v38 = vld [vmem:[#allocation7] ss:$0 sm:$0xff] }
  0x78   : > { %v1815_v37 = vld [vmem:[%s2179_s22 + $0xf8] sm:$0xff]  }
  0x79   : > { %1629 = vmatpush3.bf16.msra.mxu0 %v1782_v5  ;;  %1704 = vmatpush3.bf16.msra.mxu1 %v1782_v5 }
  0x7a   : > { %1706 = vmatprep.subr.msk.bf16.mxu0 %vm583_vm1, %v1783_v6  ;;  %1707 = vmatprep.subr.msk.bf16.mxu1 %vm583_vm1, %v1783_v6 }
  0x7d   : > { %1631 = vmatpush3.bf16.msra.mxu0 %v585_v7  ;;  %1705 = vmatpush3.bf16.msra.mxu1 %v585_v7 }
  0x80   : > { %1633 = vmatmul.mubr.msk.bf16.vlgmr.msra.gmra.mrb[0].mxu0 %vm486_vm0, %v1786_v8  ;;  %1665 = vmatmul.mubr.msk.bf16.vlgmr.msra.gmra.mrb[0].mxu1 %vm486_vm0, %v1787_v9 }
  0x81   : > { %1636 = vmatprep.mubr.msk.bf16.mxu0 %vm486_vm0, %v1788_v10  ;;  %1668 = vmatprep.mubr.msk.bf16.mxu1 %vm486_vm0, %v1789_v11 }
  0x88   : > { %1637 = vmatmul.mubr.msk.bf16.gmra.mrb[4].mxu0 %vm486_vm0, %v1790_v12  ;;  %1669 = vmatmul.mubr.msk.bf16.gmra.mrb[4].mxu1 %vm486_vm0, %v1791_v13 }
  0x89   : > { %1640 = vmatprep.mubr.msk.bf16.mxu0 %vm486_vm0, %v1792_v14  ;;  %1672 = vmatprep.mubr.msk.bf16.mxu1 %vm486_vm0, %v1793_v15 }
  0x90   : > { %1641 = vmatmul.mubr.msk.bf16.gmra.mrb[8].mxu0 %vm486_vm0, %v1794_v16  ;;  %1673 = vmatmul.mubr.msk.bf16.gmra.mrb[8].mxu1 %vm486_vm0, %v1795_v17 }
  0x91   : > { %1644 = vmatprep.mubr.msk.bf16.mxu0 %vm486_vm0, %v1796_v18  ;;  %1676 = vmatprep.mubr.msk.bf16.mxu1 %vm486_vm0, %v1797_v19 }
  0x98   : > { %1645 = vmatmul.mubr.msk.bf16.gmra.mrb[12].mxu0 %vm486_vm0, %v1798_v20  ;;  %1677 = vmatmul.mubr.msk.bf16.gmra.mrb[12].mxu1 %vm486_vm0, %v1799_v21 }
  0x99   : > { %1648 = vmatprep.mubr.msk.bf16.mxu0 %vm486_vm0, %v1800_v22  ;;  %1680 = vmatprep.mubr.msk.bf16.mxu1 %vm486_vm0, %v1801_v23 }
  0xa0   : > { %1649 = vmatmul.mubr.msk.bf16.gmra.mrb[16].mxu0 %vm486_vm0, %v1802_v24  ;;  %1681 = vmatmul.mubr.msk.bf16.gmra.mrb[16].mxu1 %vm486_vm0, %v1803_v25 }
  0xa1   : > { %1652 = vmatprep.mubr.msk.bf16.mxu0 %vm486_vm0, %v1804_v26  ;;  %1684 = vmatprep.mubr.msk.bf16.mxu1 %vm486_vm0, %v1805_v27 }
  0xa8   : > { %1653 = vmatmul.mubr.msk.bf16.gmra.mrb[20].mxu0 %vm486_vm0, %v1806_v28  ;;  %1685 = vmatmul.mubr.msk.bf16.gmra.mrb[20].mxu1 %vm486_vm0, %v1807_v29 }
  0xa9   : > { %1656 = vmatprep.mubr.msk.bf16.mxu0 %vm486_vm0, %v1808_v30  ;;  %1688 = vmatprep.mubr.msk.bf16.mxu1 %vm486_vm0, %v1809_v31 }
  0xb0   : > { %1657 = vmatmul.mubr.msk.bf16.gmra.mrb[24].mxu0 %vm486_vm0, %v1810_v32  ;;  %1689 = vmatmul.mubr.msk.bf16.gmra.mrb[24].mxu1 %vm486_vm0, %v1811_v33 }
  0xb1   : > { %1660 = vmatprep.mubr.msk.bf16.mxu0 %vm486_vm0, %v1812_v34  ;;  %1692 = vmatprep.mubr.msk.bf16.mxu1 %vm486_vm0, %v1813_v35 }
  0xb8   : > { %1661 = vmatmul.mubr.msk.bf16.gmra.mrb[28].mxu0 %vm486_vm0, %v1814_v36  ;;  %1693 = vmatmul.mubr.msk.bf16.gmra.mrb[28].mxu1 %vm486_vm0, %v1815_v37 }
 0x153   : > { %v1634_v39 = vpop.f32.mrb[0].mxu0  ;;  %v1666_v40 = vpop.f32.mrb[0].mxu1 }
 0x154   : > { %v630_v41 = vadd.f32 %v1634_v39, %v2253_v38  ;;  %v758_v42 = vadd.f32 %v1666_v40, %v2253_v38  ;;  %v621_v43 = vpop.f32.mrb[1].mxu0  ;;  %v749_v44 = vpop.f32.mrb[1].mxu1 }
 0x155   : > { %v622_v45 = vadd.f32 %v2253_v38, %v621_v43  ;;  %v750_v46 = vadd.f32 %v2253_v38, %v749_v44  ;;  %v1635_v47 = vpop.f32.mrb[2].mxu0  ;;  %v1667_v48 = vpop.f32.mrb[2].mxu1 }
 0x156   : > { %v878_v49 = vmax.f32 %v630_v41, 0.0  ;;  %v910_v50 = vmax.f32 %v758_v42, 0.0  ;;  %v633_v51 = vadd.f32 %v1635_v47, %v2253_v38  ;;  %v761_v52 = vadd.f32 %v1667_v48, %v2253_v38  ;;  %v624_v53 = vpop.f32.mrb[3].mxu0  ;;  %v752_v54 = vpop.f32.mrb[3].mxu1 }
 0x157   : > { %v876_v55 = vmax.f32 %v622_v45, 0.0  ;;  %v908_v56 = vmax.f32 %v750_v46, 0.0  ;;  %v625_v57 = vadd.f32 %v2253_v38, %v624_v53  ;;  %v753_v58 = vadd.f32 %v2253_v38, %v752_v54 }
 0x158   : > { %v1522_v59 = vpack.c.bf16 %v878_v49, %v878_v49  ;;  %v1554_v60 = vpack.c.bf16 %v910_v50, %v910_v50  ;;  %v879_v61 = vmax.f32 %v633_v51, 0.0  ;;  %v911_v62 = vmax.f32 %v761_v52, 0.0 }
 0x159   : > { %v1520_v63 = vpack.c.bf16 %v876_v55, %v876_v55  ;;  %v1552_v0 = vpack.c.bf16 %v908_v56, %v908_v56  ;;  %v877_v1 = vmax.f32 %v625_v57, 0.0  ;;  %v909_v2 = vmax.f32 %v753_v58, 0.0 }
 0x15a   : > { %1199 = vst.msk [vmem:[%s2265_s18 + $0x8] sm:$0xf] %vm1196_vm2, %v1522_v59  ;;  %1231 = vst.msk [vmem:[%s2265_s18 + $0x88] sm:$0xf] %vm1196_vm2, %v1554_v60  ;;  %v1523_v3 = vpack.c.bf16 %v879_v61, %v879_v61  ;;  %v1555_v4 = vpack.c.bf16 %v911_v62, %v911_v62 }
 0x15b   : > { %1197 = vst.msk [vmem:[%s2265_s18] sm:$0xf] %vm1196_vm2, %v1520_v63  ;;  %1229 = vst.msk [vmem:[%s2265_s18 + $0x80] sm:$0xf] %vm1196_vm2, %v1552_v0  ;;  %v1521_v5 = vpack.c.bf16 %v877_v1, %v877_v1  ;;  %v1553_v6 = vpack.c.bf16 %v909_v2, %v909_v2  ;;  %v1638_v7 = vpop.f32.mrb[4].mxu0  ;;  %v1670_v8 = vpop.f32.mrb[4].mxu1 }
 0x15c   : > { %1200 = vst.msk [vmem:[%s2265_s18 + $0xc] sm:$0xf] %vm1196_vm2, %v1523_v3  ;;  %1232 = vst.msk [vmem:[%s2265_s18 + $0x8c] sm:$0xf] %vm1196_vm2, %v1555_v4  ;;  %v646_v9 = vadd.f32 %v1638_v7, %v2253_v38  ;;  %v774_v10 = vadd.f32 %v1670_v8, %v2253_v38  ;;  %v637_v11 = vpop.f32.mrb[5].mxu0  ;;  %v765_v12 = vpop.f32.mrb[5].mxu1 }
 0x15d   : > { %1198 = vst.msk [vmem:[%s2265_s18 + $0x4] sm:$0xf] %vm1196_vm2, %v1521_v5  ;;  %1230 = vst.msk [vmem:[%s2265_s18 + $0x84] sm:$0xf] %vm1196_vm2, %v1553_v6  ;;  %v638_v13 = vadd.f32 %v2253_v38, %v637_v11  ;;  %v766_v14 = vadd.f32 %v2253_v38, %v765_v12  ;;  %v1639_v15 = vpop.f32.mrb[6].mxu0  ;;  %v1671_v16 = vpop.f32.mrb[6].mxu1 }
 0x15e   : > { %v882_v17 = vmax.f32 %v646_v9, 0.0  ;;  %v914_v18 = vmax.f32 %v774_v10, 0.0  ;;  %v649_v19 = vadd.f32 %v1639_v15, %v2253_v38  ;;  %v777_v20 = vadd.f32 %v1671_v16, %v2253_v38  ;;  %v640_v21 = vpop.f32.mrb[7].mxu0  ;;  %v768_v22 = vpop.f32.mrb[7].mxu1 }
 0x15f   : > { %v880_v23 = vmax.f32 %v638_v13, 0.0  ;;  %v912_v24 = vmax.f32 %v766_v14, 0.0  ;;  %v641_v25 = vadd.f32 %v2253_v38, %v640_v21  ;;  %v769_v26 = vadd.f32 %v2253_v38, %v768_v22 }
 0x160   : > { %v1526_v27 = vpack.c.bf16 %v882_v17, %v882_v17  ;;  %v1558_v28 = vpack.c.bf16 %v914_v18, %v914_v18  ;;  %v883_v29 = vmax.f32 %v649_v19, 0.0  ;;  %v915_v30 = vmax.f32 %v777_v20, 0.0 }
 0x161   : > { %v1524_v31 = vpack.c.bf16 %v880_v23, %v880_v23  ;;  %v1556_v32 = vpack.c.bf16 %v912_v24, %v912_v24  ;;  %v881_v33 = vmax.f32 %v641_v25, 0.0  ;;  %v913_v34 = vmax.f32 %v769_v26, 0.0 }
 0x162   : > { %1203 = vst.msk [vmem:[%s2265_s18 + $0x18] sm:$0xf] %vm1196_vm2, %v1526_v27  ;;  %1235 = vst.msk [vmem:[%s2265_s18 + $0x98] sm:$0xf] %vm1196_vm2, %v1558_v28  ;;  %v1527_v35 = vpack.c.bf16 %v883_v29, %v883_v29  ;;  %v1559_v36 = vpack.c.bf16 %v915_v30, %v915_v30 }
 0x163   : > { %1201 = vst.msk [vmem:[%s2265_s18 + $0x10] sm:$0xf] %vm1196_vm2, %v1524_v31  ;;  %1233 = vst.msk [vmem:[%s2265_s18 + $0x90] sm:$0xf] %vm1196_vm2, %v1556_v32  ;;  %v1525_v37 = vpack.c.bf16 %v881_v33, %v881_v33  ;;  %v1557_v39 = vpack.c.bf16 %v913_v34, %v913_v34  ;;  %v1642_v40 = vpop.f32.mrb[8].mxu0  ;;  %v1674_v41 = vpop.f32.mrb[8].mxu1 }
 0x164   : > { %1204 = vst.msk [vmem:[%s2265_s18 + $0x1c] sm:$0xf] %vm1196_vm2, %v1527_v35  ;;  %1236 = vst.msk [vmem:[%s2265_s18 + $0x9c] sm:$0xf] %vm1196_vm2, %v1559_v36  ;;  %v662_v42 = vadd.f32 %v1642_v40, %v2253_v38  ;;  %v790_v43 = vadd.f32 %v1674_v41, %v2253_v38  ;;  %v653_v44 = vpop.f32.mrb[9].mxu0  ;;  %v781_v45 = vpop.f32.mrb[9].mxu1 }
 0x165   : > { %1202 = vst.msk [vmem:[%s2265_s18 + $0x14] sm:$0xf] %vm1196_vm2, %v1525_v37  ;;  %1234 = vst.msk [vmem:[%s2265_s18 + $0x94] sm:$0xf] %vm1196_vm2, %v1557_v39  ;;  %v654_v46 = vadd.f32 %v2253_v38, %v653_v44  ;;  %v782_v47 = vadd.f32 %v2253_v38, %v781_v45  ;;  %v1643_v48 = vpop.f32.mrb[10].mxu0  ;;  %v1675_v49 = vpop.f32.mrb[10].mxu1 }
 0x166   : > { %v886_v50 = vmax.f32 %v662_v42, 0.0  ;;  %v918_v51 = vmax.f32 %v790_v43, 0.0  ;;  %v665_v52 = vadd.f32 %v1643_v48, %v2253_v38  ;;  %v793_v53 = vadd.f32 %v1675_v49, %v2253_v38  ;;  %v656_v54 = vpop.f32.mrb[11].mxu0  ;;  %v784_v55 = vpop.f32.mrb[11].mxu1 }
 0x167   : > { %v884_v56 = vmax.f32 %v654_v46, 0.0  ;;  %v916_v57 = vmax.f32 %v782_v47, 0.0  ;;  %v657_v58 = vadd.f32 %v2253_v38, %v656_v54  ;;  %v785_v59 = vadd.f32 %v2253_v38, %v784_v55 }
 0x168   : > { %v1530_v60 = vpack.c.bf16 %v886_v50, %v886_v50  ;;  %v1562_v61 = vpack.c.bf16 %v918_v51, %v918_v51  ;;  %v887_v62 = vmax.f32 %v665_v52, 0.0  ;;  %v919_v63 = vmax.f32 %v793_v53, 0.0 }
 0x169   : > { %v1528_v0 = vpack.c.bf16 %v884_v56, %v884_v56  ;;  %v1560_v1 = vpack.c.bf16 %v916_v57, %v916_v57  ;;  %v885_v2 = vmax.f32 %v657_v58, 0.0  ;;  %v917_v3 = vmax.f32 %v785_v59, 0.0 }
 0x16a   : > { %1207 = vst.msk [vmem:[%s2265_s18 + $0x28] sm:$0xf] %vm1196_vm2, %v1530_v60  ;;  %1239 = vst.msk [vmem:[%s2265_s18 + $0xa8] sm:$0xf] %vm1196_vm2, %v1562_v61  ;;  %v1531_v4 = vpack.c.bf16 %v887_v62, %v887_v62  ;;  %v1563_v5 = vpack.c.bf16 %v919_v63, %v919_v63 }
 0x16b   : > { %1205 = vst.msk [vmem:[%s2265_s18 + $0x20] sm:$0xf] %vm1196_vm2, %v1528_v0  ;;  %1237 = vst.msk [vmem:[%s2265_s18 + $0xa0] sm:$0xf] %vm1196_vm2, %v1560_v1  ;;  %v1529_v6 = vpack.c.bf16 %v885_v2, %v885_v2  ;;  %v1561_v7 = vpack.c.bf16 %v917_v3, %v917_v3  ;;  %v1646_v8 = vpop.f32.mrb[12].mxu0  ;;  %v1678_v9 = vpop.f32.mrb[12].mxu1 }
 0x16c   : > { %1208 = vst.msk [vmem:[%s2265_s18 + $0x2c] sm:$0xf] %vm1196_vm2, %v1531_v4  ;;  %1240 = vst.msk [vmem:[%s2265_s18 + $0xac] sm:$0xf] %vm1196_vm2, %v1563_v5  ;;  %v678_v10 = vadd.f32 %v1646_v8, %v2253_v38  ;;  %v806_v11 = vadd.f32 %v1678_v9, %v2253_v38  ;;  %v669_v12 = vpop.f32.mrb[13].mxu0  ;;  %v797_v13 = vpop.f32.mrb[13].mxu1 }
 0x16d   : > { %1206 = vst.msk [vmem:[%s2265_s18 + $0x24] sm:$0xf] %vm1196_vm2, %v1529_v6  ;;  %1238 = vst.msk [vmem:[%s2265_s18 + $0xa4] sm:$0xf] %vm1196_vm2, %v1561_v7  ;;  %v670_v14 = vadd.f32 %v2253_v38, %v669_v12  ;;  %v798_v15 = vadd.f32 %v2253_v38, %v797_v13  ;;  %v1647_v16 = vpop.f32.mrb[14].mxu0  ;;  %v1679_v17 = vpop.f32.mrb[14].mxu1 }
 0x16e   : > { %v890_v18 = vmax.f32 %v678_v10, 0.0  ;;  %v922_v19 = vmax.f32 %v806_v11, 0.0  ;;  %v681_v20 = vadd.f32 %v1647_v16, %v2253_v38  ;;  %v809_v21 = vadd.f32 %v1679_v17, %v2253_v38  ;;  %v672_v22 = vpop.f32.mrb[15].mxu0  ;;  %v800_v23 = vpop.f32.mrb[15].mxu1 }
 0x16f   : > { %v888_v24 = vmax.f32 %v670_v14, 0.0  ;;  %v920_v25 = vmax.f32 %v798_v15, 0.0  ;;  %v673_v26 = vadd.f32 %v2253_v38, %v672_v22  ;;  %v801_v27 = vadd.f32 %v2253_v38, %v800_v23 }
 0x170   : > { %v1534_v28 = vpack.c.bf16 %v890_v18, %v890_v18  ;;  %v1566_v29 = vpack.c.bf16 %v922_v19, %v922_v19  ;;  %v891_v30 = vmax.f32 %v681_v20, 0.0  ;;  %v923_v31 = vmax.f32 %v809_v21, 0.0 }
 0x171   : > { %v1532_v32 = vpack.c.bf16 %v888_v24, %v888_v24  ;;  %v1564_v33 = vpack.c.bf16 %v920_v25, %v920_v25  ;;  %v889_v34 = vmax.f32 %v673_v26, 0.0  ;;  %v921_v35 = vmax.f32 %v801_v27, 0.0 }
 0x172   : > { %1211 = vst.msk [vmem:[%s2265_s18 + $0x38] sm:$0xf] %vm1196_vm2, %v1534_v28  ;;  %1243 = vst.msk [vmem:[%s2265_s18 + $0xb8] sm:$0xf] %vm1196_vm2, %v1566_v29  ;;  %v1535_v36 = vpack.c.bf16 %v891_v30, %v891_v30  ;;  %v1567_v37 = vpack.c.bf16 %v923_v31, %v923_v31 }
 0x173   : > { %1209 = vst.msk [vmem:[%s2265_s18 + $0x30] sm:$0xf] %vm1196_vm2, %v1532_v32  ;;  %1241 = vst.msk [vmem:[%s2265_s18 + $0xb0] sm:$0xf] %vm1196_vm2, %v1564_v33  ;;  %v1533_v39 = vpack.c.bf16 %v889_v34, %v889_v34  ;;  %v1565_v40 = vpack.c.bf16 %v921_v35, %v921_v35  ;;  %v1650_v41 = vpop.f32.mrb[16].mxu0  ;;  %v1682_v42 = vpop.f32.mrb[16].mxu1 }
 0x174   : > { %1212 = vst.msk [vmem:[%s2265_s18 + $0x3c] sm:$0xf] %vm1196_vm2, %v1535_v36  ;;  %1244 = vst.msk [vmem:[%s2265_s18 + $0xbc] sm:$0xf] %vm1196_vm2, %v1567_v37  ;;  %v694_v43 = vadd.f32 %v1650_v41, %v2253_v38  ;;  %v822_v44 = vadd.f32 %v1682_v42, %v2253_v38  ;;  %v685_v45 = vpop.f32.mrb[17].mxu0  ;;  %v813_v46 = vpop.f32.mrb[17].mxu1 }
 0x175   : > { %1210 = vst.msk [vmem:[%s2265_s18 + $0x34] sm:$0xf] %vm1196_vm2, %v1533_v39  ;;  %1242 = vst.msk [vmem:[%s2265_s18 + $0xb4] sm:$0xf] %vm1196_vm2, %v1565_v40  ;;  %v686_v47 = vadd.f32 %v2253_v38, %v685_v45  ;;  %v814_v48 = vadd.f32 %v2253_v38, %v813_v46  ;;  %v1651_v49 = vpop.f32.mrb[18].mxu0  ;;  %v1683_v50 = vpop.f32.mrb[18].mxu1 }
 0x176   : > { %v894_v51 = vmax.f32 %v694_v43, 0.0  ;;  %v926_v52 = vmax.f32 %v822_v44, 0.0  ;;  %v697_v53 = vadd.f32 %v1651_v49, %v2253_v38  ;;  %v825_v54 = vadd.f32 %v1683_v50, %v2253_v38  ;;  %v688_v55 = vpop.f32.mrb[19].mxu0  ;;  %v816_v56 = vpop.f32.mrb[19].mxu1 }
 0x177   : > { %v892_v57 = vmax.f32 %v686_v47, 0.0  ;;  %v924_v58 = vmax.f32 %v814_v48, 0.0  ;;  %v689_v59 = vadd.f32 %v2253_v38, %v688_v55  ;;  %v817_v60 = vadd.f32 %v2253_v38, %v816_v56 }
 0x178   : > { %v1538_v61 = vpack.c.bf16 %v894_v51, %v894_v51  ;;  %v1570_v62 = vpack.c.bf16 %v926_v52, %v926_v52  ;;  %v895_v63 = vmax.f32 %v697_v53, 0.0  ;;  %v927_v0 = vmax.f32 %v825_v54, 0.0 }
 0x179   : > { %v1536_v1 = vpack.c.bf16 %v892_v57, %v892_v57  ;;  %v1568_v2 = vpack.c.bf16 %v924_v58, %v924_v58  ;;  %v893_v3 = vmax.f32 %v689_v59, 0.0  ;;  %v925_v4 = vmax.f32 %v817_v60, 0.0 }
 0x17a   : > { %1215 = vst.msk [vmem:[%s2265_s18 + $0x48] sm:$0xf] %vm1196_vm2, %v1538_v61  ;;  %1247 = vst.msk [vmem:[%s2265_s18 + $0xc8] sm:$0xf] %vm1196_vm2, %v1570_v62  ;;  %v1539_v5 = vpack.c.bf16 %v895_v63, %v895_v63  ;;  %v1571_v6 = vpack.c.bf16 %v927_v0, %v927_v0 }
 0x17b   : > { %1213 = vst.msk [vmem:[%s2265_s18 + $0x40] sm:$0xf] %vm1196_vm2, %v1536_v1  ;;  %1245 = vst.msk [vmem:[%s2265_s18 + $0xc0] sm:$0xf] %vm1196_vm2, %v1568_v2  ;;  %v1537_v7 = vpack.c.bf16 %v893_v3, %v893_v3  ;;  %v1569_v8 = vpack.c.bf16 %v925_v4, %v925_v4  ;;  %v1654_v9 = vpop.f32.mrb[20].mxu0  ;;  %v1686_v10 = vpop.f32.mrb[20].mxu1 }
 0x17c   : > { %1216 = vst.msk [vmem:[%s2265_s18 + $0x4c] sm:$0xf] %vm1196_vm2, %v1539_v5  ;;  %1248 = vst.msk [vmem:[%s2265_s18 + $0xcc] sm:$0xf] %vm1196_vm2, %v1571_v6  ;;  %v710_v11 = vadd.f32 %v1654_v9, %v2253_v38  ;;  %v838_v12 = vadd.f32 %v1686_v10, %v2253_v38  ;;  %v701_v13 = vpop.f32.mrb[21].mxu0  ;;  %v829_v14 = vpop.f32.mrb[21].mxu1 }
 0x17d   : > { %1214 = vst.msk [vmem:[%s2265_s18 + $0x44] sm:$0xf] %vm1196_vm2, %v1537_v7  ;;  %1246 = vst.msk [vmem:[%s2265_s18 + $0xc4] sm:$0xf] %vm1196_vm2, %v1569_v8  ;;  %v702_v15 = vadd.f32 %v2253_v38, %v701_v13  ;;  %v830_v16 = vadd.f32 %v2253_v38, %v829_v14  ;;  %v1655_v17 = vpop.f32.mrb[22].mxu0  ;;  %v1687_v18 = vpop.f32.mrb[22].mxu1 }
 0x17e   : > { %v898_v19 = vmax.f32 %v710_v11, 0.0  ;;  %v930_v20 = vmax.f32 %v838_v12, 0.0  ;;  %v713_v21 = vadd.f32 %v1655_v17, %v2253_v38  ;;  %v841_v22 = vadd.f32 %v1687_v18, %v2253_v38  ;;  %v704_v23 = vpop.f32.mrb[23].mxu0  ;;  %v832_v24 = vpop.f32.mrb[23].mxu1 }
 0x17f   : > { %v896_v25 = vmax.f32 %v702_v15, 0.0  ;;  %v928_v26 = vmax.f32 %v830_v16, 0.0  ;;  %v705_v27 = vadd.f32 %v2253_v38, %v704_v23  ;;  %v833_v28 = vadd.f32 %v2253_v38, %v832_v24 }
 0x180   : > { %v1542_v29 = vpack.c.bf16 %v898_v19, %v898_v19  ;;  %v1574_v30 = vpack.c.bf16 %v930_v20, %v930_v20  ;;  %v899_v31 = vmax.f32 %v713_v21, 0.0  ;;  %v931_v32 = vmax.f32 %v841_v22, 0.0 }
 0x181   : > { %v1540_v33 = vpack.c.bf16 %v896_v25, %v896_v25  ;;  %v1572_v34 = vpack.c.bf16 %v928_v26, %v928_v26  ;;  %v897_v35 = vmax.f32 %v705_v27, 0.0  ;;  %v929_v36 = vmax.f32 %v833_v28, 0.0 }
 0x182   : > { %1219 = vst.msk [vmem:[%s2265_s18 + $0x58] sm:$0xf] %vm1196_vm2, %v1542_v29  ;;  %1251 = vst.msk [vmem:[%s2265_s18 + $0xd8] sm:$0xf] %vm1196_vm2, %v1574_v30  ;;  %v1543_v37 = vpack.c.bf16 %v899_v31, %v899_v31  ;;  %v1575_v39 = vpack.c.bf16 %v931_v32, %v931_v32 }
 0x183   : > { %1217 = vst.msk [vmem:[%s2265_s18 + $0x50] sm:$0xf] %vm1196_vm2, %v1540_v33  ;;  %1249 = vst.msk [vmem:[%s2265_s18 + $0xd0] sm:$0xf] %vm1196_vm2, %v1572_v34  ;;  %v1541_v40 = vpack.c.bf16 %v897_v35, %v897_v35  ;;  %v1573_v41 = vpack.c.bf16 %v929_v36, %v929_v36  ;;  %v1658_v42 = vpop.f32.mrb[24].mxu0  ;;  %v1690_v43 = vpop.f32.mrb[24].mxu1 }
 0x184   : > { %1220 = vst.msk [vmem:[%s2265_s18 + $0x5c] sm:$0xf] %vm1196_vm2, %v1543_v37  ;;  %1252 = vst.msk [vmem:[%s2265_s18 + $0xdc] sm:$0xf] %vm1196_vm2, %v1575_v39  ;;  %v726_v44 = vadd.f32 %v1658_v42, %v2253_v38  ;;  %v854_v45 = vadd.f32 %v1690_v43, %v2253_v38  ;;  %v717_v46 = vpop.f32.mrb[25].mxu0  ;;  %v845_v47 = vpop.f32.mrb[25].mxu1 }
 0x185   : > { %1218 = vst.msk [vmem:[%s2265_s18 + $0x54] sm:$0xf] %vm1196_vm2, %v1541_v40  ;;  %1250 = vst.msk [vmem:[%s2265_s18 + $0xd4] sm:$0xf] %vm1196_vm2, %v1573_v41  ;;  %v718_v48 = vadd.f32 %v2253_v38, %v717_v46  ;;  %v846_v49 = vadd.f32 %v2253_v38, %v845_v47  ;;  %v1659_v50 = vpop.f32.mrb[26].mxu0  ;;  %v1691_v51 = vpop.f32.mrb[26].mxu1 }
 0x186   : > { %v902_v52 = vmax.f32 %v726_v44, 0.0  ;;  %v934_v53 = vmax.f32 %v854_v45, 0.0  ;;  %v729_v54 = vadd.f32 %v1659_v50, %v2253_v38  ;;  %v857_v55 = vadd.f32 %v1691_v51, %v2253_v38  ;;  %v720_v56 = vpop.f32.mrb[27].mxu0  ;;  %v848_v57 = vpop.f32.mrb[27].mxu1 }
 0x187   : > { %v900_v58 = vmax.f32 %v718_v48, 0.0  ;;  %v932_v59 = vmax.f32 %v846_v49, 0.0  ;;  %v721_v60 = vadd.f32 %v2253_v38, %v720_v56  ;;  %v849_v61 = vadd.f32 %v2253_v38, %v848_v57 }
 0x188   : > { %v1546_v62 = vpack.c.bf16 %v902_v52, %v902_v52  ;;  %v1578_v63 = vpack.c.bf16 %v934_v53, %v934_v53  ;;  %v903_v0 = vmax.f32 %v729_v54, 0.0  ;;  %v935_v1 = vmax.f32 %v857_v55, 0.0 }
 0x189   : > { %v1544_v2 = vpack.c.bf16 %v900_v58, %v900_v58  ;;  %v1576_v3 = vpack.c.bf16 %v932_v59, %v932_v59  ;;  %v901_v4 = vmax.f32 %v721_v60, 0.0  ;;  %v933_v5 = vmax.f32 %v849_v61, 0.0 }
 0x18a   : > { %1223 = vst.msk [vmem:[%s2265_s18 + $0x68] sm:$0xf] %vm1196_vm2, %v1546_v62  ;;  %1255 = vst.msk [vmem:[%s2265_s18 + $0xe8] sm:$0xf] %vm1196_vm2, %v1578_v63  ;;  %v1547_v6 = vpack.c.bf16 %v903_v0, %v903_v0  ;;  %v1579_v7 = vpack.c.bf16 %v935_v1, %v935_v1 }
 0x18b   : > { %1221 = vst.msk [vmem:[%s2265_s18 + $0x60] sm:$0xf] %vm1196_vm2, %v1544_v2  ;;  %1253 = vst.msk [vmem:[%s2265_s18 + $0xe0] sm:$0xf] %vm1196_vm2, %v1576_v3  ;;  %v1545_v8 = vpack.c.bf16 %v901_v4, %v901_v4  ;;  %v1577_v9 = vpack.c.bf16 %v933_v5, %v933_v5  ;;  %v1662_v10 = vpop.f32.mrb[28].mxu0  ;;  %v1694_v11 = vpop.f32.mrb[28].mxu1 }
 0x18c   : > { %1224 = vst.msk [vmem:[%s2265_s18 + $0x6c] sm:$0xf] %vm1196_vm2, %v1547_v6  ;;  %1256 = vst.msk [vmem:[%s2265_s18 + $0xec] sm:$0xf] %vm1196_vm2, %v1579_v7  ;;  %v742_v12 = vadd.f32 %v1662_v10, %v2253_v38  ;;  %v870_v13 = vadd.f32 %v1694_v11, %v2253_v38  ;;  %v733_v14 = vpop.f32.mrb[29].mxu0  ;;  %v861_v15 = vpop.f32.mrb[29].mxu1 }
 0x18d   : > { %1222 = vst.msk [vmem:[%s2265_s18 + $0x64] sm:$0xf] %vm1196_vm2, %v1545_v8  ;;  %1254 = vst.msk [vmem:[%s2265_s18 + $0xe4] sm:$0xf] %vm1196_vm2, %v1577_v9  ;;  %v734_v16 = vadd.f32 %v2253_v38, %v733_v14  ;;  %v862_v17 = vadd.f32 %v2253_v38, %v861_v15  ;;  %v1663_v18 = vpop.f32.mrb[30].mxu0  ;;  %v1695_v19 = vpop.f32.mrb[30].mxu1 }
 0x18e   : > { %v906_v20 = vmax.f32 %v742_v12, 0.0  ;;  %v938_v21 = vmax.f32 %v870_v13, 0.0  ;;  %v745_v22 = vadd.f32 %v1663_v18, %v2253_v38  ;;  %v873_v23 = vadd.f32 %v1695_v19, %v2253_v38  ;;  %v736_v24 = vpop.f32.mrb[31].mxu0  ;;  %v864_v25 = vpop.f32.mrb[31].mxu1 }
 0x18f   : > { %v904_v26 = vmax.f32 %v734_v16, 0.0  ;;  %v936_v27 = vmax.f32 %v862_v17, 0.0  ;;  %v737_v28 = vadd.f32 %v2253_v38, %v736_v24  ;;  %v865_v29 = vadd.f32 %v2253_v38, %v864_v25 }
 0x190   : > { %v1550_v30 = vpack.c.bf16 %v906_v20, %v906_v20  ;;  %v1582_v31 = vpack.c.bf16 %v938_v21, %v938_v21  ;;  %v907_v32 = vmax.f32 %v745_v22, 0.0  ;;  %v939_v33 = vmax.f32 %v873_v23, 0.0 }
 0x191   : > { %v1548_v34 = vpack.c.bf16 %v904_v26, %v904_v26  ;;  %v1580_v35 = vpack.c.bf16 %v936_v27, %v936_v27  ;;  %v905_v36 = vmax.f32 %v737_v28, 0.0  ;;  %v937_v37 = vmax.f32 %v865_v29, 0.0 }
 0x192   : > { %1227 = vst.msk [vmem:[%s2265_s18 + $0x78] sm:$0xf] %vm1196_vm2, %v1550_v30  ;;  %1259 = vst.msk [vmem:[%s2265_s18 + $0xf8] sm:$0xf] %vm1196_vm2, %v1582_v31  ;;  %v1551_v38 = vpack.c.bf16 %v907_v32, %v907_v32  ;;  %v1583_v39 = vpack.c.bf16 %v939_v33, %v939_v33 }
 0x193   : > { %1225 = vst.msk [vmem:[%s2265_s18 + $0x70] sm:$0xf] %vm1196_vm2, %v1548_v34  ;;  %1257 = vst.msk [vmem:[%s2265_s18 + $0xf0] sm:$0xf] %vm1196_vm2, %v1580_v35  ;;  %v1549_v40 = vpack.c.bf16 %v905_v36, %v905_v36  ;;  %v1581_v41 = vpack.c.bf16 %v937_v37, %v937_v37 }
 0x194   : > { %1228 = vst.msk [vmem:[%s2265_s18 + $0x7c] sm:$0xf] %vm1196_vm2, %v1551_v38  ;;  %1260 = vst.msk [vmem:[%s2265_s18 + $0xfc] sm:$0xf] %vm1196_vm2, %v1583_v39 }
 0x195   : > { %1226 = vst.msk [vmem:[%s2265_s18 + $0x74] sm:$0xf] %vm1196_vm2, %v1549_v40  ;;  %1258 = vst.msk [vmem:[%s2265_s18 + $0xf4] sm:$0xf] %vm1196_vm2, %v1581_v41 }
 0x196   : > { %1915 = shalt.err (!%p1912_p7)
}
 0x197   : > { %s1916_s11 = scalar_lea.hbm %s2444_s26, 4096  ;;  %s1920_s27 = scalar_lea.hbm %s2504_s3, 16384 }
 0x198   : > { %p1917_p9 = scmp.ne.s32.totalorder %s2444_s26, %s1916_s11  ;;  %p1921_p5 = scmp.lt.u32.totalorder %s2444_s26, %s2504_s3 }
 0x199   : > { %p1922_p10 = scmp.lt.u32.totalorder %s1920_s27, %s1916_s11  ;;  %p1924_p2 = scmp.lt.u32.totalorder %s1916_s11, %s2444_s26 }
 0x19a   : > { %p1918_p12 = pnand %p1917_p9, %p2118_p6 }
 0x19b   : > { %p1923_p1 = por %p1922_p10, %p1921_p5 }
 0x19c   : > { %p1919_p0 = pneg %p1918_p12 }
 0x19d   : > { %p1925_p4 = por %p1924_p2, %p1923_p1 }
 0x19f   : > { %p1926_p8 = pnand %p1925_p4, %p1919_p0 }
 0x1a1   : > { %1929 = shalt.err (!%p1926_p8)
}
 0x1a2   : > { %s1980_s22 = smov 64   ;;  %s1981_s18 = smov 4  }
 0x1a3   : > { %1718 = dma.vmem_to_hbm [thread:$0]  (%p2118_p6), %s2446_s7, 4096, %s2444_s26, %s1262_s28, %s1980_s22, %s1980_s22, %s1981_s18  }
 0x1a4 PF: > { %p1740_p11 = scmp.ge.s32.totalorder %s1972_s15, 2  ;;  %s1290_s20 = sand.u32 1, %s1960_s12  }
 0x1a5   : > { %p2519_p13 = scmp.ne.s32.totalorder %s2509_s19, 0  ;;  %s1291_s16 = scalar_lea.sflag [#allocation4], %s1290_s20 }
 0x1a7   : > { %p1732_p3 = pnand %p1740_p11, %p2519_p13 }
 0x1a9   : > { %1955 = dma.done.wait (!%p1732_p3), %s1291_s16, 4096  }
 0x1aa   : > { %1957 = vsyncadd (!%p1732_p3), %s1291_s16, 4294963200  ;;  %p17_p7 = scmp.ge.s32.totalorder %s2108_s5, 6   ;;  %s2520_s12 = smov %s1964_s13 }
 0x1ab   : > { %s2521_s13 = smov %s1968_s14  ;;  %s2522_s14 = smov %s2124_s10 }
 0x1ac   : > { %s2523_s15 = smov %s2108_s5  ;;  %19 = sbr.rel (!%p17_p7) target bundleno = 6 (0x6), region = 85 }
 0x1b3   :  { %1296 = vsyncpa [#allocation3], 1 }
 0x1b4   :  { %1298 = vsyncpa [#allocation3 + $0x1], 1 }
 0x1b5   :  { %1299 = vsyncpa [#allocation6], 1 }
 0x1b6   :  { %1300 = vsyncpa [#allocation4], 1 }
 0x1b7   :  { %1302 = vsyncpa [#allocation4 + $0x1], 1 }

// kernel: vggnet_modified_forward.18
= control target key start
LH: loop header
LB: loop body
LE: loop exit
PB: predicated region body
PF: predicated region fallthrough
CT: control target
= control target key end

     0   :  { %8 = vsyncpa [#allocation3], 0  ;;  %s1825_s0 = inlined_call_operand.hbm [shape: bf16[512,72], index: 0, kind: input, shape index: {}]   ;;  %s1826_s1 = inlined_call_operand.hbm [shape: bf16[72,16], index: 1, kind: input, shape index: {}]   ;;  %s1827_s2 = inlined_call_operand.hbm [shape: f32[1,16], index: 2, kind: input, shape index: {}]   ;;  %s1828_s3 = inlined_call_operand.hbm [shape: bf16[512,16], index: 3, kind: output, shape index: {}]  }
   0x1   :  { %9 = vsyncpa [#allocation6], 0 }
   0x2   :  { %10 = vsyncpa [#allocation4], 0  ;;  %s1573_s12 = smov [#allocation5]   ;;  %s1574_s14 = smov [#allocation2]  }
   0x3   :  { %s28_s13 = sshll.u32 %s1573_s12, 4  ;;  %s16_s15 = sshll.u32 %s1574_s14, 4  ;;  %s29_s13 = int_to_ptr.vmem [resolvable:$true] %s28_s13  ;;  %s1599_s15 = int_to_ptr.vmem [resolvable:$true] %s16_s15 }
   0x4   :  { %s1479_s18 = scalar_lea.hbm %s1826_s1, 576 }
   0x5   :  { %p1480_p0 = scmp.ne.s32.totalorder %s1826_s1, %s1479_s18  ;;  %p1483_p1 = scmp.lt.u32.totalorder %s1479_s18, %s1826_s1 }
   0x7   :  { %p1485_p2 = pnand %p1483_p1, %p1480_p0 }
   0x9   :  { %1488 = shalt.err (!%p1485_p2)
}
   0xa   :  { %s1489_s23 = scalar_lea.vmem %s29_s13, 576  ;;  %p1494_p4 = scmp.lt.s32.totalorder %s29_s13, %s29_s13 }
   0xb   :  { %p1490_p3 = scmp.ne.s32.totalorder %s29_s13, %s1489_s23  ;;  %p1495_p5 = scmp.lt.s32.totalorder %s1489_s23, %s1489_s23 }
   0xd   :  { %p1496_p6 = por %p1495_p5, %p1494_p4 }
   0xf   :  { %p1497_p7 = pnand %p1496_p6, %p1490_p3 }
  0x11   :  { %1500 = shalt.err (!%p1497_p7)
}
  0x12   :  { %s1575_s24 = smov 64   ;;  %s1576_s25 = smov 4  }
  0x13   :  { %34 = dma.hbm_to_vmem [thread:$0]  %s1826_s1, 576, %s29_s13, [#allocation6], %s1575_s24, %s1575_s24, %s1576_s25  }
  0x14   :  { %s1501_s30 = scalar_lea.hbm %s1825_s0, 4096 }
  0x15   :  { %p1502_p8 = scmp.ne.s32.totalorder %s1825_s0, %s1501_s30  ;;  %p1505_p9 = scmp.lt.u32.totalorder %s1501_s30, %s1825_s0 }
  0x17   :  { %p1507_p10 = pnand %p1505_p9, %p1502_p8 }
  0x19   :  { %1510 = shalt.err (!%p1507_p10)
}
  0x1a   :  { %s1511_s8 = scalar_lea.vmem %s1599_s15, 4096  ;;  %p1516_p12 = scmp.lt.s32.totalorder %s1599_s15, %s1599_s15 }
  0x1b   :  { %p1512_p11 = scmp.ne.s32.totalorder %s1599_s15, %s1511_s8  ;;  %p1517_p13 = scmp.lt.s32.totalorder %s1511_s8, %s1511_s8 }
  0x1d   :  { %p1518_p0 = por %p1517_p13, %p1516_p12 }
  0x1f   :  { %p1519_p1 = pnand %p1518_p0, %p1512_p11 }
  0x21   :  { %1522 = shalt.err (!%p1519_p1)
}
  0x22   :  { %22 = dma.hbm_to_vmem [thread:$0]  %s1825_s0, 4096, %s1599_s15, [#allocation3], %s1575_s24, %s1575_s24, %s1576_s25  }
  0x23   :  { %s1577_s10 = smov [#allocation7]   ;;  %s1523_s14 = scalar_lea.hbm %s1827_s2, 16 }
  0x24   :  { %s41_s11 = sshll.u32 %s1577_s10, 4  ;;  %p1524_p2 = scmp.ne.s32.totalorder %s1827_s2, %s1523_s14  ;;  %s42_s11 = int_to_ptr.vmem [resolvable:$true] %s41_s11 }
  0x25   :  { %p1527_p3 = scmp.lt.u32.totalorder %s1523_s14, %s1827_s2 }
  0x27   :  { %p1529_p4 = pnand %p1527_p3, %p1524_p2 }
  0x29   :  { %1532 = shalt.err (!%p1529_p4)
}
  0x2a   :  { %s1533_s20 = scalar_lea.vmem %s42_s11, 16  ;;  %s1537_s0 = scalar_lea.vmem %s42_s11, 32 }
  0x2b   :  { %p1534_p5 = scmp.ne.s32.totalorder %s42_s11, %s1533_s20  ;;  %p1538_p6 = scmp.lt.s32.totalorder %s42_s11, %s42_s11 }
  0x2c   :  { %p1539_p7 = scmp.lt.s32.totalorder %s1537_s0, %s1533_s20 }
  0x2e   :  { %p1540_p8 = por %p1539_p7, %p1538_p6 }
  0x30   :  { %p1541_p9 = pnand %p1540_p8, %p1534_p5 }
  0x32   :  { %1544 = shalt.err (!%p1541_p9)
}
  0x33   :  { %44 = dma.hbm_to_vmem [thread:$0]  %s1827_s2, 16, %s42_s11, [#allocation6]  }
  0x34   :  { %1567 = dma.done.wait [#allocation3], 4096  }
  0x35   :  { %1568 = vsyncadd [#allocation3], 4294963200 }
  0x36   :  { %1569 = dma.done.wait [#allocation6], 592  }
  0x37   :  { %1570 = vsyncadd [#allocation6], 4294966704  ;;  %v1442_v0 = vld [vmem:[#allocation5] sm:$0xff]   ;;  %v1443_v1 = vld [vmem:[#allocation5 + $0x8] sm:$0xff]   ;;  %vm322_vm0 = vcmask 588800   ;;  %vm419_vm1 = vcmask 1043456  }
  0x38   :  { %1350 = vmatprep.subr.bf16.mxu0 %v1442_v0  ;;  %1424 = vmatprep.subr.bf16.mxu1 %v1442_v0  ;;  %v1444_v2 = vld [vmem:[#allocation5 + $0x10] sm:$0xff]   ;;  %v1447_v3 = vld [vmem:[#allocation2] sm:$0xff]   ;;  %v1445_v5 = vld [vmem:[#allocation5 + $0x18] sm:$0xff]   ;;  %vm1032_vm2 = vcmask 125952   ;;  %s1578_s2 = smov [#allocation8]  }
  0x39   :  { %1351 = vmatpush3.bf16.msra.mxu0 %v1442_v0  ;;  %1429 = vmatpush3.bf16.msra.mxu1 %v1442_v0  ;;  %v1448_v4 = vld [vmem:[#allocation2 + $0x80] sm:$0xff]   ;;  %v1449_v8 = vld [vmem:[#allocation2 + $0x8] sm:$0xff]   ;;  %v1451_v10 = vld [vmem:[#allocation2 + $0x10] sm:$0xff]   ;;  %s1102_s22 = sshll.u32 %s1578_s2, 4  ;;  %s1103_s22 = int_to_ptr.vmem [resolvable:$true] %s1102_s22 }
  0x3a   :  { %1352 = vmatprep.subr.bf16.mxu0 %v1443_v1  ;;  %1425 = vmatprep.subr.bf16.mxu1 %v1443_v1  ;;  %v1446_v6 = vld [vmem:[#allocation5 + $0x20] ss:$0 sps:$4 sm:$0xff]   ;;  %v1450_v9 = vld [vmem:[#allocation2 + $0x88] sm:$0xff]   ;;  %v1452_v11 = vld [vmem:[#allocation2 + $0x90] sm:$0xff]   ;;  %s1545_s23 = scalar_lea.vmem %s1103_s22, 4096  ;;  %p1550_p11 = scmp.lt.s32.totalorder %s1103_s22, %s1103_s22 }
  0x3b   :  { %1360 = vmatprep.mubr.msk.bf16.mxu0 %vm322_vm0, %v1447_v3  ;;  %1392 = vmatprep.mubr.msk.bf16.mxu1 %vm322_vm0, %v1448_v4  ;;  %v421_v7 = vsel %vm419_vm1, %v1446_v6, 0  ;;  %v1453_v12 = vld [vmem:[#allocation2 + $0x18] sm:$0xff]   ;;  %v1455_v14 = vld [vmem:[#allocation2 + $0x20] sm:$0xff]   ;;  %v1457_v16 = vld [vmem:[#allocation2 + $0x28] sm:$0xff]   ;;  %p1546_p10 = scmp.ne.s32.totalorder %s1103_s22, %s1545_s23  ;;  %p1551_p12 = scmp.lt.s32.totalorder %s1545_s23, %s1545_s23 }
  0x3c   :  { %v1454_v13 = vld [vmem:[#allocation2 + $0x98] sm:$0xff]   ;;  %v1456_v15 = vld [vmem:[#allocation2 + $0xa0] sm:$0xff]   ;;  %v1458_v17 = vld [vmem:[#allocation2 + $0xa8] sm:$0xff]  }
  0x3d   :  { %1353 = vmatpush3.bf16.msra.mxu0 %v1443_v1  ;;  %1430 = vmatpush3.bf16.msra.mxu1 %v1443_v1  ;;  %v1459_v18 = vld [vmem:[#allocation2 + $0x30] sm:$0xff]   ;;  %v1461_v20 = vld [vmem:[#allocation2 + $0x38] sm:$0xff]   ;;  %v1463_v22 = vld [vmem:[#allocation2 + $0x40] sm:$0xff]   ;;  %p1552_p13 = por %p1551_p12, %p1550_p11 }
  0x3e   :  { %1354 = vmatprep.subr.bf16.mxu0 %v1444_v2  ;;  %1426 = vmatprep.subr.bf16.mxu1 %v1444_v2  ;;  %v1460_v19 = vld [vmem:[#allocation2 + $0xb0] sm:$0xff]   ;;  %v1462_v21 = vld [vmem:[#allocation2 + $0xb8] sm:$0xff]   ;;  %v1464_v23 = vld [vmem:[#allocation2 + $0xc0] sm:$0xff]  }
  0x3f   :  { %v1465_v24 = vld [vmem:[#allocation2 + $0x48] sm:$0xff]   ;;  %v1467_v26 = vld [vmem:[#allocation2 + $0x50] sm:$0xff]   ;;  %v1469_v28 = vld [vmem:[#allocation2 + $0x58] sm:$0xff]   ;;  %p1553_p0 = pnand %p1552_p13, %p1546_p10 }
  0x40   :  { %v1466_v25 = vld [vmem:[#allocation2 + $0xc8] sm:$0xff]   ;;  %v1468_v27 = vld [vmem:[#allocation2 + $0xd0] sm:$0xff]   ;;  %v1470_v29 = vld [vmem:[#allocation2 + $0xd8] sm:$0xff]  }
  0x41   :  { %1355 = vmatpush3.bf16.msra.mxu0 %v1444_v2  ;;  %1431 = vmatpush3.bf16.msra.mxu1 %v1444_v2  ;;  %v1471_v30 = vld [vmem:[#allocation2 + $0x60] sm:$0xff]   ;;  %v1473_v32 = vld [vmem:[#allocation2 + $0x68] sm:$0xff]   ;;  %v1475_v34 = vld [vmem:[#allocation2 + $0x70] sm:$0xff]  }
  0x42   :  { %1356 = vmatprep.subr.bf16.mxu0 %v1445_v5  ;;  %1427 = vmatprep.subr.bf16.mxu1 %v1445_v5  ;;  %v1472_v31 = vld [vmem:[#allocation2 + $0xe0] sm:$0xff]   ;;  %v1474_v33 = vld [vmem:[#allocation2 + $0xe8] sm:$0xff]   ;;  %v1476_v35 = vld [vmem:[#allocation2 + $0xf0] sm:$0xff]  }
  0x43   :  { %v1477_v36 = vld [vmem:[#allocation2 + $0x78] sm:$0xff]   ;;  %v1680_v38 = vld [vmem:[#allocation7] ss:$0 sm:$0xff] }
  0x44   :  { %v1478_v37 = vld [vmem:[#allocation2 + $0xf8] sm:$0xff]  }
  0x45   :  { %1357 = vmatpush3.bf16.msra.mxu0 %v1445_v5  ;;  %1432 = vmatpush3.bf16.msra.mxu1 %v1445_v5 }
  0x46   :  { %1434 = vmatprep.subr.msk.bf16.mxu0 %vm419_vm1, %v1446_v6  ;;  %1435 = vmatprep.subr.msk.bf16.mxu1 %vm419_vm1, %v1446_v6 }
  0x49   :  { %1359 = vmatpush3.bf16.msra.mxu0 %v421_v7  ;;  %1433 = vmatpush3.bf16.msra.mxu1 %v421_v7 }
  0x4c   :  { %1361 = vmatmul.mubr.msk.bf16.vlgmr.msra.gmra.mrb[0].mxu0 %vm322_vm0, %v1449_v8  ;;  %1393 = vmatmul.mubr.msk.bf16.vlgmr.msra.gmra.mrb[0].mxu1 %vm322_vm0, %v1450_v9 }
  0x4d   :  { %1364 = vmatprep.mubr.msk.bf16.mxu0 %vm322_vm0, %v1451_v10  ;;  %1396 = vmatprep.mubr.msk.bf16.mxu1 %vm322_vm0, %v1452_v11 }
  0x54   :  { %1365 = vmatmul.mubr.msk.bf16.gmra.mrb[4].mxu0 %vm322_vm0, %v1453_v12  ;;  %1397 = vmatmul.mubr.msk.bf16.gmra.mrb[4].mxu1 %vm322_vm0, %v1454_v13 }
  0x55   :  { %1368 = vmatprep.mubr.msk.bf16.mxu0 %vm322_vm0, %v1455_v14  ;;  %1400 = vmatprep.mubr.msk.bf16.mxu1 %vm322_vm0, %v1456_v15 }
  0x5c   :  { %1369 = vmatmul.mubr.msk.bf16.gmra.mrb[8].mxu0 %vm322_vm0, %v1457_v16  ;;  %1401 = vmatmul.mubr.msk.bf16.gmra.mrb[8].mxu1 %vm322_vm0, %v1458_v17 }
  0x5d   :  { %1372 = vmatprep.mubr.msk.bf16.mxu0 %vm322_vm0, %v1459_v18  ;;  %1404 = vmatprep.mubr.msk.bf16.mxu1 %vm322_vm0, %v1460_v19 }
  0x64   :  { %1373 = vmatmul.mubr.msk.bf16.gmra.mrb[12].mxu0 %vm322_vm0, %v1461_v20  ;;  %1405 = vmatmul.mubr.msk.bf16.gmra.mrb[12].mxu1 %vm322_vm0, %v1462_v21 }
  0x65   :  { %1376 = vmatprep.mubr.msk.bf16.mxu0 %vm322_vm0, %v1463_v22  ;;  %1408 = vmatprep.mubr.msk.bf16.mxu1 %vm322_vm0, %v1464_v23 }
  0x6c   :  { %1377 = vmatmul.mubr.msk.bf16.gmra.mrb[16].mxu0 %vm322_vm0, %v1465_v24  ;;  %1409 = vmatmul.mubr.msk.bf16.gmra.mrb[16].mxu1 %vm322_vm0, %v1466_v25 }
  0x6d   :  { %1380 = vmatprep.mubr.msk.bf16.mxu0 %vm322_vm0, %v1467_v26  ;;  %1412 = vmatprep.mubr.msk.bf16.mxu1 %vm322_vm0, %v1468_v27 }
  0x74   :  { %1381 = vmatmul.mubr.msk.bf16.gmra.mrb[20].mxu0 %vm322_vm0, %v1469_v28  ;;  %1413 = vmatmul.mubr.msk.bf16.gmra.mrb[20].mxu1 %vm322_vm0, %v1470_v29 }
  0x75   :  { %1384 = vmatprep.mubr.msk.bf16.mxu0 %vm322_vm0, %v1471_v30  ;;  %1416 = vmatprep.mubr.msk.bf16.mxu1 %vm322_vm0, %v1472_v31 }
  0x7c   :  { %1385 = vmatmul.mubr.msk.bf16.gmra.mrb[24].mxu0 %vm322_vm0, %v1473_v32  ;;  %1417 = vmatmul.mubr.msk.bf16.gmra.mrb[24].mxu1 %vm322_vm0, %v1474_v33 }
  0x7d   :  { %1388 = vmatprep.mubr.msk.bf16.mxu0 %vm322_vm0, %v1475_v34  ;;  %1420 = vmatprep.mubr.msk.bf16.mxu1 %vm322_vm0, %v1476_v35 }
  0x84   :  { %1389 = vmatmul.mubr.msk.bf16.gmra.mrb[28].mxu0 %vm322_vm0, %v1477_v36  ;;  %1421 = vmatmul.mubr.msk.bf16.gmra.mrb[28].mxu1 %vm322_vm0, %v1478_v37 }
 0x11f   :  { %v1362_v39 = vpop.f32.mrb[0].mxu0  ;;  %v1394_v40 = vpop.f32.mrb[0].mxu1 }
 0x120   :  { %v466_v41 = vadd.f32 %v1362_v39, %v1680_v38  ;;  %v594_v42 = vadd.f32 %v1394_v40, %v1680_v38  ;;  %v457_v43 = vpop.f32.mrb[1].mxu0  ;;  %v585_v44 = vpop.f32.mrb[1].mxu1 }
 0x121   :  { %v458_v45 = vadd.f32 %v1680_v38, %v457_v43  ;;  %v586_v46 = vadd.f32 %v1680_v38, %v585_v44  ;;  %v1363_v47 = vpop.f32.mrb[2].mxu0  ;;  %v1395_v48 = vpop.f32.mrb[2].mxu1 }
 0x122   :  { %v714_v49 = vmax.f32 %v466_v41, 0.0  ;;  %v746_v50 = vmax.f32 %v594_v42, 0.0  ;;  %v469_v51 = vadd.f32 %v1363_v47, %v1680_v38  ;;  %v597_v52 = vadd.f32 %v1395_v48, %v1680_v38  ;;  %v460_v53 = vpop.f32.mrb[3].mxu0  ;;  %v588_v54 = vpop.f32.mrb[3].mxu1 }
 0x123   :  { %v712_v55 = vmax.f32 %v458_v45, 0.0  ;;  %v744_v56 = vmax.f32 %v586_v46, 0.0  ;;  %v461_v57 = vadd.f32 %v1680_v38, %v460_v53  ;;  %v589_v58 = vadd.f32 %v1680_v38, %v588_v54 }
 0x124   :  { %v1251_v59 = vpack.c.bf16 %v714_v49, %v714_v49  ;;  %v1283_v60 = vpack.c.bf16 %v746_v50, %v746_v50  ;;  %v715_v61 = vmax.f32 %v469_v51, 0.0  ;;  %v747_v62 = vmax.f32 %v597_v52, 0.0 }
 0x125   :  { %v1249_v63 = vpack.c.bf16 %v712_v55, %v712_v55  ;;  %v1281_v0 = vpack.c.bf16 %v744_v56, %v744_v56  ;;  %v713_v1 = vmax.f32 %v461_v57, 0.0  ;;  %v745_v2 = vmax.f32 %v589_v58, 0.0 }
 0x126   :  { %1035 = vst.msk [vmem:[#allocation8 + $0x8] sm:$0xf] %vm1032_vm2, %v1251_v59  ;;  %1067 = vst.msk [vmem:[#allocation8 + $0x88] sm:$0xf] %vm1032_vm2, %v1283_v60  ;;  %v1252_v3 = vpack.c.bf16 %v715_v61, %v715_v61  ;;  %v1284_v4 = vpack.c.bf16 %v747_v62, %v747_v62 }
 0x127   :  { %1033 = vst.msk [vmem:[#allocation8] sm:$0xf] %vm1032_vm2, %v1249_v63  ;;  %1065 = vst.msk [vmem:[#allocation8 + $0x80] sm:$0xf] %vm1032_vm2, %v1281_v0  ;;  %v1250_v5 = vpack.c.bf16 %v713_v1, %v713_v1  ;;  %v1282_v6 = vpack.c.bf16 %v745_v2, %v745_v2  ;;  %v1366_v7 = vpop.f32.mrb[4].mxu0  ;;  %v1398_v8 = vpop.f32.mrb[4].mxu1 }
 0x128   :  { %1036 = vst.msk [vmem:[#allocation8 + $0xc] sm:$0xf] %vm1032_vm2, %v1252_v3  ;;  %1068 = vst.msk [vmem:[#allocation8 + $0x8c] sm:$0xf] %vm1032_vm2, %v1284_v4  ;;  %v482_v9 = vadd.f32 %v1366_v7, %v1680_v38  ;;  %v610_v10 = vadd.f32 %v1398_v8, %v1680_v38  ;;  %v473_v11 = vpop.f32.mrb[5].mxu0  ;;  %v601_v12 = vpop.f32.mrb[5].mxu1 }
 0x129   :  { %1034 = vst.msk [vmem:[#allocation8 + $0x4] sm:$0xf] %vm1032_vm2, %v1250_v5  ;;  %1066 = vst.msk [vmem:[#allocation8 + $0x84] sm:$0xf] %vm1032_vm2, %v1282_v6  ;;  %v474_v13 = vadd.f32 %v1680_v38, %v473_v11  ;;  %v602_v14 = vadd.f32 %v1680_v38, %v601_v12  ;;  %v1367_v15 = vpop.f32.mrb[6].mxu0  ;;  %v1399_v16 = vpop.f32.mrb[6].mxu1 }
 0x12a   :  { %v718_v17 = vmax.f32 %v482_v9, 0.0  ;;  %v750_v18 = vmax.f32 %v610_v10, 0.0  ;;  %v485_v19 = vadd.f32 %v1367_v15, %v1680_v38  ;;  %v613_v20 = vadd.f32 %v1399_v16, %v1680_v38  ;;  %v476_v21 = vpop.f32.mrb[7].mxu0  ;;  %v604_v22 = vpop.f32.mrb[7].mxu1 }
 0x12b   :  { %v716_v23 = vmax.f32 %v474_v13, 0.0  ;;  %v748_v24 = vmax.f32 %v602_v14, 0.0  ;;  %v477_v25 = vadd.f32 %v1680_v38, %v476_v21  ;;  %v605_v26 = vadd.f32 %v1680_v38, %v604_v22 }
 0x12c   :  { %v1255_v27 = vpack.c.bf16 %v718_v17, %v718_v17  ;;  %v1287_v28 = vpack.c.bf16 %v750_v18, %v750_v18  ;;  %v719_v29 = vmax.f32 %v485_v19, 0.0  ;;  %v751_v30 = vmax.f32 %v613_v20, 0.0 }
 0x12d   :  { %v1253_v31 = vpack.c.bf16 %v716_v23, %v716_v23  ;;  %v1285_v32 = vpack.c.bf16 %v748_v24, %v748_v24  ;;  %v717_v33 = vmax.f32 %v477_v25, 0.0  ;;  %v749_v34 = vmax.f32 %v605_v26, 0.0 }
 0x12e   :  { %1039 = vst.msk [vmem:[#allocation8 + $0x18] sm:$0xf] %vm1032_vm2, %v1255_v27  ;;  %1071 = vst.msk [vmem:[#allocation8 + $0x98] sm:$0xf] %vm1032_vm2, %v1287_v28  ;;  %v1256_v35 = vpack.c.bf16 %v719_v29, %v719_v29  ;;  %v1288_v36 = vpack.c.bf16 %v751_v30, %v751_v30 }
 0x12f   :  { %1037 = vst.msk [vmem:[#allocation8 + $0x10] sm:$0xf] %vm1032_vm2, %v1253_v31  ;;  %1069 = vst.msk [vmem:[#allocation8 + $0x90] sm:$0xf] %vm1032_vm2, %v1285_v32  ;;  %v1254_v37 = vpack.c.bf16 %v717_v33, %v717_v33  ;;  %v1286_v39 = vpack.c.bf16 %v749_v34, %v749_v34  ;;  %v1370_v40 = vpop.f32.mrb[8].mxu0  ;;  %v1402_v41 = vpop.f32.mrb[8].mxu1 }
 0x130   :  { %1040 = vst.msk [vmem:[#allocation8 + $0x1c] sm:$0xf] %vm1032_vm2, %v1256_v35  ;;  %1072 = vst.msk [vmem:[#allocation8 + $0x9c] sm:$0xf] %vm1032_vm2, %v1288_v36  ;;  %v498_v42 = vadd.f32 %v1370_v40, %v1680_v38  ;;  %v626_v43 = vadd.f32 %v1402_v41, %v1680_v38  ;;  %v489_v44 = vpop.f32.mrb[9].mxu0  ;;  %v617_v45 = vpop.f32.mrb[9].mxu1 }
 0x131   :  { %1038 = vst.msk [vmem:[#allocation8 + $0x14] sm:$0xf] %vm1032_vm2, %v1254_v37  ;;  %1070 = vst.msk [vmem:[#allocation8 + $0x94] sm:$0xf] %vm1032_vm2, %v1286_v39  ;;  %v490_v46 = vadd.f32 %v1680_v38, %v489_v44  ;;  %v618_v47 = vadd.f32 %v1680_v38, %v617_v45  ;;  %v1371_v48 = vpop.f32.mrb[10].mxu0  ;;  %v1403_v49 = vpop.f32.mrb[10].mxu1 }
 0x132   :  { %v722_v50 = vmax.f32 %v498_v42, 0.0  ;;  %v754_v51 = vmax.f32 %v626_v43, 0.0  ;;  %v501_v52 = vadd.f32 %v1371_v48, %v1680_v38  ;;  %v629_v53 = vadd.f32 %v1403_v49, %v1680_v38  ;;  %v492_v54 = vpop.f32.mrb[11].mxu0  ;;  %v620_v55 = vpop.f32.mrb[11].mxu1 }
 0x133   :  { %v720_v56 = vmax.f32 %v490_v46, 0.0  ;;  %v752_v57 = vmax.f32 %v618_v47, 0.0  ;;  %v493_v58 = vadd.f32 %v1680_v38, %v492_v54  ;;  %v621_v59 = vadd.f32 %v1680_v38, %v620_v55 }
 0x134   :  { %v1259_v60 = vpack.c.bf16 %v722_v50, %v722_v50  ;;  %v1291_v61 = vpack.c.bf16 %v754_v51, %v754_v51  ;;  %v723_v62 = vmax.f32 %v501_v52, 0.0  ;;  %v755_v63 = vmax.f32 %v629_v53, 0.0 }
 0x135   :  { %v1257_v0 = vpack.c.bf16 %v720_v56, %v720_v56  ;;  %v1289_v1 = vpack.c.bf16 %v752_v57, %v752_v57  ;;  %v721_v2 = vmax.f32 %v493_v58, 0.0  ;;  %v753_v3 = vmax.f32 %v621_v59, 0.0 }
 0x136   :  { %1043 = vst.msk [vmem:[#allocation8 + $0x28] sm:$0xf] %vm1032_vm2, %v1259_v60  ;;  %1075 = vst.msk [vmem:[#allocation8 + $0xa8] sm:$0xf] %vm1032_vm2, %v1291_v61  ;;  %v1260_v4 = vpack.c.bf16 %v723_v62, %v723_v62  ;;  %v1292_v5 = vpack.c.bf16 %v755_v63, %v755_v63 }
 0x137   :  { %1041 = vst.msk [vmem:[#allocation8 + $0x20] sm:$0xf] %vm1032_vm2, %v1257_v0  ;;  %1073 = vst.msk [vmem:[#allocation8 + $0xa0] sm:$0xf] %vm1032_vm2, %v1289_v1  ;;  %v1258_v6 = vpack.c.bf16 %v721_v2, %v721_v2  ;;  %v1290_v7 = vpack.c.bf16 %v753_v3, %v753_v3  ;;  %v1374_v8 = vpop.f32.mrb[12].mxu0  ;;  %v1406_v9 = vpop.f32.mrb[12].mxu1 }
 0x138   :  { %1044 = vst.msk [vmem:[#allocation8 + $0x2c] sm:$0xf] %vm1032_vm2, %v1260_v4  ;;  %1076 = vst.msk [vmem:[#allocation8 + $0xac] sm:$0xf] %vm1032_vm2, %v1292_v5  ;;  %v514_v10 = vadd.f32 %v1374_v8, %v1680_v38  ;;  %v642_v11 = vadd.f32 %v1406_v9, %v1680_v38  ;;  %v505_v12 = vpop.f32.mrb[13].mxu0  ;;  %v633_v13 = vpop.f32.mrb[13].mxu1 }
 0x139   :  { %1042 = vst.msk [vmem:[#allocation8 + $0x24] sm:$0xf] %vm1032_vm2, %v1258_v6  ;;  %1074 = vst.msk [vmem:[#allocation8 + $0xa4] sm:$0xf] %vm1032_vm2, %v1290_v7  ;;  %v506_v14 = vadd.f32 %v1680_v38, %v505_v12  ;;  %v634_v15 = vadd.f32 %v1680_v38, %v633_v13  ;;  %v1375_v16 = vpop.f32.mrb[14].mxu0  ;;  %v1407_v17 = vpop.f32.mrb[14].mxu1 }
 0x13a   :  { %v726_v18 = vmax.f32 %v514_v10, 0.0  ;;  %v758_v19 = vmax.f32 %v642_v11, 0.0  ;;  %v517_v20 = vadd.f32 %v1375_v16, %v1680_v38  ;;  %v645_v21 = vadd.f32 %v1407_v17, %v1680_v38  ;;  %v508_v22 = vpop.f32.mrb[15].mxu0  ;;  %v636_v23 = vpop.f32.mrb[15].mxu1 }
 0x13b   :  { %v724_v24 = vmax.f32 %v506_v14, 0.0  ;;  %v756_v25 = vmax.f32 %v634_v15, 0.0  ;;  %v509_v26 = vadd.f32 %v1680_v38, %v508_v22  ;;  %v637_v27 = vadd.f32 %v1680_v38, %v636_v23 }
 0x13c   :  { %v1263_v28 = vpack.c.bf16 %v726_v18, %v726_v18  ;;  %v1295_v29 = vpack.c.bf16 %v758_v19, %v758_v19  ;;  %v727_v30 = vmax.f32 %v517_v20, 0.0  ;;  %v759_v31 = vmax.f32 %v645_v21, 0.0 }
 0x13d   :  { %v1261_v32 = vpack.c.bf16 %v724_v24, %v724_v24  ;;  %v1293_v33 = vpack.c.bf16 %v756_v25, %v756_v25  ;;  %v725_v34 = vmax.f32 %v509_v26, 0.0  ;;  %v757_v35 = vmax.f32 %v637_v27, 0.0 }
 0x13e   :  { %1047 = vst.msk [vmem:[#allocation8 + $0x38] sm:$0xf] %vm1032_vm2, %v1263_v28  ;;  %1079 = vst.msk [vmem:[#allocation8 + $0xb8] sm:$0xf] %vm1032_vm2, %v1295_v29  ;;  %v1264_v36 = vpack.c.bf16 %v727_v30, %v727_v30  ;;  %v1296_v37 = vpack.c.bf16 %v759_v31, %v759_v31 }
 0x13f   :  { %1045 = vst.msk [vmem:[#allocation8 + $0x30] sm:$0xf] %vm1032_vm2, %v1261_v32  ;;  %1077 = vst.msk [vmem:[#allocation8 + $0xb0] sm:$0xf] %vm1032_vm2, %v1293_v33  ;;  %v1262_v39 = vpack.c.bf16 %v725_v34, %v725_v34  ;;  %v1294_v40 = vpack.c.bf16 %v757_v35, %v757_v35  ;;  %v1378_v41 = vpop.f32.mrb[16].mxu0  ;;  %v1410_v42 = vpop.f32.mrb[16].mxu1 }
 0x140   :  { %1048 = vst.msk [vmem:[#allocation8 + $0x3c] sm:$0xf] %vm1032_vm2, %v1264_v36  ;;  %1080 = vst.msk [vmem:[#allocation8 + $0xbc] sm:$0xf] %vm1032_vm2, %v1296_v37  ;;  %v530_v43 = vadd.f32 %v1378_v41, %v1680_v38  ;;  %v658_v44 = vadd.f32 %v1410_v42, %v1680_v38  ;;  %v521_v45 = vpop.f32.mrb[17].mxu0  ;;  %v649_v46 = vpop.f32.mrb[17].mxu1 }
 0x141   :  { %1046 = vst.msk [vmem:[#allocation8 + $0x34] sm:$0xf] %vm1032_vm2, %v1262_v39  ;;  %1078 = vst.msk [vmem:[#allocation8 + $0xb4] sm:$0xf] %vm1032_vm2, %v1294_v40  ;;  %v522_v47 = vadd.f32 %v1680_v38, %v521_v45  ;;  %v650_v48 = vadd.f32 %v1680_v38, %v649_v46  ;;  %v1379_v49 = vpop.f32.mrb[18].mxu0  ;;  %v1411_v50 = vpop.f32.mrb[18].mxu1 }
 0x142   :  { %v730_v51 = vmax.f32 %v530_v43, 0.0  ;;  %v762_v52 = vmax.f32 %v658_v44, 0.0  ;;  %v533_v53 = vadd.f32 %v1379_v49, %v1680_v38  ;;  %v661_v54 = vadd.f32 %v1411_v50, %v1680_v38  ;;  %v524_v55 = vpop.f32.mrb[19].mxu0  ;;  %v652_v56 = vpop.f32.mrb[19].mxu1 }
 0x143   :  { %v728_v57 = vmax.f32 %v522_v47, 0.0  ;;  %v760_v58 = vmax.f32 %v650_v48, 0.0  ;;  %v525_v59 = vadd.f32 %v1680_v38, %v524_v55  ;;  %v653_v60 = vadd.f32 %v1680_v38, %v652_v56 }
 0x144   :  { %v1267_v61 = vpack.c.bf16 %v730_v51, %v730_v51  ;;  %v1299_v62 = vpack.c.bf16 %v762_v52, %v762_v52  ;;  %v731_v63 = vmax.f32 %v533_v53, 0.0  ;;  %v763_v0 = vmax.f32 %v661_v54, 0.0 }
 0x145   :  { %v1265_v1 = vpack.c.bf16 %v728_v57, %v728_v57  ;;  %v1297_v2 = vpack.c.bf16 %v760_v58, %v760_v58  ;;  %v729_v3 = vmax.f32 %v525_v59, 0.0  ;;  %v761_v4 = vmax.f32 %v653_v60, 0.0 }
 0x146   :  { %1051 = vst.msk [vmem:[#allocation8 + $0x48] sm:$0xf] %vm1032_vm2, %v1267_v61  ;;  %1083 = vst.msk [vmem:[#allocation8 + $0xc8] sm:$0xf] %vm1032_vm2, %v1299_v62  ;;  %v1268_v5 = vpack.c.bf16 %v731_v63, %v731_v63  ;;  %v1300_v6 = vpack.c.bf16 %v763_v0, %v763_v0 }
 0x147   :  { %1049 = vst.msk [vmem:[#allocation8 + $0x40] sm:$0xf] %vm1032_vm2, %v1265_v1  ;;  %1081 = vst.msk [vmem:[#allocation8 + $0xc0] sm:$0xf] %vm1032_vm2, %v1297_v2  ;;  %v1266_v7 = vpack.c.bf16 %v729_v3, %v729_v3  ;;  %v1298_v8 = vpack.c.bf16 %v761_v4, %v761_v4  ;;  %v1382_v9 = vpop.f32.mrb[20].mxu0  ;;  %v1414_v10 = vpop.f32.mrb[20].mxu1 }
 0x148   :  { %1052 = vst.msk [vmem:[#allocation8 + $0x4c] sm:$0xf] %vm1032_vm2, %v1268_v5  ;;  %1084 = vst.msk [vmem:[#allocation8 + $0xcc] sm:$0xf] %vm1032_vm2, %v1300_v6  ;;  %v546_v11 = vadd.f32 %v1382_v9, %v1680_v38  ;;  %v674_v12 = vadd.f32 %v1414_v10, %v1680_v38  ;;  %v537_v13 = vpop.f32.mrb[21].mxu0  ;;  %v665_v14 = vpop.f32.mrb[21].mxu1 }
 0x149   :  { %1050 = vst.msk [vmem:[#allocation8 + $0x44] sm:$0xf] %vm1032_vm2, %v1266_v7  ;;  %1082 = vst.msk [vmem:[#allocation8 + $0xc4] sm:$0xf] %vm1032_vm2, %v1298_v8  ;;  %v538_v15 = vadd.f32 %v1680_v38, %v537_v13  ;;  %v666_v16 = vadd.f32 %v1680_v38, %v665_v14  ;;  %v1383_v17 = vpop.f32.mrb[22].mxu0  ;;  %v1415_v18 = vpop.f32.mrb[22].mxu1 }
 0x14a   :  { %v734_v19 = vmax.f32 %v546_v11, 0.0  ;;  %v766_v20 = vmax.f32 %v674_v12, 0.0  ;;  %v549_v21 = vadd.f32 %v1383_v17, %v1680_v38  ;;  %v677_v22 = vadd.f32 %v1415_v18, %v1680_v38  ;;  %v540_v23 = vpop.f32.mrb[23].mxu0  ;;  %v668_v24 = vpop.f32.mrb[23].mxu1 }
 0x14b   :  { %v732_v25 = vmax.f32 %v538_v15, 0.0  ;;  %v764_v26 = vmax.f32 %v666_v16, 0.0  ;;  %v541_v27 = vadd.f32 %v1680_v38, %v540_v23  ;;  %v669_v28 = vadd.f32 %v1680_v38, %v668_v24 }
 0x14c   :  { %v1271_v29 = vpack.c.bf16 %v734_v19, %v734_v19  ;;  %v1303_v30 = vpack.c.bf16 %v766_v20, %v766_v20  ;;  %v735_v31 = vmax.f32 %v549_v21, 0.0  ;;  %v767_v32 = vmax.f32 %v677_v22, 0.0 }
 0x14d   :  { %v1269_v33 = vpack.c.bf16 %v732_v25, %v732_v25  ;;  %v1301_v34 = vpack.c.bf16 %v764_v26, %v764_v26  ;;  %v733_v35 = vmax.f32 %v541_v27, 0.0  ;;  %v765_v36 = vmax.f32 %v669_v28, 0.0 }
 0x14e   :  { %1055 = vst.msk [vmem:[#allocation8 + $0x58] sm:$0xf] %vm1032_vm2, %v1271_v29  ;;  %1087 = vst.msk [vmem:[#allocation8 + $0xd8] sm:$0xf] %vm1032_vm2, %v1303_v30  ;;  %v1272_v37 = vpack.c.bf16 %v735_v31, %v735_v31  ;;  %v1304_v39 = vpack.c.bf16 %v767_v32, %v767_v32 }
 0x14f   :  { %1053 = vst.msk [vmem:[#allocation8 + $0x50] sm:$0xf] %vm1032_vm2, %v1269_v33  ;;  %1085 = vst.msk [vmem:[#allocation8 + $0xd0] sm:$0xf] %vm1032_vm2, %v1301_v34  ;;  %v1270_v40 = vpack.c.bf16 %v733_v35, %v733_v35  ;;  %v1302_v41 = vpack.c.bf16 %v765_v36, %v765_v36  ;;  %v1386_v42 = vpop.f32.mrb[24].mxu0  ;;  %v1418_v43 = vpop.f32.mrb[24].mxu1 }
 0x150   :  { %1056 = vst.msk [vmem:[#allocation8 + $0x5c] sm:$0xf] %vm1032_vm2, %v1272_v37  ;;  %1088 = vst.msk [vmem:[#allocation8 + $0xdc] sm:$0xf] %vm1032_vm2, %v1304_v39  ;;  %v562_v44 = vadd.f32 %v1386_v42, %v1680_v38  ;;  %v690_v45 = vadd.f32 %v1418_v43, %v1680_v38  ;;  %v553_v46 = vpop.f32.mrb[25].mxu0  ;;  %v681_v47 = vpop.f32.mrb[25].mxu1 }
 0x151   :  { %1054 = vst.msk [vmem:[#allocation8 + $0x54] sm:$0xf] %vm1032_vm2, %v1270_v40  ;;  %1086 = vst.msk [vmem:[#allocation8 + $0xd4] sm:$0xf] %vm1032_vm2, %v1302_v41  ;;  %v554_v48 = vadd.f32 %v1680_v38, %v553_v46  ;;  %v682_v49 = vadd.f32 %v1680_v38, %v681_v47  ;;  %v1387_v50 = vpop.f32.mrb[26].mxu0  ;;  %v1419_v51 = vpop.f32.mrb[26].mxu1 }
 0x152   :  { %v738_v52 = vmax.f32 %v562_v44, 0.0  ;;  %v770_v53 = vmax.f32 %v690_v45, 0.0  ;;  %v565_v54 = vadd.f32 %v1387_v50, %v1680_v38  ;;  %v693_v55 = vadd.f32 %v1419_v51, %v1680_v38  ;;  %v556_v56 = vpop.f32.mrb[27].mxu0  ;;  %v684_v57 = vpop.f32.mrb[27].mxu1 }
 0x153   :  { %v736_v58 = vmax.f32 %v554_v48, 0.0  ;;  %v768_v59 = vmax.f32 %v682_v49, 0.0  ;;  %v557_v60 = vadd.f32 %v1680_v38, %v556_v56  ;;  %v685_v61 = vadd.f32 %v1680_v38, %v684_v57 }
 0x154   :  { %v1275_v62 = vpack.c.bf16 %v738_v52, %v738_v52  ;;  %v1307_v63 = vpack.c.bf16 %v770_v53, %v770_v53  ;;  %v739_v0 = vmax.f32 %v565_v54, 0.0  ;;  %v771_v1 = vmax.f32 %v693_v55, 0.0 }
 0x155   :  { %v1273_v2 = vpack.c.bf16 %v736_v58, %v736_v58  ;;  %v1305_v3 = vpack.c.bf16 %v768_v59, %v768_v59  ;;  %v737_v4 = vmax.f32 %v557_v60, 0.0  ;;  %v769_v5 = vmax.f32 %v685_v61, 0.0 }
 0x156   :  { %1059 = vst.msk [vmem:[#allocation8 + $0x68] sm:$0xf] %vm1032_vm2, %v1275_v62  ;;  %1091 = vst.msk [vmem:[#allocation8 + $0xe8] sm:$0xf] %vm1032_vm2, %v1307_v63  ;;  %v1276_v6 = vpack.c.bf16 %v739_v0, %v739_v0  ;;  %v1308_v7 = vpack.c.bf16 %v771_v1, %v771_v1 }
 0x157   :  { %1057 = vst.msk [vmem:[#allocation8 + $0x60] sm:$0xf] %vm1032_vm2, %v1273_v2  ;;  %1089 = vst.msk [vmem:[#allocation8 + $0xe0] sm:$0xf] %vm1032_vm2, %v1305_v3  ;;  %v1274_v8 = vpack.c.bf16 %v737_v4, %v737_v4  ;;  %v1306_v9 = vpack.c.bf16 %v769_v5, %v769_v5  ;;  %v1390_v10 = vpop.f32.mrb[28].mxu0  ;;  %v1422_v11 = vpop.f32.mrb[28].mxu1 }
 0x158   :  { %1060 = vst.msk [vmem:[#allocation8 + $0x6c] sm:$0xf] %vm1032_vm2, %v1276_v6  ;;  %1092 = vst.msk [vmem:[#allocation8 + $0xec] sm:$0xf] %vm1032_vm2, %v1308_v7  ;;  %v578_v12 = vadd.f32 %v1390_v10, %v1680_v38  ;;  %v706_v13 = vadd.f32 %v1422_v11, %v1680_v38  ;;  %v569_v14 = vpop.f32.mrb[29].mxu0  ;;  %v697_v15 = vpop.f32.mrb[29].mxu1 }
 0x159   :  { %1058 = vst.msk [vmem:[#allocation8 + $0x64] sm:$0xf] %vm1032_vm2, %v1274_v8  ;;  %1090 = vst.msk [vmem:[#allocation8 + $0xe4] sm:$0xf] %vm1032_vm2, %v1306_v9  ;;  %v570_v16 = vadd.f32 %v1680_v38, %v569_v14  ;;  %v698_v17 = vadd.f32 %v1680_v38, %v697_v15  ;;  %v1391_v18 = vpop.f32.mrb[30].mxu0  ;;  %v1423_v19 = vpop.f32.mrb[30].mxu1 }
 0x15a   :  { %v742_v20 = vmax.f32 %v578_v12, 0.0  ;;  %v774_v21 = vmax.f32 %v706_v13, 0.0  ;;  %v581_v22 = vadd.f32 %v1391_v18, %v1680_v38  ;;  %v709_v23 = vadd.f32 %v1423_v19, %v1680_v38  ;;  %v572_v24 = vpop.f32.mrb[31].mxu0  ;;  %v700_v25 = vpop.f32.mrb[31].mxu1 }
 0x15b   :  { %v740_v26 = vmax.f32 %v570_v16, 0.0  ;;  %v772_v27 = vmax.f32 %v698_v17, 0.0  ;;  %v573_v28 = vadd.f32 %v1680_v38, %v572_v24  ;;  %v701_v29 = vadd.f32 %v1680_v38, %v700_v25 }
 0x15c   :  { %v1279_v30 = vpack.c.bf16 %v742_v20, %v742_v20  ;;  %v1311_v31 = vpack.c.bf16 %v774_v21, %v774_v21  ;;  %v743_v32 = vmax.f32 %v581_v22, 0.0  ;;  %v775_v33 = vmax.f32 %v709_v23, 0.0 }
 0x15d   :  { %v1277_v34 = vpack.c.bf16 %v740_v26, %v740_v26  ;;  %v1309_v35 = vpack.c.bf16 %v772_v27, %v772_v27  ;;  %v741_v36 = vmax.f32 %v573_v28, 0.0  ;;  %v773_v37 = vmax.f32 %v701_v29, 0.0 }
 0x15e   :  { %1063 = vst.msk [vmem:[#allocation8 + $0x78] sm:$0xf] %vm1032_vm2, %v1279_v30  ;;  %1095 = vst.msk [vmem:[#allocation8 + $0xf8] sm:$0xf] %vm1032_vm2, %v1311_v31  ;;  %v1280_v39 = vpack.c.bf16 %v743_v32, %v743_v32  ;;  %v1312_v40 = vpack.c.bf16 %v775_v33, %v775_v33 }
 0x15f   :  { %1061 = vst.msk [vmem:[#allocation8 + $0x70] sm:$0xf] %vm1032_vm2, %v1277_v34  ;;  %1093 = vst.msk [vmem:[#allocation8 + $0xf0] sm:$0xf] %vm1032_vm2, %v1309_v35  ;;  %v1278_v38 = vpack.c.bf16 %v741_v36, %v741_v36  ;;  %v1310_v41 = vpack.c.bf16 %v773_v37, %v773_v37 }
 0x160   :  { %1064 = vst.msk [vmem:[#allocation8 + $0x7c] sm:$0xf] %vm1032_vm2, %v1280_v39  ;;  %1096 = vst.msk [vmem:[#allocation8 + $0xfc] sm:$0xf] %vm1032_vm2, %v1312_v40 }
 0x161   :  { %1062 = vst.msk [vmem:[#allocation8 + $0x74] sm:$0xf] %vm1032_vm2, %v1278_v38  ;;  %1094 = vst.msk [vmem:[#allocation8 + $0xf4] sm:$0xf] %vm1032_vm2, %v1310_v41 }
 0x162   :  { %1556 = shalt.err (!%p1553_p0)
}
 0x163   :  { %s1557_s28 = scalar_lea.hbm %s1828_s3, 4096 }
 0x164   :  { %p1558_p1 = scmp.ne.s32.totalorder %s1828_s3, %s1557_s28  ;;  %p1561_p2 = scmp.lt.u32.totalorder %s1557_s28, %s1828_s3 }
 0x166   :  { %p1563_p3 = pnand %p1561_p2, %p1558_p1 }
 0x168   :  { %1566 = shalt.err (!%p1563_p3)
}
 0x169   :  { %1108 = dma.vmem_to_hbm [thread:$0]  %s1103_s22, 4096, %s1828_s3, [#allocation4], %s1575_s24, %s1575_s24, %s1576_s25  }
 0x16a   :  { %1571 = dma.done.wait [#allocation4], 4096  }
 0x16b   :  { %1572 = vsyncadd [#allocation4], 4294963200 }
 0x16c   :  { %1112 = vsyncpa [#allocation3], 1 }
 0x16d   :  { %1113 = vsyncpa [#allocation6], 1 }
 0x16e   :  { %1114 = vsyncpa [#allocation4], 1 }

// kernel: vggnet_modified_forward.19
= control target key start
LH: loop header
LB: loop body
LE: loop exit
PB: predicated region body
PF: predicated region fallthrough
CT: control target
= control target key end

     0   :  { %8 = vsyncpa [#allocation3], 0  ;;  %s1980_s0 = inlined_call_operand.hbm [shape: bf16[512,144], index: 0, kind: input, shape index: {}]   ;;  %s1981_s1 = inlined_call_operand.hbm [shape: bf16[144,16], index: 1, kind: input, shape index: {}]   ;;  %s1982_s2 = inlined_call_operand.hbm [shape: f32[1,16], index: 2, kind: input, shape index: {}]   ;;  %s1983_s3 = inlined_call_operand.hbm [shape: bf16[512,16], index: 3, kind: output, shape index: {}]  }
   0x1   :  { %9 = vsyncpa [#allocation6], 0 }
   0x2   :  { %10 = vsyncpa [#allocation4], 0  ;;  %s1735_s12 = smov [#allocation5]   ;;  %s1641_s16 = scalar_lea.hbm %s1981_s1, 1152 }
   0x3   :  { %s28_s13 = sshll.u32 %s1735_s12, 4  ;;  %p1642_p0 = scmp.ne.s32.totalorder %s1981_s1, %s1641_s16  ;;  %s29_s13 = int_to_ptr.vmem [resolvable:$true] %s28_s13 }
   0x4   :  { %p1645_p1 = scmp.lt.u32.totalorder %s1641_s16, %s1981_s1 }
   0x6   :  { %p1647_p2 = pnand %p1645_p1, %p1642_p0 }
   0x8   :  { %1650 = shalt.err (!%p1647_p2)
}
   0x9   :  { %s1651_s21 = scalar_lea.vmem %s29_s13, 1152  ;;  %p1656_p4 = scmp.lt.s32.totalorder %s29_s13, %s29_s13 }
   0xa   :  { %p1652_p3 = scmp.ne.s32.totalorder %s29_s13, %s1651_s21  ;;  %p1657_p5 = scmp.lt.s32.totalorder %s1651_s21, %s1651_s21 }
   0xc   :  { %p1658_p6 = por %p1657_p5, %p1656_p4 }
   0xe   :  { %p1659_p7 = pnand %p1658_p6, %p1652_p3 }
  0x10   :  { %1662 = shalt.err (!%p1659_p7)
}
  0x11   :  { %s1736_s22 = smov 64   ;;  %s1737_s23 = smov 4  }
  0x12   :  { %34 = dma.hbm_to_vmem [thread:$0]  %s1981_s1, 1152, %s29_s13, [#allocation6], %s1736_s22, %s1736_s22, %s1737_s23  }
  0x13   :  { %s1738_s26 = smov [#allocation2]   ;;  %s1663_s30 = scalar_lea.hbm %s1980_s0, 8192 }
  0x14   :  { %s16_s27 = sshll.u32 %s1738_s26, 4  ;;  %p1664_p8 = scmp.ne.s32.totalorder %s1980_s0, %s1663_s30  ;;  %s17_s27 = int_to_ptr.vmem [resolvable:$true] %s16_s27 }
  0x15   :  { %p1667_p9 = scmp.lt.u32.totalorder %s1663_s30, %s1980_s0 }
  0x17   :  { %p1669_p10 = pnand %p1667_p9, %p1664_p8 }
  0x19   :  { %1672 = shalt.err (!%p1669_p10)
}
  0x1a   :  { %s1673_s8 = scalar_lea.vmem %s17_s27, 8192  ;;  %p1678_p12 = scmp.lt.s32.totalorder %s17_s27, %s17_s27 }
  0x1b   :  { %p1674_p11 = scmp.ne.s32.totalorder %s17_s27, %s1673_s8  ;;  %p1679_p13 = scmp.lt.s32.totalorder %s1673_s8, %s1673_s8 }
  0x1d   :  { %p1680_p0 = por %p1679_p13, %p1678_p12 }
  0x1f   :  { %p1681_p1 = pnand %p1680_p0, %p1674_p11 }
  0x21   :  { %1684 = shalt.err (!%p1681_p1)
}
  0x22   :  { %s1739_s1 = smov 128   ;;  %s1740_s9 = smov 8  }
  0x23   :  { %22 = dma.hbm_to_vmem [thread:$0]  %s1980_s0, 8192, %s17_s27, [#allocation3], %s1739_s1, %s1739_s1, %s1740_s9  }
  0x24   :  { %s1741_s12 = smov [#allocation7]   ;;  %s1685_s16 = scalar_lea.hbm %s1982_s2, 16 }
  0x25   :  { %s41_s13 = sshll.u32 %s1741_s12, 4  ;;  %p1686_p2 = scmp.ne.s32.totalorder %s1982_s2, %s1685_s16  ;;  %s42_s13 = int_to_ptr.vmem [resolvable:$true] %s41_s13 }
  0x26   :  { %p1689_p3 = scmp.lt.u32.totalorder %s1685_s16, %s1982_s2 }
  0x28   :  { %p1691_p4 = pnand %p1689_p3, %p1686_p2 }
  0x2a   :  { %1694 = shalt.err (!%p1691_p4)
}
  0x2b   :  { %s1695_s21 = scalar_lea.vmem %s42_s13, 16  ;;  %s1699_s0 = scalar_lea.vmem %s42_s13, 32 }
  0x2c   :  { %p1696_p5 = scmp.ne.s32.totalorder %s42_s13, %s1695_s21  ;;  %p1700_p6 = scmp.lt.s32.totalorder %s42_s13, %s42_s13 }
  0x2d   :  { %p1701_p7 = scmp.lt.s32.totalorder %s1699_s0, %s1695_s21 }
  0x2f   :  { %p1702_p8 = por %p1701_p7, %p1700_p6 }
  0x31   :  { %p1703_p9 = pnand %p1702_p8, %p1696_p5 }
  0x33   :  { %1706 = shalt.err (!%p1703_p9)
}
  0x34   :  { %44 = dma.hbm_to_vmem [thread:$0]  %s1982_s2, 16, %s42_s13, [#allocation6]  }
  0x35   :  { %1729 = dma.done.wait [#allocation3], 8192  }
  0x36   :  { %1730 = vsyncadd [#allocation3], 4294959104 }
  0x37   :  { %1731 = dma.done.wait [#allocation6], 1168  }
  0x38   :  { %1732 = vsyncadd [#allocation6], 4294966128  ;;  %v1742_v0 = vmov 0   ;;  %v1536_v1 = vld [vmem:[#allocation5] sm:$0xff]   ;;  %v1537_v2 = vld [vmem:[#allocation5 + $0x8] sm:$0xff]   ;;  %vm486_vm0 = vcmask 130048  }
  0x39   :  { %583 = vmatprep.subr.bf16.mxu0 %v1742_v0  ;;  %1509 = vmatprep.subr.bf16.mxu1 %v1742_v0  ;;  %v1538_v3 = vld [vmem:[#allocation5 + $0x10] sm:$0xff]   ;;  %v1539_v4 = vld [vmem:[#allocation5 + $0x18] sm:$0xff]   ;;  %v1547_v5 = vld [vmem:[#allocation2 + $0x4] ss:$8 sps:$4 sm:$0xff]   ;;  %vm1192_vm1 = vcmask 125952   ;;  %s1743_s2 = smov [#allocation8]  }
  0x3a   :  { %584 = vmatpush1.bf16.msra.mxu0 %v1536_v1  ;;  %1518 = vmatpush1.bf16.msra.mxu1 %v1536_v1  ;;  %v1550_v6 = vld [vmem:[#allocation2 + $0x104] ss:$8 sps:$4 sm:$0xff]   ;;  %v1542_v9 = vld [vmem:[#allocation5 + $0x30] sm:$0xff]   ;;  %v1543_v10 = vld [vmem:[#allocation5 + $0x38] sm:$0xff]   ;;  %s1262_s26 = sshll.u32 %s1743_s2, 4  ;;  %s1263_s26 = int_to_ptr.vmem [resolvable:$true] %s1262_s26 }
  0x3b   :  { %585 = vmatprep.subr.bf16.mxu0 %v1742_v0  ;;  %1510 = vmatprep.subr.bf16.mxu1 %v1742_v0  ;;  %v1540_v7 = vld [vmem:[#allocation5 + $0x20] sm:$0xff]   ;;  %v1541_v8 = vld [vmem:[#allocation5 + $0x28] sm:$0xff]   ;;  %v1551_v14 = vld [vmem:[#allocation2 + $0x14] ss:$8 sps:$4 sm:$0xff]   ;;  %s1707_s27 = scalar_lea.vmem %s1263_s26, 4096  ;;  %p1712_p11 = scmp.lt.s32.totalorder %s1263_s26, %s1263_s26 }
  0x3c   :  { %1349 = vmatprep.mubr.msk.bf16.mxu0 %vm486_vm0, %v1547_v5  ;;  %1365 = vmatprep.mubr.msk.bf16.mxu1 %vm486_vm0, %v1550_v6  ;;  %v1544_v11 = vld [vmem:[#allocation5 + $0x40] sm:$0xff]   ;;  %v1553_v15 = vld [vmem:[#allocation2 + $0x114] ss:$8 sps:$4 sm:$0xff]   ;;  %v1555_v16 = vld [vmem:[#allocation2 + $0x10] ss:$8 sps:$4 sm:$0xff]   ;;  %p1708_p10 = scmp.ne.s32.totalorder %s1263_s26, %s1707_s27  ;;  %p1713_p12 = scmp.lt.s32.totalorder %s1707_s27, %s1707_s27 }
  0x3d   :  { %v1545_v12 = vld [vmem:[#allocation2] ss:$8 sps:$4 sm:$0xff]   ;;  %v1556_v17 = vld [vmem:[#allocation2 + $0x110] ss:$8 sps:$4 sm:$0xff]   ;;  %v1557_v18 = vld [vmem:[#allocation2 + $0x24] ss:$8 sps:$4 sm:$0xff]  }
  0x3e   :  { %586 = vmatpush1.bf16.msra.mxu0 %v1537_v2  ;;  %1519 = vmatpush1.bf16.msra.mxu1 %v1537_v2  ;;  %v1548_v13 = vld [vmem:[#allocation2 + $0x100] ss:$8 sps:$4 sm:$0xff]   ;;  %v1559_v19 = vld [vmem:[#allocation2 + $0x124] ss:$8 sps:$4 sm:$0xff]   ;;  %v1563_v22 = vld [vmem:[#allocation2 + $0x34] ss:$8 sps:$4 sm:$0xff]   ;;  %p1714_p13 = por %p1713_p12, %p1712_p11 }
  0x3f   :  { %587 = vmatprep.subr.bf16.mxu0 %v1742_v0  ;;  %1511 = vmatprep.subr.bf16.mxu1 %v1742_v0  ;;  %v1561_v20 = vld [vmem:[#allocation2 + $0x20] ss:$8 sps:$4 sm:$0xff]   ;;  %v1565_v23 = vld [vmem:[#allocation2 + $0x134] ss:$8 sps:$4 sm:$0xff]   ;;  %v1567_v24 = vld [vmem:[#allocation2 + $0x30] ss:$8 sps:$4 sm:$0xff]  }
  0x40   :  { %v1562_v21 = vld [vmem:[#allocation2 + $0x120] ss:$8 sps:$4 sm:$0xff]   ;;  %v1568_v25 = vld [vmem:[#allocation2 + $0x130] ss:$8 sps:$4 sm:$0xff]   ;;  %v1569_v26 = vld [vmem:[#allocation2 + $0x44] ss:$8 sps:$4 sm:$0xff]   ;;  %p1715_p0 = pnand %p1714_p13, %p1708_p10 }
  0x41   :  { %v1571_v27 = vld [vmem:[#allocation2 + $0x144] ss:$8 sps:$4 sm:$0xff]   ;;  %v1573_v28 = vld [vmem:[#allocation2 + $0x40] ss:$8 sps:$4 sm:$0xff]   ;;  %v1575_v30 = vld [vmem:[#allocation2 + $0x54] ss:$8 sps:$4 sm:$0xff]  }
  0x42   :  { %588 = vmatpush1.bf16.msra.mxu0 %v1538_v3  ;;  %1520 = vmatpush1.bf16.msra.mxu1 %v1538_v3  ;;  %v1574_v29 = vld [vmem:[#allocation2 + $0x140] ss:$8 sps:$4 sm:$0xff]   ;;  %v1577_v31 = vld [vmem:[#allocation2 + $0x154] ss:$8 sps:$4 sm:$0xff]   ;;  %v1579_v32 = vld [vmem:[#allocation2 + $0x50] ss:$8 sps:$4 sm:$0xff]  }
  0x43   :  { %589 = vmatprep.subr.bf16.mxu0 %v1742_v0  ;;  %1512 = vmatprep.subr.bf16.mxu1 %v1742_v0  ;;  %v1580_v33 = vld [vmem:[#allocation2 + $0x150] ss:$8 sps:$4 sm:$0xff]   ;;  %v1581_v34 = vld [vmem:[#allocation2 + $0x64] ss:$8 sps:$4 sm:$0xff]   ;;  %v1585_v36 = vld [vmem:[#allocation2 + $0x60] ss:$8 sps:$4 sm:$0xff]  }
  0x44   :  { %v1583_v35 = vld [vmem:[#allocation2 + $0x164] ss:$8 sps:$4 sm:$0xff]   ;;  %v1586_v37 = vld [vmem:[#allocation2 + $0x160] ss:$8 sps:$4 sm:$0xff]   ;;  %v1587_v38 = vld [vmem:[#allocation2 + $0x74] ss:$8 sps:$4 sm:$0xff]  }
  0x45   :  { %v1589_v39 = vld [vmem:[#allocation2 + $0x174] ss:$8 sps:$4 sm:$0xff]   ;;  %v1591_v40 = vld [vmem:[#allocation2 + $0x70] ss:$8 sps:$4 sm:$0xff]   ;;  %v1593_v42 = vld [vmem:[#allocation2 + $0x84] ss:$8 sps:$4 sm:$0xff]  }
  0x46   :  { %590 = vmatpush1.bf16.msra.mxu0 %v1539_v4  ;;  %1521 = vmatpush1.bf16.msra.mxu1 %v1539_v4  ;;  %v1592_v41 = vld [vmem:[#allocation2 + $0x170] ss:$8 sps:$4 sm:$0xff]   ;;  %v1595_v43 = vld [vmem:[#allocation2 + $0x184] ss:$8 sps:$4 sm:$0xff]   ;;  %v1597_v44 = vld [vmem:[#allocation2 + $0x80] ss:$8 sps:$4 sm:$0xff]  }
  0x47   :  { %591 = vmatprep.subr.bf16.mxu0 %v1742_v0  ;;  %1513 = vmatprep.subr.bf16.mxu1 %v1742_v0  ;;  %v1598_v45 = vld [vmem:[#allocation2 + $0x180] ss:$8 sps:$4 sm:$0xff]   ;;  %v1599_v46 = vld [vmem:[#allocation2 + $0x94] ss:$8 sps:$4 sm:$0xff]   ;;  %v1603_v48 = vld [vmem:[#allocation2 + $0x90] ss:$8 sps:$4 sm:$0xff]  }
  0x48   :  { %v1601_v47 = vld [vmem:[#allocation2 + $0x194] ss:$8 sps:$4 sm:$0xff]   ;;  %v1604_v49 = vld [vmem:[#allocation2 + $0x190] ss:$8 sps:$4 sm:$0xff]   ;;  %v1605_v50 = vld [vmem:[#allocation2 + $0xa4] ss:$8 sps:$4 sm:$0xff]  }
  0x49   :  { %v1607_v51 = vld [vmem:[#allocation2 + $0x1a4] ss:$8 sps:$4 sm:$0xff]   ;;  %v1609_v52 = vld [vmem:[#allocation2 + $0xa0] ss:$8 sps:$4 sm:$0xff]   ;;  %v1611_v54 = vld [vmem:[#allocation2 + $0xb4] ss:$8 sps:$4 sm:$0xff]  }
  0x4a   :  { %592 = vmatpush1.bf16.msra.mxu0 %v1540_v7  ;;  %1522 = vmatpush1.bf16.msra.mxu1 %v1540_v7  ;;  %v1610_v53 = vld [vmem:[#allocation2 + $0x1a0] ss:$8 sps:$4 sm:$0xff]   ;;  %v1613_v55 = vld [vmem:[#allocation2 + $0x1b4] ss:$8 sps:$4 sm:$0xff]   ;;  %v1615_v56 = vld [vmem:[#allocation2 + $0xb0] ss:$8 sps:$4 sm:$0xff]  }
  0x4b   :  { %593 = vmatprep.subr.bf16.mxu0 %v1742_v0  ;;  %1514 = vmatprep.subr.bf16.mxu1 %v1742_v0  ;;  %v1616_v57 = vld [vmem:[#allocation2 + $0x1b0] ss:$8 sps:$4 sm:$0xff]   ;;  %v1617_v58 = vld [vmem:[#allocation2 + $0xc4] ss:$8 sps:$4 sm:$0xff]   ;;  %v1621_v60 = vld [vmem:[#allocation2 + $0xc0] ss:$8 sps:$4 sm:$0xff]  }
  0x4c   :  { %v1619_v59 = vld [vmem:[#allocation2 + $0x1c4] ss:$8 sps:$4 sm:$0xff]   ;;  %v1622_v61 = vld [vmem:[#allocation2 + $0x1c0] ss:$8 sps:$4 sm:$0xff]   ;;  %v1623_v62 = vld [vmem:[#allocation2 + $0xd4] ss:$8 sps:$4 sm:$0xff]  }
  0x4d   :  { %v1625_v63 = vld [vmem:[#allocation2 + $0x1d4] ss:$8 sps:$4 sm:$0xff]   ;;  %v1628_v1 = vld [vmem:[#allocation2 + $0x1d0] ss:$8 sps:$4 sm:$0xff]   ;;  %v1629_v2 = vld [vmem:[#allocation2 + $0xe4] ss:$8 sps:$4 sm:$0xff]  }
  0x4e   :  { %594 = vmatpush1.bf16.msra.mxu0 %v1541_v8  ;;  %1523 = vmatpush1.bf16.msra.mxu1 %v1541_v8  ;;  %v1631_v3 = vld [vmem:[#allocation2 + $0x1e4] ss:$8 sps:$4 sm:$0xff]   ;;  %v1633_v4 = vld [vmem:[#allocation2 + $0xe0] ss:$8 sps:$4 sm:$0xff]   ;;  %v1635_v6 = vld [vmem:[#allocation2 + $0xf4] ss:$8 sps:$4 sm:$0xff]  }
  0x4f   :  { %595 = vmatprep.subr.bf16.mxu0 %v1742_v0  ;;  %1515 = vmatprep.subr.bf16.mxu1 %v1742_v0  ;;  %v1634_v5 = vld [vmem:[#allocation2 + $0x1e0] ss:$8 sps:$4 sm:$0xff]   ;;  %v1637_v7 = vld [vmem:[#allocation2 + $0x1f4] ss:$8 sps:$4 sm:$0xff]   ;;  %v1639_v8 = vld [vmem:[#allocation2 + $0xf0] ss:$8 sps:$4 sm:$0xff]  }
  0x52   :  { %596 = vmatpush1.bf16.msra.mxu0 %v1542_v9  ;;  %1524 = vmatpush1.bf16.msra.mxu1 %v1542_v9  ;;  %v1640_v9 = vld [vmem:[#allocation2 + $0x1f0] ss:$8 sps:$4 sm:$0xff]  }
  0x53   :  { %597 = vmatprep.subr.bf16.mxu0 %v1742_v0  ;;  %1516 = vmatprep.subr.bf16.mxu1 %v1742_v0 }
  0x56   :  { %598 = vmatpush1.bf16.msra.mxu0 %v1543_v10  ;;  %1525 = vmatpush1.bf16.msra.mxu1 %v1543_v10  ;;  %v1835_v10 = vld [vmem:[#allocation7] ss:$0 sm:$0xff] }
  0x57   :  { %599 = vmatprep.subr.bf16.mxu0 %v1742_v0  ;;  %1517 = vmatprep.subr.bf16.mxu1 %v1742_v0  ;;  %v1627_v0 = vld [vmem:[#allocation2 + $0xd0] ss:$8 sps:$4 sm:$0xff]  }
  0x5a   :  { %600 = vmatpush1.bf16.msra.mxu0 %v1544_v11  ;;  %1526 = vmatpush1.bf16.msra.mxu1 %v1544_v11 }
  0x5d   :  { %616 = vmatmul.mubr.bf16.vlgmr.msra.gmra.mrb[0].mxu0 %v1545_v12  ;;  %744 = vmatmul.mubr.bf16.vlgmr.msra.gmra.mrb[0].mxu1 %v1548_v13 }
  0x5e   :  { %1350 = vmatprep.mubr.msk.bf16.mxu0 %vm486_vm0, %v1551_v14  ;;  %1366 = vmatprep.mubr.msk.bf16.mxu1 %vm486_vm0, %v1553_v15 }
  0x65   :  { %624 = vmatmul.mubr.bf16.gmra.mrb[4].mxu0 %v1555_v16  ;;  %752 = vmatmul.mubr.bf16.gmra.mrb[4].mxu1 %v1556_v17 }
  0x66   :  { %1351 = vmatprep.mubr.msk.bf16.mxu0 %vm486_vm0, %v1557_v18  ;;  %1367 = vmatprep.mubr.msk.bf16.mxu1 %vm486_vm0, %v1559_v19 }
  0x6d   :  { %632 = vmatmul.mubr.bf16.gmra.mrb[8].mxu0 %v1561_v20  ;;  %760 = vmatmul.mubr.bf16.gmra.mrb[8].mxu1 %v1562_v21 }
  0x6e   :  { %1352 = vmatprep.mubr.msk.bf16.mxu0 %vm486_vm0, %v1563_v22  ;;  %1368 = vmatprep.mubr.msk.bf16.mxu1 %vm486_vm0, %v1565_v23 }
  0x75   :  { %640 = vmatmul.mubr.bf16.gmra.mrb[12].mxu0 %v1567_v24  ;;  %768 = vmatmul.mubr.bf16.gmra.mrb[12].mxu1 %v1568_v25 }
  0x76   :  { %1353 = vmatprep.mubr.msk.bf16.mxu0 %vm486_vm0, %v1569_v26  ;;  %1369 = vmatprep.mubr.msk.bf16.mxu1 %vm486_vm0, %v1571_v27 }
  0x7d   :  { %648 = vmatmul.mubr.bf16.gmra.mrb[16].mxu0 %v1573_v28  ;;  %776 = vmatmul.mubr.bf16.gmra.mrb[16].mxu1 %v1574_v29 }
  0x7e   :  { %1354 = vmatprep.mubr.msk.bf16.mxu0 %vm486_vm0, %v1575_v30  ;;  %1370 = vmatprep.mubr.msk.bf16.mxu1 %vm486_vm0, %v1577_v31 }
  0x85   :  { %656 = vmatmul.mubr.bf16.gmra.mrb[20].mxu0 %v1579_v32  ;;  %784 = vmatmul.mubr.bf16.gmra.mrb[20].mxu1 %v1580_v33 }
  0x86   :  { %1355 = vmatprep.mubr.msk.bf16.mxu0 %vm486_vm0, %v1581_v34  ;;  %1371 = vmatprep.mubr.msk.bf16.mxu1 %vm486_vm0, %v1583_v35 }
  0x8d   :  { %664 = vmatmul.mubr.bf16.gmra.mrb[24].mxu0 %v1585_v36  ;;  %792 = vmatmul.mubr.bf16.gmra.mrb[24].mxu1 %v1586_v37 }
  0x8e   :  { %1356 = vmatprep.mubr.msk.bf16.mxu0 %vm486_vm0, %v1587_v38  ;;  %1372 = vmatprep.mubr.msk.bf16.mxu1 %vm486_vm0, %v1589_v39 }
  0x95   :  { %672 = vmatmul.mubr.bf16.gmra.mrb[28].mxu0 %v1591_v40  ;;  %800 = vmatmul.mubr.bf16.gmra.mrb[28].mxu1 %v1592_v41 }
  0x96   :  { %1357 = vmatprep.mubr.msk.bf16.mxu0 %vm486_vm0, %v1593_v42  ;;  %1373 = vmatprep.mubr.msk.bf16.mxu1 %vm486_vm0, %v1595_v43 }
  0x9d   :  { %680 = vmatmul.mubr.bf16.gmra.mrb[32].mxu0 %v1597_v44  ;;  %808 = vmatmul.mubr.bf16.gmra.mrb[32].mxu1 %v1598_v45 }
  0x9e   :  { %1358 = vmatprep.mubr.msk.bf16.mxu0 %vm486_vm0, %v1599_v46  ;;  %1374 = vmatprep.mubr.msk.bf16.mxu1 %vm486_vm0, %v1601_v47 }
  0xa5   :  { %688 = vmatmul.mubr.bf16.gmra.mrb[36].mxu0 %v1603_v48  ;;  %816 = vmatmul.mubr.bf16.gmra.mrb[36].mxu1 %v1604_v49 }
  0xa6   :  { %1359 = vmatprep.mubr.msk.bf16.mxu0 %vm486_vm0, %v1605_v50  ;;  %1375 = vmatprep.mubr.msk.bf16.mxu1 %vm486_vm0, %v1607_v51 }
  0xad   :  { %696 = vmatmul.mubr.bf16.gmra.mrb[40].mxu0 %v1609_v52  ;;  %824 = vmatmul.mubr.bf16.gmra.mrb[40].mxu1 %v1610_v53 }
  0xae   :  { %1360 = vmatprep.mubr.msk.bf16.mxu0 %vm486_vm0, %v1611_v54  ;;  %1376 = vmatprep.mubr.msk.bf16.mxu1 %vm486_vm0, %v1613_v55 }
  0xb5   :  { %704 = vmatmul.mubr.bf16.gmra.mrb[44].mxu0 %v1615_v56  ;;  %832 = vmatmul.mubr.bf16.gmra.mrb[44].mxu1 %v1616_v57 }
  0xb6   :  { %1361 = vmatprep.mubr.msk.bf16.mxu0 %vm486_vm0, %v1617_v58  ;;  %1377 = vmatprep.mubr.msk.bf16.mxu1 %vm486_vm0, %v1619_v59 }
  0xbd   :  { %712 = vmatmul.mubr.bf16.gmra.mrb[48].mxu0 %v1621_v60  ;;  %840 = vmatmul.mubr.bf16.gmra.mrb[48].mxu1 %v1622_v61 }
  0xbe   :  { %1362 = vmatprep.mubr.msk.bf16.mxu0 %vm486_vm0, %v1623_v62  ;;  %1378 = vmatprep.mubr.msk.bf16.mxu1 %vm486_vm0, %v1625_v63 }
  0xc5   :  { %720 = vmatmul.mubr.bf16.gmra.mrb[52].mxu0 %v1627_v0  ;;  %848 = vmatmul.mubr.bf16.gmra.mrb[52].mxu1 %v1628_v1 }
  0xc6   :  { %1363 = vmatprep.mubr.msk.bf16.mxu0 %vm486_vm0, %v1629_v2  ;;  %1379 = vmatprep.mubr.msk.bf16.mxu1 %vm486_vm0, %v1631_v3 }
  0xcd   :  { %728 = vmatmul.mubr.bf16.gmra.mrb[56].mxu0 %v1633_v4  ;;  %856 = vmatmul.mubr.bf16.gmra.mrb[56].mxu1 %v1634_v5 }
  0xce   :  { %1364 = vmatprep.mubr.msk.bf16.mxu0 %vm486_vm0, %v1635_v6  ;;  %1380 = vmatprep.mubr.msk.bf16.mxu1 %vm486_vm0, %v1637_v7 }
  0xd5   :  { %736 = vmatmul.mubr.bf16.gmra.mrb[60].mxu0 %v1639_v8  ;;  %864 = vmatmul.mubr.bf16.gmra.mrb[60].mxu1 %v1640_v9 }
 0x130   :  { %v617_v11 = vpop.f32.mrb[0].mxu0  ;;  %v745_v12 = vpop.f32.mrb[0].mxu1 }
 0x131   :  { %v618_v13 = vadd.f32 %v1835_v10, %v617_v11  ;;  %v746_v14 = vadd.f32 %v1835_v10, %v745_v12  ;;  %v619_v15 = vpop.f32.mrb[1].mxu0  ;;  %v747_v16 = vpop.f32.mrb[1].mxu1 }
 0x132   :  { %v620_v17 = vpop.f32.mrb[2].mxu0  ;;  %v748_v18 = vpop.f32.mrb[2].mxu1 }
 0x133   :  { %v872_v19 = vmax.f32 %v618_v13, 0.0  ;;  %v904_v20 = vmax.f32 %v746_v14, 0.0  ;;  %v621_v21 = vadd.f32 %v1835_v10, %v620_v17  ;;  %v749_v22 = vadd.f32 %v1835_v10, %v748_v18  ;;  %v622_v23 = vpop.f32.mrb[3].mxu0  ;;  %v750_v24 = vpop.f32.mrb[3].mxu1 }
 0x135   :  { %v1445_v25 = vpack.c.bf16 %v872_v19, %v872_v19  ;;  %v1477_v26 = vpack.c.bf16 %v904_v20, %v904_v20  ;;  %v873_v27 = vmax.f32 %v621_v21, 0.0  ;;  %v905_v28 = vmax.f32 %v749_v22, 0.0 }
 0x137   :  { %1193 = vst.msk [vmem:[#allocation8] sm:$0xf] %vm1192_vm1, %v1445_v25  ;;  %1225 = vst.msk [vmem:[#allocation8 + $0x80] sm:$0xf] %vm1192_vm1, %v1477_v26  ;;  %v1446_v29 = vpack.c.bf16 %v873_v27, %v873_v27  ;;  %v1478_v30 = vpack.c.bf16 %v905_v28, %v905_v28 }
 0x138   :  { %v625_v31 = vpop.f32.mrb[4].mxu0  ;;  %v753_v32 = vpop.f32.mrb[4].mxu1 }
 0x139   :  { %1194 = vst.msk [vmem:[#allocation8 + $0x4] sm:$0xf] %vm1192_vm1, %v1446_v29  ;;  %1226 = vst.msk [vmem:[#allocation8 + $0x84] sm:$0xf] %vm1192_vm1, %v1478_v30  ;;  %v626_v33 = vadd.f32 %v1835_v10, %v625_v31  ;;  %v754_v34 = vadd.f32 %v1835_v10, %v753_v32  ;;  %v627_v35 = vpop.f32.mrb[5].mxu0  ;;  %v755_v36 = vpop.f32.mrb[5].mxu1 }
 0x13a   :  { %v628_v37 = vpop.f32.mrb[6].mxu0  ;;  %v756_v38 = vpop.f32.mrb[6].mxu1 }
 0x13b   :  { %v874_v39 = vmax.f32 %v626_v33, 0.0  ;;  %v906_v40 = vmax.f32 %v754_v34, 0.0  ;;  %v629_v41 = vadd.f32 %v1835_v10, %v628_v37  ;;  %v757_v42 = vadd.f32 %v1835_v10, %v756_v38  ;;  %v630_v43 = vpop.f32.mrb[7].mxu0  ;;  %v758_v44 = vpop.f32.mrb[7].mxu1 }
 0x13d   :  { %v1447_v45 = vpack.c.bf16 %v874_v39, %v874_v39  ;;  %v1479_v46 = vpack.c.bf16 %v906_v40, %v906_v40  ;;  %v875_v47 = vmax.f32 %v629_v41, 0.0  ;;  %v907_v48 = vmax.f32 %v757_v42, 0.0 }
 0x13f   :  { %1195 = vst.msk [vmem:[#allocation8 + $0x8] sm:$0xf] %vm1192_vm1, %v1447_v45  ;;  %1227 = vst.msk [vmem:[#allocation8 + $0x88] sm:$0xf] %vm1192_vm1, %v1479_v46  ;;  %v1448_v49 = vpack.c.bf16 %v875_v47, %v875_v47  ;;  %v1480_v50 = vpack.c.bf16 %v907_v48, %v907_v48 }
 0x140   :  { %v633_v51 = vpop.f32.mrb[8].mxu0  ;;  %v761_v52 = vpop.f32.mrb[8].mxu1 }
 0x141   :  { %1196 = vst.msk [vmem:[#allocation8 + $0xc] sm:$0xf] %vm1192_vm1, %v1448_v49  ;;  %1228 = vst.msk [vmem:[#allocation8 + $0x8c] sm:$0xf] %vm1192_vm1, %v1480_v50  ;;  %v634_v53 = vadd.f32 %v1835_v10, %v633_v51  ;;  %v762_v54 = vadd.f32 %v1835_v10, %v761_v52  ;;  %v635_v55 = vpop.f32.mrb[9].mxu0  ;;  %v763_v56 = vpop.f32.mrb[9].mxu1 }
 0x142   :  { %v636_v57 = vpop.f32.mrb[10].mxu0  ;;  %v764_v58 = vpop.f32.mrb[10].mxu1 }
 0x143   :  { %v876_v59 = vmax.f32 %v634_v53, 0.0  ;;  %v908_v60 = vmax.f32 %v762_v54, 0.0  ;;  %v637_v61 = vadd.f32 %v1835_v10, %v636_v57  ;;  %v765_v62 = vadd.f32 %v1835_v10, %v764_v58  ;;  %v638_v63 = vpop.f32.mrb[11].mxu0  ;;  %v766_v0 = vpop.f32.mrb[11].mxu1 }
 0x145   :  { %v1449_v1 = vpack.c.bf16 %v876_v59, %v876_v59  ;;  %v1481_v2 = vpack.c.bf16 %v908_v60, %v908_v60  ;;  %v877_v3 = vmax.f32 %v637_v61, 0.0  ;;  %v909_v4 = vmax.f32 %v765_v62, 0.0 }
 0x147   :  { %1197 = vst.msk [vmem:[#allocation8 + $0x10] sm:$0xf] %vm1192_vm1, %v1449_v1  ;;  %1229 = vst.msk [vmem:[#allocation8 + $0x90] sm:$0xf] %vm1192_vm1, %v1481_v2  ;;  %v1450_v5 = vpack.c.bf16 %v877_v3, %v877_v3  ;;  %v1482_v6 = vpack.c.bf16 %v909_v4, %v909_v4 }
 0x148   :  { %v641_v7 = vpop.f32.mrb[12].mxu0  ;;  %v769_v8 = vpop.f32.mrb[12].mxu1 }
 0x149   :  { %1198 = vst.msk [vmem:[#allocation8 + $0x14] sm:$0xf] %vm1192_vm1, %v1450_v5  ;;  %1230 = vst.msk [vmem:[#allocation8 + $0x94] sm:$0xf] %vm1192_vm1, %v1482_v6  ;;  %v642_v9 = vadd.f32 %v1835_v10, %v641_v7  ;;  %v770_v11 = vadd.f32 %v1835_v10, %v769_v8  ;;  %v643_v12 = vpop.f32.mrb[13].mxu0  ;;  %v771_v13 = vpop.f32.mrb[13].mxu1 }
 0x14a   :  { %v644_v14 = vpop.f32.mrb[14].mxu0  ;;  %v772_v15 = vpop.f32.mrb[14].mxu1 }
 0x14b   :  { %v878_v16 = vmax.f32 %v642_v9, 0.0  ;;  %v910_v17 = vmax.f32 %v770_v11, 0.0  ;;  %v645_v18 = vadd.f32 %v1835_v10, %v644_v14  ;;  %v773_v19 = vadd.f32 %v1835_v10, %v772_v15  ;;  %v646_v20 = vpop.f32.mrb[15].mxu0  ;;  %v774_v21 = vpop.f32.mrb[15].mxu1 }
 0x14d   :  { %v1451_v22 = vpack.c.bf16 %v878_v16, %v878_v16  ;;  %v1483_v23 = vpack.c.bf16 %v910_v17, %v910_v17  ;;  %v879_v24 = vmax.f32 %v645_v18, 0.0  ;;  %v911_v25 = vmax.f32 %v773_v19, 0.0 }
 0x14f   :  { %1199 = vst.msk [vmem:[#allocation8 + $0x18] sm:$0xf] %vm1192_vm1, %v1451_v22  ;;  %1231 = vst.msk [vmem:[#allocation8 + $0x98] sm:$0xf] %vm1192_vm1, %v1483_v23  ;;  %v1452_v26 = vpack.c.bf16 %v879_v24, %v879_v24  ;;  %v1484_v27 = vpack.c.bf16 %v911_v25, %v911_v25 }
 0x150   :  { %v649_v28 = vpop.f32.mrb[16].mxu0  ;;  %v777_v29 = vpop.f32.mrb[16].mxu1 }
 0x151   :  { %1200 = vst.msk [vmem:[#allocation8 + $0x1c] sm:$0xf] %vm1192_vm1, %v1452_v26  ;;  %1232 = vst.msk [vmem:[#allocation8 + $0x9c] sm:$0xf] %vm1192_vm1, %v1484_v27  ;;  %v650_v30 = vadd.f32 %v1835_v10, %v649_v28  ;;  %v778_v31 = vadd.f32 %v1835_v10, %v777_v29  ;;  %v651_v32 = vpop.f32.mrb[17].mxu0  ;;  %v779_v33 = vpop.f32.mrb[17].mxu1 }
 0x152   :  { %v652_v34 = vpop.f32.mrb[18].mxu0  ;;  %v780_v35 = vpop.f32.mrb[18].mxu1 }
 0x153   :  { %v880_v36 = vmax.f32 %v650_v30, 0.0  ;;  %v912_v37 = vmax.f32 %v778_v31, 0.0  ;;  %v653_v38 = vadd.f32 %v1835_v10, %v652_v34  ;;  %v781_v39 = vadd.f32 %v1835_v10, %v780_v35  ;;  %v654_v40 = vpop.f32.mrb[19].mxu0  ;;  %v782_v41 = vpop.f32.mrb[19].mxu1 }
 0x155   :  { %v1453_v42 = vpack.c.bf16 %v880_v36, %v880_v36  ;;  %v1485_v43 = vpack.c.bf16 %v912_v37, %v912_v37  ;;  %v881_v44 = vmax.f32 %v653_v38, 0.0  ;;  %v913_v45 = vmax.f32 %v781_v39, 0.0 }
 0x157   :  { %1201 = vst.msk [vmem:[#allocation8 + $0x20] sm:$0xf] %vm1192_vm1, %v1453_v42  ;;  %1233 = vst.msk [vmem:[#allocation8 + $0xa0] sm:$0xf] %vm1192_vm1, %v1485_v43  ;;  %v1454_v46 = vpack.c.bf16 %v881_v44, %v881_v44  ;;  %v1486_v47 = vpack.c.bf16 %v913_v45, %v913_v45 }
 0x158   :  { %v657_v48 = vpop.f32.mrb[20].mxu0  ;;  %v785_v49 = vpop.f32.mrb[20].mxu1 }
 0x159   :  { %1202 = vst.msk [vmem:[#allocation8 + $0x24] sm:$0xf] %vm1192_vm1, %v1454_v46  ;;  %1234 = vst.msk [vmem:[#allocation8 + $0xa4] sm:$0xf] %vm1192_vm1, %v1486_v47  ;;  %v658_v50 = vadd.f32 %v1835_v10, %v657_v48  ;;  %v786_v51 = vadd.f32 %v1835_v10, %v785_v49  ;;  %v659_v52 = vpop.f32.mrb[21].mxu0  ;;  %v787_v53 = vpop.f32.mrb[21].mxu1 }
 0x15a   :  { %v660_v54 = vpop.f32.mrb[22].mxu0  ;;  %v788_v55 = vpop.f32.mrb[22].mxu1 }
 0x15b   :  { %v882_v56 = vmax.f32 %v658_v50, 0.0  ;;  %v914_v57 = vmax.f32 %v786_v51, 0.0  ;;  %v661_v58 = vadd.f32 %v1835_v10, %v660_v54  ;;  %v789_v59 = vadd.f32 %v1835_v10, %v788_v55  ;;  %v662_v60 = vpop.f32.mrb[23].mxu0  ;;  %v790_v61 = vpop.f32.mrb[23].mxu1 }
 0x15d   :  { %v1455_v62 = vpack.c.bf16 %v882_v56, %v882_v56  ;;  %v1487_v63 = vpack.c.bf16 %v914_v57, %v914_v57  ;;  %v883_v0 = vmax.f32 %v661_v58, 0.0  ;;  %v915_v1 = vmax.f32 %v789_v59, 0.0 }
 0x15f   :  { %1203 = vst.msk [vmem:[#allocation8 + $0x28] sm:$0xf] %vm1192_vm1, %v1455_v62  ;;  %1235 = vst.msk [vmem:[#allocation8 + $0xa8] sm:$0xf] %vm1192_vm1, %v1487_v63  ;;  %v1456_v2 = vpack.c.bf16 %v883_v0, %v883_v0  ;;  %v1488_v3 = vpack.c.bf16 %v915_v1, %v915_v1 }
 0x160   :  { %v665_v4 = vpop.f32.mrb[24].mxu0  ;;  %v793_v5 = vpop.f32.mrb[24].mxu1 }
 0x161   :  { %1204 = vst.msk [vmem:[#allocation8 + $0x2c] sm:$0xf] %vm1192_vm1, %v1456_v2  ;;  %1236 = vst.msk [vmem:[#allocation8 + $0xac] sm:$0xf] %vm1192_vm1, %v1488_v3  ;;  %v666_v6 = vadd.f32 %v1835_v10, %v665_v4  ;;  %v794_v7 = vadd.f32 %v1835_v10, %v793_v5  ;;  %v667_v8 = vpop.f32.mrb[25].mxu0  ;;  %v795_v9 = vpop.f32.mrb[25].mxu1 }
 0x162   :  { %v668_v11 = vpop.f32.mrb[26].mxu0  ;;  %v796_v12 = vpop.f32.mrb[26].mxu1 }
 0x163   :  { %v884_v13 = vmax.f32 %v666_v6, 0.0  ;;  %v916_v14 = vmax.f32 %v794_v7, 0.0  ;;  %v669_v15 = vadd.f32 %v1835_v10, %v668_v11  ;;  %v797_v16 = vadd.f32 %v1835_v10, %v796_v12  ;;  %v670_v17 = vpop.f32.mrb[27].mxu0  ;;  %v798_v18 = vpop.f32.mrb[27].mxu1 }
 0x165   :  { %v1457_v19 = vpack.c.bf16 %v884_v13, %v884_v13  ;;  %v1489_v20 = vpack.c.bf16 %v916_v14, %v916_v14  ;;  %v885_v21 = vmax.f32 %v669_v15, 0.0  ;;  %v917_v22 = vmax.f32 %v797_v16, 0.0 }
 0x167   :  { %1205 = vst.msk [vmem:[#allocation8 + $0x30] sm:$0xf] %vm1192_vm1, %v1457_v19  ;;  %1237 = vst.msk [vmem:[#allocation8 + $0xb0] sm:$0xf] %vm1192_vm1, %v1489_v20  ;;  %v1458_v23 = vpack.c.bf16 %v885_v21, %v885_v21  ;;  %v1490_v24 = vpack.c.bf16 %v917_v22, %v917_v22 }
 0x168   :  { %v673_v25 = vpop.f32.mrb[28].mxu0  ;;  %v801_v26 = vpop.f32.mrb[28].mxu1 }
 0x169   :  { %1206 = vst.msk [vmem:[#allocation8 + $0x34] sm:$0xf] %vm1192_vm1, %v1458_v23  ;;  %1238 = vst.msk [vmem:[#allocation8 + $0xb4] sm:$0xf] %vm1192_vm1, %v1490_v24  ;;  %v674_v27 = vadd.f32 %v1835_v10, %v673_v25  ;;  %v802_v28 = vadd.f32 %v1835_v10, %v801_v26  ;;  %v675_v29 = vpop.f32.mrb[29].mxu0  ;;  %v803_v30 = vpop.f32.mrb[29].mxu1 }
 0x16a   :  { %v676_v31 = vpop.f32.mrb[30].mxu0  ;;  %v804_v32 = vpop.f32.mrb[30].mxu1 }
 0x16b   :  { %v886_v33 = vmax.f32 %v674_v27, 0.0  ;;  %v918_v34 = vmax.f32 %v802_v28, 0.0  ;;  %v677_v35 = vadd.f32 %v1835_v10, %v676_v31  ;;  %v805_v36 = vadd.f32 %v1835_v10, %v804_v32  ;;  %v678_v37 = vpop.f32.mrb[31].mxu0  ;;  %v806_v38 = vpop.f32.mrb[31].mxu1 }
 0x16d   :  { %v1459_v39 = vpack.c.bf16 %v886_v33, %v886_v33  ;;  %v1491_v40 = vpack.c.bf16 %v918_v34, %v918_v34  ;;  %v887_v41 = vmax.f32 %v677_v35, 0.0  ;;  %v919_v42 = vmax.f32 %v805_v36, 0.0 }
 0x16f   :  { %1207 = vst.msk [vmem:[#allocation8 + $0x38] sm:$0xf] %vm1192_vm1, %v1459_v39  ;;  %1239 = vst.msk [vmem:[#allocation8 + $0xb8] sm:$0xf] %vm1192_vm1, %v1491_v40  ;;  %v1460_v43 = vpack.c.bf16 %v887_v41, %v887_v41  ;;  %v1492_v44 = vpack.c.bf16 %v919_v42, %v919_v42 }
 0x170   :  { %v681_v45 = vpop.f32.mrb[32].mxu0  ;;  %v809_v46 = vpop.f32.mrb[32].mxu1 }
 0x171   :  { %1208 = vst.msk [vmem:[#allocation8 + $0x3c] sm:$0xf] %vm1192_vm1, %v1460_v43  ;;  %1240 = vst.msk [vmem:[#allocation8 + $0xbc] sm:$0xf] %vm1192_vm1, %v1492_v44  ;;  %v682_v47 = vadd.f32 %v1835_v10, %v681_v45  ;;  %v810_v48 = vadd.f32 %v1835_v10, %v809_v46  ;;  %v683_v49 = vpop.f32.mrb[33].mxu0  ;;  %v811_v50 = vpop.f32.mrb[33].mxu1 }
 0x172   :  { %v684_v51 = vpop.f32.mrb[34].mxu0  ;;  %v812_v52 = vpop.f32.mrb[34].mxu1 }
 0x173   :  { %v888_v53 = vmax.f32 %v682_v47, 0.0  ;;  %v920_v54 = vmax.f32 %v810_v48, 0.0  ;;  %v685_v55 = vadd.f32 %v1835_v10, %v684_v51  ;;  %v813_v56 = vadd.f32 %v1835_v10, %v812_v52  ;;  %v686_v57 = vpop.f32.mrb[35].mxu0  ;;  %v814_v58 = vpop.f32.mrb[35].mxu1 }
 0x175   :  { %v1461_v59 = vpack.c.bf16 %v888_v53, %v888_v53  ;;  %v1493_v60 = vpack.c.bf16 %v920_v54, %v920_v54  ;;  %v889_v61 = vmax.f32 %v685_v55, 0.0  ;;  %v921_v62 = vmax.f32 %v813_v56, 0.0 }
 0x177   :  { %1209 = vst.msk [vmem:[#allocation8 + $0x40] sm:$0xf] %vm1192_vm1, %v1461_v59  ;;  %1241 = vst.msk [vmem:[#allocation8 + $0xc0] sm:$0xf] %vm1192_vm1, %v1493_v60  ;;  %v1462_v63 = vpack.c.bf16 %v889_v61, %v889_v61  ;;  %v1494_v0 = vpack.c.bf16 %v921_v62, %v921_v62 }
 0x178   :  { %v689_v1 = vpop.f32.mrb[36].mxu0  ;;  %v817_v2 = vpop.f32.mrb[36].mxu1 }
 0x179   :  { %1210 = vst.msk [vmem:[#allocation8 + $0x44] sm:$0xf] %vm1192_vm1, %v1462_v63  ;;  %1242 = vst.msk [vmem:[#allocation8 + $0xc4] sm:$0xf] %vm1192_vm1, %v1494_v0  ;;  %v690_v3 = vadd.f32 %v1835_v10, %v689_v1  ;;  %v818_v4 = vadd.f32 %v1835_v10, %v817_v2  ;;  %v691_v5 = vpop.f32.mrb[37].mxu0  ;;  %v819_v6 = vpop.f32.mrb[37].mxu1 }
 0x17a   :  { %v692_v7 = vpop.f32.mrb[38].mxu0  ;;  %v820_v8 = vpop.f32.mrb[38].mxu1 }
 0x17b   :  { %v890_v9 = vmax.f32 %v690_v3, 0.0  ;;  %v922_v11 = vmax.f32 %v818_v4, 0.0  ;;  %v693_v12 = vadd.f32 %v1835_v10, %v692_v7  ;;  %v821_v13 = vadd.f32 %v1835_v10, %v820_v8  ;;  %v694_v14 = vpop.f32.mrb[39].mxu0  ;;  %v822_v15 = vpop.f32.mrb[39].mxu1 }
 0x17d   :  { %v1463_v16 = vpack.c.bf16 %v890_v9, %v890_v9  ;;  %v1495_v17 = vpack.c.bf16 %v922_v11, %v922_v11  ;;  %v891_v18 = vmax.f32 %v693_v12, 0.0  ;;  %v923_v19 = vmax.f32 %v821_v13, 0.0 }
 0x17f   :  { %1211 = vst.msk [vmem:[#allocation8 + $0x48] sm:$0xf] %vm1192_vm1, %v1463_v16  ;;  %1243 = vst.msk [vmem:[#allocation8 + $0xc8] sm:$0xf] %vm1192_vm1, %v1495_v17  ;;  %v1464_v20 = vpack.c.bf16 %v891_v18, %v891_v18  ;;  %v1496_v21 = vpack.c.bf16 %v923_v19, %v923_v19 }
 0x180   :  { %v697_v22 = vpop.f32.mrb[40].mxu0  ;;  %v825_v23 = vpop.f32.mrb[40].mxu1 }
 0x181   :  { %1212 = vst.msk [vmem:[#allocation8 + $0x4c] sm:$0xf] %vm1192_vm1, %v1464_v20  ;;  %1244 = vst.msk [vmem:[#allocation8 + $0xcc] sm:$0xf] %vm1192_vm1, %v1496_v21  ;;  %v698_v24 = vadd.f32 %v1835_v10, %v697_v22  ;;  %v826_v25 = vadd.f32 %v1835_v10, %v825_v23  ;;  %v699_v26 = vpop.f32.mrb[41].mxu0  ;;  %v827_v27 = vpop.f32.mrb[41].mxu1 }
 0x182   :  { %v700_v28 = vpop.f32.mrb[42].mxu0  ;;  %v828_v29 = vpop.f32.mrb[42].mxu1 }
 0x183   :  { %v892_v30 = vmax.f32 %v698_v24, 0.0  ;;  %v924_v31 = vmax.f32 %v826_v25, 0.0  ;;  %v701_v32 = vadd.f32 %v1835_v10, %v700_v28  ;;  %v829_v33 = vadd.f32 %v1835_v10, %v828_v29  ;;  %v702_v34 = vpop.f32.mrb[43].mxu0  ;;  %v830_v35 = vpop.f32.mrb[43].mxu1 }
 0x185   :  { %v1465_v36 = vpack.c.bf16 %v892_v30, %v892_v30  ;;  %v1497_v37 = vpack.c.bf16 %v924_v31, %v924_v31  ;;  %v893_v38 = vmax.f32 %v701_v32, 0.0  ;;  %v925_v39 = vmax.f32 %v829_v33, 0.0 }
 0x187   :  { %1213 = vst.msk [vmem:[#allocation8 + $0x50] sm:$0xf] %vm1192_vm1, %v1465_v36  ;;  %1245 = vst.msk [vmem:[#allocation8 + $0xd0] sm:$0xf] %vm1192_vm1, %v1497_v37  ;;  %v1466_v40 = vpack.c.bf16 %v893_v38, %v893_v38  ;;  %v1498_v41 = vpack.c.bf16 %v925_v39, %v925_v39 }
 0x188   :  { %v705_v42 = vpop.f32.mrb[44].mxu0  ;;  %v833_v43 = vpop.f32.mrb[44].mxu1 }
 0x189   :  { %1214 = vst.msk [vmem:[#allocation8 + $0x54] sm:$0xf] %vm1192_vm1, %v1466_v40  ;;  %1246 = vst.msk [vmem:[#allocation8 + $0xd4] sm:$0xf] %vm1192_vm1, %v1498_v41  ;;  %v706_v44 = vadd.f32 %v1835_v10, %v705_v42  ;;  %v834_v45 = vadd.f32 %v1835_v10, %v833_v43  ;;  %v707_v46 = vpop.f32.mrb[45].mxu0  ;;  %v835_v47 = vpop.f32.mrb[45].mxu1 }
 0x18a   :  { %v708_v48 = vpop.f32.mrb[46].mxu0  ;;  %v836_v49 = vpop.f32.mrb[46].mxu1 }
 0x18b   :  { %v894_v50 = vmax.f32 %v706_v44, 0.0  ;;  %v926_v51 = vmax.f32 %v834_v45, 0.0  ;;  %v709_v52 = vadd.f32 %v1835_v10, %v708_v48  ;;  %v837_v53 = vadd.f32 %v1835_v10, %v836_v49  ;;  %v710_v54 = vpop.f32.mrb[47].mxu0  ;;  %v838_v55 = vpop.f32.mrb[47].mxu1 }
 0x18d   :  { %v1467_v56 = vpack.c.bf16 %v894_v50, %v894_v50  ;;  %v1499_v57 = vpack.c.bf16 %v926_v51, %v926_v51  ;;  %v895_v58 = vmax.f32 %v709_v52, 0.0  ;;  %v927_v59 = vmax.f32 %v837_v53, 0.0 }
 0x18f   :  { %1215 = vst.msk [vmem:[#allocation8 + $0x58] sm:$0xf] %vm1192_vm1, %v1467_v56  ;;  %1247 = vst.msk [vmem:[#allocation8 + $0xd8] sm:$0xf] %vm1192_vm1, %v1499_v57  ;;  %v1468_v60 = vpack.c.bf16 %v895_v58, %v895_v58  ;;  %v1500_v61 = vpack.c.bf16 %v927_v59, %v927_v59 }
 0x190   :  { %v713_v62 = vpop.f32.mrb[48].mxu0  ;;  %v841_v63 = vpop.f32.mrb[48].mxu1 }
 0x191   :  { %1216 = vst.msk [vmem:[#allocation8 + $0x5c] sm:$0xf] %vm1192_vm1, %v1468_v60  ;;  %1248 = vst.msk [vmem:[#allocation8 + $0xdc] sm:$0xf] %vm1192_vm1, %v1500_v61  ;;  %v714_v0 = vadd.f32 %v1835_v10, %v713_v62  ;;  %v842_v1 = vadd.f32 %v1835_v10, %v841_v63  ;;  %v715_v2 = vpop.f32.mrb[49].mxu0  ;;  %v843_v3 = vpop.f32.mrb[49].mxu1 }
 0x192   :  { %v716_v4 = vpop.f32.mrb[50].mxu0  ;;  %v844_v5 = vpop.f32.mrb[50].mxu1 }
 0x193   :  { %v896_v6 = vmax.f32 %v714_v0, 0.0  ;;  %v928_v7 = vmax.f32 %v842_v1, 0.0  ;;  %v717_v8 = vadd.f32 %v1835_v10, %v716_v4  ;;  %v845_v9 = vadd.f32 %v1835_v10, %v844_v5  ;;  %v718_v11 = vpop.f32.mrb[51].mxu0  ;;  %v846_v12 = vpop.f32.mrb[51].mxu1 }
 0x195   :  { %v1469_v13 = vpack.c.bf16 %v896_v6, %v896_v6  ;;  %v1501_v14 = vpack.c.bf16 %v928_v7, %v928_v7  ;;  %v897_v15 = vmax.f32 %v717_v8, 0.0  ;;  %v929_v16 = vmax.f32 %v845_v9, 0.0 }
 0x197   :  { %1217 = vst.msk [vmem:[#allocation8 + $0x60] sm:$0xf] %vm1192_vm1, %v1469_v13  ;;  %1249 = vst.msk [vmem:[#allocation8 + $0xe0] sm:$0xf] %vm1192_vm1, %v1501_v14  ;;  %v1470_v17 = vpack.c.bf16 %v897_v15, %v897_v15  ;;  %v1502_v18 = vpack.c.bf16 %v929_v16, %v929_v16 }
 0x198   :  { %v721_v19 = vpop.f32.mrb[52].mxu0  ;;  %v849_v20 = vpop.f32.mrb[52].mxu1 }
 0x199   :  { %1218 = vst.msk [vmem:[#allocation8 + $0x64] sm:$0xf] %vm1192_vm1, %v1470_v17  ;;  %1250 = vst.msk [vmem:[#allocation8 + $0xe4] sm:$0xf] %vm1192_vm1, %v1502_v18  ;;  %v722_v21 = vadd.f32 %v1835_v10, %v721_v19  ;;  %v850_v22 = vadd.f32 %v1835_v10, %v849_v20  ;;  %v723_v23 = vpop.f32.mrb[53].mxu0  ;;  %v851_v24 = vpop.f32.mrb[53].mxu1 }
 0x19a   :  { %v724_v25 = vpop.f32.mrb[54].mxu0  ;;  %v852_v26 = vpop.f32.mrb[54].mxu1 }
 0x19b   :  { %v898_v27 = vmax.f32 %v722_v21, 0.0  ;;  %v930_v28 = vmax.f32 %v850_v22, 0.0  ;;  %v725_v29 = vadd.f32 %v1835_v10, %v724_v25  ;;  %v853_v30 = vadd.f32 %v1835_v10, %v852_v26  ;;  %v726_v31 = vpop.f32.mrb[55].mxu0  ;;  %v854_v32 = vpop.f32.mrb[55].mxu1 }
 0x19d   :  { %v1471_v33 = vpack.c.bf16 %v898_v27, %v898_v27  ;;  %v1503_v34 = vpack.c.bf16 %v930_v28, %v930_v28  ;;  %v899_v35 = vmax.f32 %v725_v29, 0.0  ;;  %v931_v36 = vmax.f32 %v853_v30, 0.0 }
 0x19f   :  { %1219 = vst.msk [vmem:[#allocation8 + $0x68] sm:$0xf] %vm1192_vm1, %v1471_v33  ;;  %1251 = vst.msk [vmem:[#allocation8 + $0xe8] sm:$0xf] %vm1192_vm1, %v1503_v34  ;;  %v1472_v37 = vpack.c.bf16 %v899_v35, %v899_v35  ;;  %v1504_v38 = vpack.c.bf16 %v931_v36, %v931_v36 }
 0x1a0   :  { %v729_v39 = vpop.f32.mrb[56].mxu0  ;;  %v857_v40 = vpop.f32.mrb[56].mxu1 }
 0x1a1   :  { %1220 = vst.msk [vmem:[#allocation8 + $0x6c] sm:$0xf] %vm1192_vm1, %v1472_v37  ;;  %1252 = vst.msk [vmem:[#allocation8 + $0xec] sm:$0xf] %vm1192_vm1, %v1504_v38  ;;  %v730_v41 = vadd.f32 %v1835_v10, %v729_v39  ;;  %v858_v42 = vadd.f32 %v1835_v10, %v857_v40  ;;  %v731_v43 = vpop.f32.mrb[57].mxu0  ;;  %v859_v44 = vpop.f32.mrb[57].mxu1 }
 0x1a2   :  { %v732_v45 = vpop.f32.mrb[58].mxu0  ;;  %v860_v46 = vpop.f32.mrb[58].mxu1 }
 0x1a3   :  { %v900_v47 = vmax.f32 %v730_v41, 0.0  ;;  %v932_v48 = vmax.f32 %v858_v42, 0.0  ;;  %v733_v49 = vadd.f32 %v1835_v10, %v732_v45  ;;  %v861_v50 = vadd.f32 %v1835_v10, %v860_v46  ;;  %v734_v51 = vpop.f32.mrb[59].mxu0  ;;  %v862_v52 = vpop.f32.mrb[59].mxu1 }
 0x1a5   :  { %v1473_v53 = vpack.c.bf16 %v900_v47, %v900_v47  ;;  %v1505_v54 = vpack.c.bf16 %v932_v48, %v932_v48  ;;  %v901_v55 = vmax.f32 %v733_v49, 0.0  ;;  %v933_v56 = vmax.f32 %v861_v50, 0.0 }
 0x1a7   :  { %1221 = vst.msk [vmem:[#allocation8 + $0x70] sm:$0xf] %vm1192_vm1, %v1473_v53  ;;  %1253 = vst.msk [vmem:[#allocation8 + $0xf0] sm:$0xf] %vm1192_vm1, %v1505_v54  ;;  %v1474_v57 = vpack.c.bf16 %v901_v55, %v901_v55  ;;  %v1506_v58 = vpack.c.bf16 %v933_v56, %v933_v56 }
 0x1a8   :  { %v737_v59 = vpop.f32.mrb[60].mxu0  ;;  %v865_v60 = vpop.f32.mrb[60].mxu1 }
 0x1a9   :  { %1222 = vst.msk [vmem:[#allocation8 + $0x74] sm:$0xf] %vm1192_vm1, %v1474_v57  ;;  %1254 = vst.msk [vmem:[#allocation8 + $0xf4] sm:$0xf] %vm1192_vm1, %v1506_v58  ;;  %v738_v61 = vadd.f32 %v1835_v10, %v737_v59  ;;  %v866_v62 = vadd.f32 %v1835_v10, %v865_v60  ;;  %v739_v63 = vpop.f32.mrb[61].mxu0  ;;  %v867_v0 = vpop.f32.mrb[61].mxu1 }
 0x1aa   :  { %v740_v1 = vpop.f32.mrb[62].mxu0  ;;  %v868_v2 = vpop.f32.mrb[62].mxu1 }
 0x1ab   :  { %v902_v3 = vmax.f32 %v738_v61, 0.0  ;;  %v934_v4 = vmax.f32 %v866_v62, 0.0  ;;  %v741_v5 = vadd.f32 %v1835_v10, %v740_v1  ;;  %v869_v6 = vadd.f32 %v1835_v10, %v868_v2  ;;  %v742_v7 = vpop.f32.mrb[63].mxu0  ;;  %v870_v8 = vpop.f32.mrb[63].mxu1 }
 0x1ad   :  { %v1475_v9 = vpack.c.bf16 %v902_v3, %v902_v3  ;;  %v1507_v11 = vpack.c.bf16 %v934_v4, %v934_v4  ;;  %v903_v12 = vmax.f32 %v741_v5, 0.0  ;;  %v935_v13 = vmax.f32 %v869_v6, 0.0 }
 0x1af   :  { %1223 = vst.msk [vmem:[#allocation8 + $0x78] sm:$0xf] %vm1192_vm1, %v1475_v9  ;;  %1255 = vst.msk [vmem:[#allocation8 + $0xf8] sm:$0xf] %vm1192_vm1, %v1507_v11  ;;  %v1476_v14 = vpack.c.bf16 %v903_v12, %v903_v12  ;;  %v1508_v15 = vpack.c.bf16 %v935_v13, %v935_v13 }
 0x1b1   :  { %1224 = vst.msk [vmem:[#allocation8 + $0x7c] sm:$0xf] %vm1192_vm1, %v1476_v14  ;;  %1256 = vst.msk [vmem:[#allocation8 + $0xfc] sm:$0xf] %vm1192_vm1, %v1508_v15 }
 0x1b2   :  { %1718 = shalt.err (!%p1715_p0)
}
 0x1b3   :  { %s1719_s30 = scalar_lea.hbm %s1983_s3, 4096 }
 0x1b4   :  { %p1720_p1 = scmp.ne.s32.totalorder %s1983_s3, %s1719_s30  ;;  %p1723_p2 = scmp.lt.u32.totalorder %s1719_s30, %s1983_s3 }
 0x1b6   :  { %p1725_p3 = pnand %p1723_p2, %p1720_p1 }
 0x1b8   :  { %1728 = shalt.err (!%p1725_p3)
}
 0x1b9   :  { %1268 = dma.vmem_to_hbm [thread:$0]  %s1263_s26, 4096, %s1983_s3, [#allocation4], %s1736_s22, %s1736_s22, %s1737_s23  }
 0x1ba   :  { %1733 = dma.done.wait [#allocation4], 4096  }
 0x1bb   :  { %1734 = vsyncadd [#allocation4], 4294963200 }
 0x1bc   :  { %1272 = vsyncpa [#allocation3], 1 }
 0x1bd   :  { %1273 = vsyncpa [#allocation6], 1 }
 0x1be   :  { %1274 = vsyncpa [#allocation4], 1 }

// kernel: vggnet_modified_forward.20
= control target key start
LH: loop header
LB: loop body
LE: loop exit
PB: predicated region body
PF: predicated region fallthrough
CT: control target
= control target key end

     0   :  { %8 = vsyncpa [#allocation3], 0  ;;  %s804_s0 = inlined_call_operand.hbm [shape: bf16[128,144], index: 0, kind: input, shape index: {}]   ;;  %s805_s1 = inlined_call_operand.hbm [shape: bf16[144,32], index: 1, kind: input, shape index: {}]   ;;  %s806_s2 = inlined_call_operand.hbm [shape: f32[1,32], index: 2, kind: input, shape index: {}]   ;;  %s807_s3 = inlined_call_operand.hbm [shape: bf16[128,32], index: 3, kind: output, shape index: {}]  }
   0x1   :  { %9 = vsyncpa [#allocation6], 0 }
   0x2   :  { %10 = vsyncpa [#allocation4], 0  ;;  %s679_s12 = smov [#allocation5]   ;;  %s585_s16 = scalar_lea.hbm %s805_s1, 1152 }
   0x3   :  { %s28_s13 = sshll.u32 %s679_s12, 4  ;;  %p586_p0 = scmp.ne.s32.totalorder %s805_s1, %s585_s16  ;;  %s29_s13 = int_to_ptr.vmem [resolvable:$true] %s28_s13 }
   0x4   :  { %p589_p1 = scmp.lt.u32.totalorder %s585_s16, %s805_s1 }
   0x6   :  { %p591_p2 = pnand %p589_p1, %p586_p0 }
   0x8   :  { %594 = shalt.err (!%p591_p2)
}
   0x9   :  { %s595_s21 = scalar_lea.vmem %s29_s13, 1152  ;;  %p600_p4 = scmp.lt.s32.totalorder %s29_s13, %s29_s13 }
   0xa   :  { %p596_p3 = scmp.ne.s32.totalorder %s29_s13, %s595_s21  ;;  %p601_p5 = scmp.lt.s32.totalorder %s595_s21, %s595_s21 }
   0xc   :  { %p602_p6 = por %p601_p5, %p600_p4 }
   0xe   :  { %p603_p7 = pnand %p602_p6, %p596_p3 }
  0x10   :  { %606 = shalt.err (!%p603_p7)
}
  0x11   :  { %s680_s22 = smov 64   ;;  %s681_s23 = smov 4  }
  0x12   :  { %34 = dma.hbm_to_vmem [thread:$0]  %s805_s1, 1152, %s29_s13, [#allocation6], %s680_s22, %s680_s22, %s681_s23  }
  0x13   :  { %s682_s26 = smov [#allocation2]   ;;  %s607_s30 = scalar_lea.hbm %s804_s0, 2048 }
  0x14   :  { %s16_s27 = sshll.u32 %s682_s26, 4  ;;  %p608_p8 = scmp.ne.s32.totalorder %s804_s0, %s607_s30  ;;  %s17_s27 = int_to_ptr.vmem [resolvable:$true] %s16_s27 }
  0x15   :  { %p611_p9 = scmp.lt.u32.totalorder %s607_s30, %s804_s0 }
  0x17   :  { %p613_p10 = pnand %p611_p9, %p608_p8 }
  0x19   :  { %616 = shalt.err (!%p613_p10)
}
  0x1a   :  { %s617_s8 = scalar_lea.vmem %s17_s27, 2048  ;;  %p622_p12 = scmp.lt.s32.totalorder %s17_s27, %s17_s27 }
  0x1b   :  { %p618_p11 = scmp.ne.s32.totalorder %s17_s27, %s617_s8  ;;  %p623_p13 = scmp.lt.s32.totalorder %s617_s8, %s617_s8 }
  0x1d   :  { %p624_p0 = por %p623_p13, %p622_p12 }
  0x1f   :  { %p625_p1 = pnand %p624_p0, %p618_p11 }
  0x21   :  { %628 = shalt.err (!%p625_p1)
}
  0x22   :  { %s683_s1 = smov 128   ;;  %s684_s9 = smov 8  }
  0x23   :  { %22 = dma.hbm_to_vmem [thread:$0]  %s804_s0, 2048, %s17_s27, [#allocation3], %s683_s1, %s683_s1, %s684_s9  }
  0x24   :  { %s685_s12 = smov [#allocation7]   ;;  %s629_s16 = scalar_lea.hbm %s806_s2, 16 }
  0x25   :  { %s41_s13 = sshll.u32 %s685_s12, 4  ;;  %p630_p2 = scmp.ne.s32.totalorder %s806_s2, %s629_s16  ;;  %s42_s13 = int_to_ptr.vmem [resolvable:$true] %s41_s13 }
  0x26   :  { %p633_p3 = scmp.lt.u32.totalorder %s629_s16, %s806_s2 }
  0x28   :  { %p635_p4 = pnand %p633_p3, %p630_p2 }
  0x2a   :  { %638 = shalt.err (!%p635_p4)
}
  0x2b   :  { %s639_s21 = scalar_lea.vmem %s42_s13, 16  ;;  %s643_s0 = scalar_lea.vmem %s42_s13, 32 }
  0x2c   :  { %p640_p5 = scmp.ne.s32.totalorder %s42_s13, %s639_s21  ;;  %p644_p6 = scmp.lt.s32.totalorder %s42_s13, %s42_s13 }
  0x2d   :  { %p645_p7 = scmp.lt.s32.totalorder %s643_s0, %s639_s21 }
  0x2f   :  { %p646_p8 = por %p645_p7, %p644_p6 }
  0x31   :  { %p647_p9 = pnand %p646_p8, %p640_p5 }
  0x33   :  { %650 = shalt.err (!%p647_p9)
}
  0x34   :  { %44 = dma.hbm_to_vmem [thread:$0]  %s806_s2, 16, %s42_s13, [#allocation6]  }
  0x35   :  { %673 = dma.done.wait [#allocation3], 2048  }
  0x36   :  { %674 = vsyncadd [#allocation3], 4294965248 }
  0x37   :  { %675 = dma.done.wait [#allocation6], 1168  }
  0x38   :  { %676 = vsyncadd [#allocation6], 4294966128  ;;  %v686_v0 = vmov 0   ;;  %v552_v1 = vld [vmem:[#allocation5] sm:$0xff]   ;;  %v553_v2 = vld [vmem:[#allocation5 + $0x8] sm:$0xff]   ;;  %vm222_vm0 = vcmask 130048  }
  0x39   :  { %247 = vmatprep.subr.bf16.mxu0 %v686_v0  ;;  %525 = vmatprep.subr.bf16.mxu1 %v686_v0  ;;  %v554_v3 = vld [vmem:[#allocation5 + $0x10] sm:$0xff]   ;;  %v555_v4 = vld [vmem:[#allocation5 + $0x18] sm:$0xff]   ;;  %v563_v5 = vld [vmem:[#allocation2 + $0x4] ss:$8 sps:$4 sm:$0xff]   ;;  %vm424_vm1 = vcmask 257024   ;;  %s687_s2 = smov [#allocation8]  }
  0x3a   :  { %248 = vmatpush1.bf16.msra.mxu0 %v552_v1  ;;  %534 = vmatpush1.bf16.msra.mxu1 %v552_v1  ;;  %v566_v6 = vld [vmem:[#allocation2 + $0x44] ss:$8 sps:$4 sm:$0xff]   ;;  %v558_v9 = vld [vmem:[#allocation5 + $0x30] sm:$0xff]   ;;  %v559_v10 = vld [vmem:[#allocation5 + $0x38] sm:$0xff]   ;;  %s446_s26 = sshll.u32 %s687_s2, 4  ;;  %s447_s26 = int_to_ptr.vmem [resolvable:$true] %s446_s26 }
  0x3b   :  { %249 = vmatprep.subr.bf16.mxu0 %v686_v0  ;;  %526 = vmatprep.subr.bf16.mxu1 %v686_v0  ;;  %v556_v7 = vld [vmem:[#allocation5 + $0x20] sm:$0xff]   ;;  %v557_v8 = vld [vmem:[#allocation5 + $0x28] sm:$0xff]   ;;  %v567_v14 = vld [vmem:[#allocation2 + $0x14] ss:$8 sps:$4 sm:$0xff]   ;;  %s651_s27 = scalar_lea.vmem %s447_s26, 1024  ;;  %p656_p11 = scmp.lt.s32.totalorder %s447_s26, %s447_s26 }
  0x3c   :  { %485 = vmatprep.mubr.msk.bf16.mxu0 %vm222_vm0, %v563_v5  ;;  %489 = vmatprep.mubr.msk.bf16.mxu1 %vm222_vm0, %v566_v6  ;;  %v560_v11 = vld [vmem:[#allocation5 + $0x40] sm:$0xff]   ;;  %v569_v15 = vld [vmem:[#allocation2 + $0x54] ss:$8 sps:$4 sm:$0xff]   ;;  %v571_v16 = vld [vmem:[#allocation2 + $0x10] ss:$8 sps:$4 sm:$0xff]   ;;  %p652_p10 = scmp.ne.s32.totalorder %s447_s26, %s651_s27  ;;  %p657_p12 = scmp.lt.s32.totalorder %s651_s27, %s651_s27 }
  0x3d   :  { %v561_v12 = vld [vmem:[#allocation2] ss:$8 sps:$4 sm:$0xff]   ;;  %v572_v17 = vld [vmem:[#allocation2 + $0x50] ss:$8 sps:$4 sm:$0xff]   ;;  %v573_v18 = vld [vmem:[#allocation2 + $0x24] ss:$8 sps:$4 sm:$0xff]  }
  0x3e   :  { %250 = vmatpush1.bf16.msra.mxu0 %v553_v2  ;;  %535 = vmatpush1.bf16.msra.mxu1 %v553_v2  ;;  %v564_v13 = vld [vmem:[#allocation2 + $0x40] ss:$8 sps:$4 sm:$0xff]   ;;  %v575_v19 = vld [vmem:[#allocation2 + $0x64] ss:$8 sps:$4 sm:$0xff]   ;;  %v579_v22 = vld [vmem:[#allocation2 + $0x34] ss:$8 sps:$4 sm:$0xff]   ;;  %p658_p13 = por %p657_p12, %p656_p11 }
  0x3f   :  { %251 = vmatprep.subr.bf16.mxu0 %v686_v0  ;;  %527 = vmatprep.subr.bf16.mxu1 %v686_v0  ;;  %v577_v20 = vld [vmem:[#allocation2 + $0x20] ss:$8 sps:$4 sm:$0xff]   ;;  %v581_v23 = vld [vmem:[#allocation2 + $0x74] ss:$8 sps:$4 sm:$0xff]   ;;  %v583_v24 = vld [vmem:[#allocation2 + $0x30] ss:$8 sps:$4 sm:$0xff]  }
  0x40   :  { %v578_v21 = vld [vmem:[#allocation2 + $0x60] ss:$8 sps:$4 sm:$0xff]   ;;  %v584_v25 = vld [vmem:[#allocation2 + $0x70] ss:$8 sps:$4 sm:$0xff]   ;;  %p659_p0 = pnand %p658_p13, %p652_p10 }
  0x41   :  { %v755_v26 = vld [vmem:[#allocation7] ss:$0 sm:$0xff] }
  0x42   :  { %252 = vmatpush1.bf16.msra.mxu0 %v554_v3  ;;  %536 = vmatpush1.bf16.msra.mxu1 %v554_v3 }
  0x43   :  { %253 = vmatprep.subr.bf16.mxu0 %v686_v0  ;;  %528 = vmatprep.subr.bf16.mxu1 %v686_v0 }
  0x46   :  { %254 = vmatpush1.bf16.msra.mxu0 %v555_v4  ;;  %537 = vmatpush1.bf16.msra.mxu1 %v555_v4 }
  0x47   :  { %255 = vmatprep.subr.bf16.mxu0 %v686_v0  ;;  %529 = vmatprep.subr.bf16.mxu1 %v686_v0 }
  0x4a   :  { %256 = vmatpush1.bf16.msra.mxu0 %v556_v7  ;;  %538 = vmatpush1.bf16.msra.mxu1 %v556_v7 }
  0x4b   :  { %257 = vmatprep.subr.bf16.mxu0 %v686_v0  ;;  %530 = vmatprep.subr.bf16.mxu1 %v686_v0 }
  0x4e   :  { %258 = vmatpush1.bf16.msra.mxu0 %v557_v8  ;;  %539 = vmatpush1.bf16.msra.mxu1 %v557_v8 }
  0x4f   :  { %259 = vmatprep.subr.bf16.mxu0 %v686_v0  ;;  %531 = vmatprep.subr.bf16.mxu1 %v686_v0 }
  0x52   :  { %260 = vmatpush1.bf16.msra.mxu0 %v558_v9  ;;  %540 = vmatpush1.bf16.msra.mxu1 %v558_v9 }
  0x53   :  { %261 = vmatprep.subr.bf16.mxu0 %v686_v0  ;;  %532 = vmatprep.subr.bf16.mxu1 %v686_v0 }
  0x56   :  { %262 = vmatpush1.bf16.msra.mxu0 %v559_v10  ;;  %541 = vmatpush1.bf16.msra.mxu1 %v559_v10 }
  0x57   :  { %263 = vmatprep.subr.bf16.mxu0 %v686_v0  ;;  %533 = vmatprep.subr.bf16.mxu1 %v686_v0 }
  0x5a   :  { %264 = vmatpush1.bf16.msra.mxu0 %v560_v11  ;;  %542 = vmatpush1.bf16.msra.mxu1 %v560_v11 }
  0x5d   :  { %280 = vmatmul.mubr.bf16.vlgmr.msra.gmra.mrb[0].mxu0 %v561_v12  ;;  %312 = vmatmul.mubr.bf16.vlgmr.msra.gmra.mrb[0].mxu1 %v564_v13 }
  0x5e   :  { %486 = vmatprep.mubr.msk.bf16.mxu0 %vm222_vm0, %v567_v14  ;;  %490 = vmatprep.mubr.msk.bf16.mxu1 %vm222_vm0, %v569_v15 }
  0x65   :  { %288 = vmatmul.mubr.bf16.gmra.mrb[4].mxu0 %v571_v16  ;;  %320 = vmatmul.mubr.bf16.gmra.mrb[4].mxu1 %v572_v17 }
  0x66   :  { %487 = vmatprep.mubr.msk.bf16.mxu0 %vm222_vm0, %v573_v18  ;;  %491 = vmatprep.mubr.msk.bf16.mxu1 %vm222_vm0, %v575_v19 }
  0x6d   :  { %296 = vmatmul.mubr.bf16.gmra.mrb[8].mxu0 %v577_v20  ;;  %328 = vmatmul.mubr.bf16.gmra.mrb[8].mxu1 %v578_v21 }
  0x6e   :  { %488 = vmatprep.mubr.msk.bf16.mxu0 %vm222_vm0, %v579_v22  ;;  %492 = vmatprep.mubr.msk.bf16.mxu1 %vm222_vm0, %v581_v23 }
  0x75   :  { %304 = vmatmul.mubr.bf16.gmra.mrb[12].mxu0 %v583_v24  ;;  %336 = vmatmul.mubr.bf16.gmra.mrb[12].mxu1 %v584_v25 }
 0x130   :  { %v281_v27 = vpop.f32.mrb[0].mxu0  ;;  %v313_v28 = vpop.f32.mrb[0].mxu1 }
 0x131   :  { %v282_v29 = vadd.f32 %v755_v26, %v281_v27  ;;  %v314_v30 = vadd.f32 %v755_v26, %v313_v28  ;;  %v283_v31 = vpop.f32.mrb[1].mxu0  ;;  %v315_v32 = vpop.f32.mrb[1].mxu1 }
 0x132   :  { %v284_v33 = vpop.f32.mrb[2].mxu0  ;;  %v316_v34 = vpop.f32.mrb[2].mxu1 }
 0x133   :  { %v344_v35 = vmax.f32 %v282_v29, 0.0  ;;  %v352_v36 = vmax.f32 %v314_v30, 0.0  ;;  %v285_v37 = vadd.f32 %v755_v26, %v284_v33  ;;  %v317_v38 = vadd.f32 %v755_v26, %v316_v34  ;;  %v286_v39 = vpop.f32.mrb[3].mxu0  ;;  %v318_v40 = vpop.f32.mrb[3].mxu1 }
 0x135   :  { %v509_v41 = vpack.c.bf16 %v344_v35, %v344_v35  ;;  %v517_v42 = vpack.c.bf16 %v352_v36, %v352_v36  ;;  %v345_v43 = vmax.f32 %v285_v37, 0.0  ;;  %v353_v44 = vmax.f32 %v317_v38, 0.0 }
 0x137   :  { %425 = vst.msk [vmem:[#allocation8] sm:$0xf] %vm424_vm1, %v509_v41  ;;  %433 = vst.msk [vmem:[#allocation8 + $0x20] sm:$0xf] %vm424_vm1, %v517_v42  ;;  %v510_v45 = vpack.c.bf16 %v345_v43, %v345_v43  ;;  %v518_v46 = vpack.c.bf16 %v353_v44, %v353_v44 }
 0x138   :  { %v289_v47 = vpop.f32.mrb[4].mxu0  ;;  %v321_v48 = vpop.f32.mrb[4].mxu1 }
 0x139   :  { %426 = vst.msk [vmem:[#allocation8 + $0x4] sm:$0xf] %vm424_vm1, %v510_v45  ;;  %434 = vst.msk [vmem:[#allocation8 + $0x24] sm:$0xf] %vm424_vm1, %v518_v46  ;;  %v290_v49 = vadd.f32 %v755_v26, %v289_v47  ;;  %v322_v50 = vadd.f32 %v755_v26, %v321_v48  ;;  %v291_v51 = vpop.f32.mrb[5].mxu0  ;;  %v323_v52 = vpop.f32.mrb[5].mxu1 }
 0x13a   :  { %v292_v53 = vpop.f32.mrb[6].mxu0  ;;  %v324_v54 = vpop.f32.mrb[6].mxu1 }
 0x13b   :  { %v346_v55 = vmax.f32 %v290_v49, 0.0  ;;  %v354_v56 = vmax.f32 %v322_v50, 0.0  ;;  %v293_v57 = vadd.f32 %v755_v26, %v292_v53  ;;  %v325_v58 = vadd.f32 %v755_v26, %v324_v54  ;;  %v294_v59 = vpop.f32.mrb[7].mxu0  ;;  %v326_v60 = vpop.f32.mrb[7].mxu1 }
 0x13d   :  { %v511_v61 = vpack.c.bf16 %v346_v55, %v346_v55  ;;  %v519_v62 = vpack.c.bf16 %v354_v56, %v354_v56  ;;  %v347_v63 = vmax.f32 %v293_v57, 0.0  ;;  %v355_v0 = vmax.f32 %v325_v58, 0.0 }
 0x13f   :  { %427 = vst.msk [vmem:[#allocation8 + $0x8] sm:$0xf] %vm424_vm1, %v511_v61  ;;  %435 = vst.msk [vmem:[#allocation8 + $0x28] sm:$0xf] %vm424_vm1, %v519_v62  ;;  %v512_v1 = vpack.c.bf16 %v347_v63, %v347_v63  ;;  %v520_v2 = vpack.c.bf16 %v355_v0, %v355_v0 }
 0x140   :  { %v297_v3 = vpop.f32.mrb[8].mxu0  ;;  %v329_v4 = vpop.f32.mrb[8].mxu1 }
 0x141   :  { %428 = vst.msk [vmem:[#allocation8 + $0xc] sm:$0xf] %vm424_vm1, %v512_v1  ;;  %436 = vst.msk [vmem:[#allocation8 + $0x2c] sm:$0xf] %vm424_vm1, %v520_v2  ;;  %v298_v5 = vadd.f32 %v755_v26, %v297_v3  ;;  %v330_v6 = vadd.f32 %v755_v26, %v329_v4  ;;  %v299_v7 = vpop.f32.mrb[9].mxu0  ;;  %v331_v8 = vpop.f32.mrb[9].mxu1 }
 0x142   :  { %v300_v9 = vpop.f32.mrb[10].mxu0  ;;  %v332_v10 = vpop.f32.mrb[10].mxu1 }
 0x143   :  { %v348_v11 = vmax.f32 %v298_v5, 0.0  ;;  %v356_v12 = vmax.f32 %v330_v6, 0.0  ;;  %v301_v13 = vadd.f32 %v755_v26, %v300_v9  ;;  %v333_v14 = vadd.f32 %v755_v26, %v332_v10  ;;  %v302_v15 = vpop.f32.mrb[11].mxu0  ;;  %v334_v16 = vpop.f32.mrb[11].mxu1 }
 0x145   :  { %v513_v17 = vpack.c.bf16 %v348_v11, %v348_v11  ;;  %v521_v18 = vpack.c.bf16 %v356_v12, %v356_v12  ;;  %v349_v19 = vmax.f32 %v301_v13, 0.0  ;;  %v357_v20 = vmax.f32 %v333_v14, 0.0 }
 0x147   :  { %429 = vst.msk [vmem:[#allocation8 + $0x10] sm:$0xf] %vm424_vm1, %v513_v17  ;;  %437 = vst.msk [vmem:[#allocation8 + $0x30] sm:$0xf] %vm424_vm1, %v521_v18  ;;  %v514_v21 = vpack.c.bf16 %v349_v19, %v349_v19  ;;  %v522_v22 = vpack.c.bf16 %v357_v20, %v357_v20 }
 0x148   :  { %v305_v23 = vpop.f32.mrb[12].mxu0  ;;  %v337_v24 = vpop.f32.mrb[12].mxu1 }
 0x149   :  { %430 = vst.msk [vmem:[#allocation8 + $0x14] sm:$0xf] %vm424_vm1, %v514_v21  ;;  %438 = vst.msk [vmem:[#allocation8 + $0x34] sm:$0xf] %vm424_vm1, %v522_v22  ;;  %v306_v25 = vadd.f32 %v755_v26, %v305_v23  ;;  %v338_v27 = vadd.f32 %v755_v26, %v337_v24  ;;  %v307_v28 = vpop.f32.mrb[13].mxu0  ;;  %v339_v29 = vpop.f32.mrb[13].mxu1 }
 0x14a   :  { %v308_v30 = vpop.f32.mrb[14].mxu0  ;;  %v340_v31 = vpop.f32.mrb[14].mxu1 }
 0x14b   :  { %v350_v32 = vmax.f32 %v306_v25, 0.0  ;;  %v358_v33 = vmax.f32 %v338_v27, 0.0  ;;  %v309_v34 = vadd.f32 %v755_v26, %v308_v30  ;;  %v341_v35 = vadd.f32 %v755_v26, %v340_v31  ;;  %v310_v36 = vpop.f32.mrb[15].mxu0  ;;  %v342_v37 = vpop.f32.mrb[15].mxu1 }
 0x14d   :  { %v515_v38 = vpack.c.bf16 %v350_v32, %v350_v32  ;;  %v523_v39 = vpack.c.bf16 %v358_v33, %v358_v33  ;;  %v351_v40 = vmax.f32 %v309_v34, 0.0  ;;  %v359_v41 = vmax.f32 %v341_v35, 0.0 }
 0x14f   :  { %431 = vst.msk [vmem:[#allocation8 + $0x18] sm:$0xf] %vm424_vm1, %v515_v38  ;;  %439 = vst.msk [vmem:[#allocation8 + $0x38] sm:$0xf] %vm424_vm1, %v523_v39  ;;  %v516_v42 = vpack.c.bf16 %v351_v40, %v351_v40  ;;  %v524_v43 = vpack.c.bf16 %v359_v41, %v359_v41 }
 0x151   :  { %432 = vst.msk [vmem:[#allocation8 + $0x1c] sm:$0xf] %vm424_vm1, %v516_v42  ;;  %440 = vst.msk [vmem:[#allocation8 + $0x3c] sm:$0xf] %vm424_vm1, %v524_v43 }
 0x152   :  { %662 = shalt.err (!%p659_p0)
}
 0x153   :  { %s663_s30 = scalar_lea.hbm %s807_s3, 1024 }
 0x154   :  { %p664_p1 = scmp.ne.s32.totalorder %s807_s3, %s663_s30  ;;  %p667_p2 = scmp.lt.u32.totalorder %s663_s30, %s807_s3 }
 0x156   :  { %p669_p3 = pnand %p667_p2, %p664_p1 }
 0x158   :  { %672 = shalt.err (!%p669_p3)
}
 0x159   :  { %452 = dma.vmem_to_hbm [thread:$0]  %s447_s26, 1024, %s807_s3, [#allocation4], %s680_s22, %s680_s22, %s681_s23  }
 0x15a   :  { %677 = dma.done.wait [#allocation4], 1024  }
 0x15b   :  { %678 = vsyncadd [#allocation4], 4294966272 }
 0x15c   :  { %456 = vsyncpa [#allocation3], 1 }
 0x15d   :  { %457 = vsyncpa [#allocation6], 1 }
 0x15e   :  { %458 = vsyncpa [#allocation4], 1 }

// kernel: vggnet_modified_forward.21
= control target key start
LH: loop header
LB: loop body
LE: loop exit
PB: predicated region body
PF: predicated region fallthrough
CT: control target
= control target key end

     0   :  { %8 = vsyncpa [#allocation3], 0  ;;  %s1173_s0 = inlined_call_operand.hbm [shape: bf16[128,288], index: 0, kind: input, shape index: {}]   ;;  %s1174_s1 = inlined_call_operand.hbm [shape: bf16[288,32], index: 1, kind: input, shape index: {}]   ;;  %s1175_s2 = inlined_call_operand.hbm [shape: f32[1,32], index: 2, kind: input, shape index: {}]   ;;  %s1176_s3 = inlined_call_operand.hbm [shape: bf16[128,32], index: 3, kind: output, shape index: {}]  }
   0x1   :  { %9 = vsyncpa [#allocation6], 0 }
   0x2   :  { %10 = vsyncpa [#allocation4], 0  ;;  %s1037_s12 = smov [#allocation5]   ;;  %s943_s16 = scalar_lea.hbm %s1174_s1, 2304 }
   0x3   :  { %s28_s13 = sshll.u32 %s1037_s12, 4  ;;  %p944_p0 = scmp.ne.s32.totalorder %s1174_s1, %s943_s16  ;;  %s29_s13 = int_to_ptr.vmem [resolvable:$true] %s28_s13 }
   0x4   :  { %p947_p1 = scmp.lt.u32.totalorder %s943_s16, %s1174_s1 }
   0x6   :  { %p949_p2 = pnand %p947_p1, %p944_p0 }
   0x8   :  { %952 = shalt.err (!%p949_p2)
}
   0x9   :  { %s953_s21 = scalar_lea.vmem %s29_s13, 2304  ;;  %p958_p4 = scmp.lt.s32.totalorder %s29_s13, %s29_s13 }
   0xa   :  { %p954_p3 = scmp.ne.s32.totalorder %s29_s13, %s953_s21  ;;  %p959_p5 = scmp.lt.s32.totalorder %s953_s21, %s953_s21 }
   0xc   :  { %p960_p6 = por %p959_p5, %p958_p4 }
   0xe   :  { %p961_p7 = pnand %p960_p6, %p954_p3 }
  0x10   :  { %964 = shalt.err (!%p961_p7)
}
  0x11   :  { %s1038_s22 = smov 64   ;;  %s1039_s23 = smov 4  }
  0x12   :  { %34 = dma.hbm_to_vmem [thread:$0]  %s1174_s1, 2304, %s29_s13, [#allocation6], %s1038_s22, %s1038_s22, %s1039_s23  }
  0x13   :  { %s1040_s26 = smov [#allocation2]   ;;  %s965_s30 = scalar_lea.hbm %s1173_s0, 3072 }
  0x14   :  { %s16_s27 = sshll.u32 %s1040_s26, 4  ;;  %p966_p8 = scmp.ne.s32.totalorder %s1173_s0, %s965_s30  ;;  %s17_s27 = int_to_ptr.vmem [resolvable:$true] %s16_s27 }
  0x15   :  { %p969_p9 = scmp.lt.u32.totalorder %s965_s30, %s1173_s0 }
  0x17   :  { %p971_p10 = pnand %p969_p9, %p966_p8 }
  0x19   :  { %974 = shalt.err (!%p971_p10)
}
  0x1a   :  { %s975_s8 = scalar_lea.vmem %s17_s27, 3072  ;;  %p980_p12 = scmp.lt.s32.totalorder %s17_s27, %s17_s27 }
  0x1b   :  { %p976_p11 = scmp.ne.s32.totalorder %s17_s27, %s975_s8  ;;  %p981_p13 = scmp.lt.s32.totalorder %s975_s8, %s975_s8 }
  0x1d   :  { %p982_p0 = por %p981_p13, %p980_p12 }
  0x1f   :  { %p983_p1 = pnand %p982_p0, %p976_p11 }
  0x21   :  { %986 = shalt.err (!%p983_p1)
}
  0x22   :  { %s1041_s1 = smov 192   ;;  %s1042_s9 = smov 12  }
  0x23   :  { %22 = dma.hbm_to_vmem [thread:$0]  %s1173_s0, 3072, %s17_s27, [#allocation3], %s1041_s1, %s1041_s1, %s1042_s9  }
  0x24   :  { %s1043_s12 = smov [#allocation7]   ;;  %s987_s16 = scalar_lea.hbm %s1175_s2, 16 }
  0x25   :  { %s41_s13 = sshll.u32 %s1043_s12, 4  ;;  %p988_p2 = scmp.ne.s32.totalorder %s1175_s2, %s987_s16  ;;  %s42_s13 = int_to_ptr.vmem [resolvable:$true] %s41_s13 }
  0x26   :  { %p991_p3 = scmp.lt.u32.totalorder %s987_s16, %s1175_s2 }
  0x28   :  { %p993_p4 = pnand %p991_p3, %p988_p2 }
  0x2a   :  { %996 = shalt.err (!%p993_p4)
}
  0x2b   :  { %s997_s21 = scalar_lea.vmem %s42_s13, 16  ;;  %s1001_s0 = scalar_lea.vmem %s42_s13, 32 }
  0x2c   :  { %p998_p5 = scmp.ne.s32.totalorder %s42_s13, %s997_s21  ;;  %p1002_p6 = scmp.lt.s32.totalorder %s42_s13, %s42_s13 }
  0x2d   :  { %p1003_p7 = scmp.lt.s32.totalorder %s1001_s0, %s997_s21 }
  0x2f   :  { %p1004_p8 = por %p1003_p7, %p1002_p6 }
  0x31   :  { %p1005_p9 = pnand %p1004_p8, %p998_p5 }
  0x33   :  { %1008 = shalt.err (!%p1005_p9)
}
  0x34   :  { %44 = dma.hbm_to_vmem [thread:$0]  %s1175_s2, 16, %s42_s13, [#allocation6]  }
  0x35   :  { %1031 = dma.done.wait [#allocation3], 3072  }
  0x36   :  { %1032 = vsyncadd [#allocation3], 4294964224 }
  0x37   :  { %1033 = dma.done.wait [#allocation6], 2320  }
  0x38   :  { %1034 = vsyncadd [#allocation6], 4294964976  ;;  %v893_v0 = vld [vmem:[#allocation5 + $0x40] sm:$0xff]   ;;  %v895_v2 = vld [vmem:[#allocation5 + $0x48] sm:$0xff]   ;;  %vm358_vm0 = vcmask 261120   ;;  %vm657_vm1 = vcmask 257024  }
  0x39   :  { %v894_v1 = vld [vmem:[#allocation5] sm:$0xff]   ;;  %775 = vmatprep.subr.bf16.mxu0 %v893_v0  ;;  %869 = vmatprep.subr.bf16.mxu1 %v893_v0  ;;  %v896_v3 = vld [vmem:[#allocation5 + $0x8] sm:$0xff]   ;;  %v897_v4 = vld [vmem:[#allocation5 + $0x50] sm:$0xff]   ;;  %s1044_s2 = smov [#allocation8]  }
  0x3a   :  { %776 = vmatpush3.bf16.msra.mxu0 %v894_v1  ;;  %877 = vmatpush3.bf16.msra.mxu1 %v894_v1  ;;  %v898_v5 = vld [vmem:[#allocation5 + $0x10] sm:$0xff]   ;;  %v899_v6 = vld [vmem:[#allocation5 + $0x58] sm:$0xff]   ;;  %v901_v8 = vld [vmem:[#allocation5 + $0x60] sm:$0xff]   ;;  %s679_s26 = sshll.u32 %s1044_s2, 4  ;;  %s680_s26 = int_to_ptr.vmem [resolvable:$true] %s679_s26 }
  0x3b   :  { %777 = vmatprep.subr.bf16.mxu0 %v895_v2  ;;  %870 = vmatprep.subr.bf16.mxu1 %v895_v2  ;;  %v900_v7 = vld [vmem:[#allocation5 + $0x18] sm:$0xff]   ;;  %v902_v9 = vld [vmem:[#allocation5 + $0x20] sm:$0xff]   ;;  %v903_v10 = vld [vmem:[#allocation5 + $0x68] sm:$0xff]   ;;  %s1009_s27 = scalar_lea.vmem %s680_s26, 1024  ;;  %p1014_p11 = scmp.lt.s32.totalorder %s680_s26, %s680_s26 }
  0x3c   :  { %v911_v11 = vld [vmem:[#allocation2 + $0x4] ss:$12 sps:$4 sm:$0xff]   ;;  %v914_v12 = vld [vmem:[#allocation2 + $0x94] ss:$12 sps:$4 sm:$0xff]   ;;  %v904_v13 = vld [vmem:[#allocation5 + $0x28] sm:$0xff]   ;;  %p1010_p10 = scmp.ne.s32.totalorder %s680_s26, %s1009_s27  ;;  %p1015_p12 = scmp.lt.s32.totalorder %s1009_s27, %s1009_s27 }
  0x3d   :  { %v905_v14 = vld [vmem:[#allocation5 + $0x70] sm:$0xff]   ;;  %415 = vmatprep.mubr.bf16.mxu0 %v911_v11  ;;  %463 = vmatprep.mubr.bf16.mxu1 %v914_v12  ;;  %v907_v16 = vld [vmem:[#allocation5 + $0x78] sm:$0xff]   ;;  %v909_v18 = vld [vmem:[#allocation2] ss:$12 sps:$4 sm:$0xff]  }
  0x3e   :  { %778 = vmatpush3.bf16.msra.mxu0 %v896_v3  ;;  %878 = vmatpush3.bf16.msra.mxu1 %v896_v3  ;;  %v906_v15 = vld [vmem:[#allocation5 + $0x30] sm:$0xff]   ;;  %v908_v17 = vld [vmem:[#allocation5 + $0x38] sm:$0xff]   ;;  %v915_v19 = vld [vmem:[#allocation5 + $0x80] sm:$0xff]   ;;  %p1016_p13 = por %p1015_p12, %p1014_p11 }
  0x3f   :  { %779 = vmatprep.subr.bf16.mxu0 %v897_v4  ;;  %871 = vmatprep.subr.bf16.mxu1 %v897_v4  ;;  %v912_v20 = vld [vmem:[#allocation2 + $0x90] ss:$12 sps:$4 sm:$0xff]   ;;  %v918_v22 = vld [vmem:[#allocation2 + $0xac] ss:$12 sps:$4 sm:$0xff]   ;;  %v921_v25 = vld [vmem:[#allocation2 + $0xa8] ss:$12 sps:$4 sm:$0xff]  }
  0x40   :  { %v916_v21 = vld [vmem:[#allocation2 + $0x1c] ss:$12 sps:$4 sm:$0xff]   ;;  %v920_v24 = vld [vmem:[#allocation2 + $0x18] ss:$12 sps:$4 sm:$0xff]   ;;  %v923_v26 = vld [vmem:[#allocation2 + $0x34] ss:$12 sps:$4 sm:$0xff]   ;;  %p1017_p0 = pnand %p1016_p13, %p1010_p10 }
  0x41   :  { %v922_v23 = vld [vmem:[#allocation5 + $0x88] sm:$0xff]   ;;  %v926_v28 = vld [vmem:[#allocation2 + $0x30] ss:$12 sps:$4 sm:$0xff]   ;;  %v930_v31 = vld [vmem:[#allocation2 + $0x38] ss:$12 sps:$4 sm:$0xff]  }
  0x42   :  { %780 = vmatpush3.bf16.msra.mxu0 %v898_v5  ;;  %879 = vmatpush3.bf16.msra.mxu1 %v898_v5  ;;  %v925_v27 = vld [vmem:[#allocation2 + $0x8] ss:$12 sps:$4 sm:$0xff]   ;;  %v927_v29 = vld [vmem:[#allocation2 + $0x20] ss:$12 sps:$4 sm:$0xff]   ;;  %v932_v33 = vld [vmem:[#allocation2 + $0x50] ss:$12 sps:$4 sm:$0xff]  }
  0x43   :  { %781 = vmatprep.subr.bf16.mxu0 %v899_v6  ;;  %872 = vmatprep.subr.bf16.mxu1 %v899_v6  ;;  %v928_v30 = vld [vmem:[#allocation2 + $0x4c] ss:$12 sps:$4 sm:$0xff]   ;;  %v931_v32 = vld [vmem:[#allocation2 + $0x48] ss:$12 sps:$4 sm:$0xff]   ;;  %v933_v34 = vld [vmem:[#allocation2 + $0x64] ss:$12 sps:$4 sm:$0xff]  }
  0x44   :  { %v935_v35 = vld [vmem:[#allocation2 + $0x68] ss:$12 sps:$4 sm:$0xff]   ;;  %v936_v36 = vld [vmem:[#allocation2 + $0x60] ss:$12 sps:$4 sm:$0xff]   ;;  %v940_v39 = vld [vmem:[#allocation2 + $0x98] ss:$12 sps:$4 sm:$0xff]  }
  0x45   :  { %v937_v37 = vld [vmem:[#allocation2 + $0x80] ss:$12 sps:$4 sm:$0xff]   ;;  %v938_v38 = vld [vmem:[#allocation2 + $0x7c] ss:$12 sps:$4 sm:$0xff]   ;;  %v941_v40 = vld [vmem:[#allocation2 + $0x78] ss:$12 sps:$4 sm:$0xff]  }
  0x46   :  { %782 = vmatpush3.bf16.msra.mxu0 %v900_v7  ;;  %880 = vmatpush3.bf16.msra.mxu1 %v900_v7  ;;  %v942_v41 = vld [vmem:[#allocation2 + $0xb0] ss:$12 sps:$4 sm:$0xff]  }
  0x47   :  { %783 = vmatprep.subr.bf16.mxu0 %v901_v8  ;;  %873 = vmatprep.subr.bf16.mxu1 %v901_v8  ;;  %v1120_v2 = vld [vmem:[#allocation7] ss:$0 sm:$0xff] }
  0x4a   :  { %784 = vmatpush3.bf16.msra.mxu0 %v902_v9  ;;  %881 = vmatpush3.bf16.msra.mxu1 %v902_v9 }
  0x4b   :  { %785 = vmatprep.subr.bf16.mxu0 %v903_v10  ;;  %874 = vmatprep.subr.bf16.mxu1 %v903_v10 }
  0x4e   :  { %786 = vmatpush3.bf16.msra.mxu0 %v904_v13  ;;  %882 = vmatpush3.bf16.msra.mxu1 %v904_v13 }
  0x4f   :  { %787 = vmatprep.subr.bf16.mxu0 %v905_v14  ;;  %875 = vmatprep.subr.bf16.mxu1 %v905_v14 }
  0x52   :  { %788 = vmatpush3.bf16.msra.mxu0 %v906_v15  ;;  %883 = vmatpush3.bf16.msra.mxu1 %v906_v15 }
  0x53   :  { %789 = vmatprep.subr.bf16.mxu0 %v907_v16  ;;  %876 = vmatprep.subr.bf16.mxu1 %v907_v16 }
  0x56   :  { %790 = vmatpush3.bf16.msra.mxu0 %v908_v17  ;;  %884 = vmatpush3.bf16.msra.mxu1 %v908_v17 }
  0x57   :  { %849 = vmatprep.subr.bf16.mxu1 %v915_v19 }
  0x59   :  { %416 = vmatmul.mubr.bf16.vlgmr.msra.gmra.mrb[0].mxu0 %v909_v18  ;;  %464 = vmatmul.mubr.bf16.vlgmr.msra.gmra.mrb[0].mxu1 %v912_v20 }
  0x5a   :  { %850 = vmatpush3.bf16.msra.mxu1 %v915_v19  ;;  %423 = vmatprep.mubr.bf16.mxu0 %v916_v21 }
  0x5b   :  { %471 = vmatprep.mubr.bf16.mxu1 %v918_v22  ;;  %851 = vmatprep.subr.bf16.mxu1 %v922_v23 }
  0x5e   :  { %852 = vmatpush3.bf16.msra.mxu1 %v922_v23 }
  0x61   :  { %424 = vmatmul.mubr.bf16.gmra.mrb[4].mxu0 %v920_v24  ;;  %472 = vmatmul.mubr.bf16.gmra.mrb[4].mxu1 %v921_v25 }
  0x62   :  { %431 = vmatprep.mubr.bf16.mxu0 %v923_v26  ;;  %853 = vmatprep.mubr.msk.bf16.mxu1 %vm358_vm0, %v925_v27 }
  0x69   :  { %432 = vmatmul.mubr.bf16.gmra.mrb[8].mxu0 %v926_v28  ;;  %854 = vmatmul.mubr.msk.bf16.vlgmr.msra.gmra.mrb[8].mxu1 %vm358_vm0, %v927_v29 }
  0x6a   :  { %439 = vmatprep.mubr.bf16.mxu0 %v928_v30  ;;  %857 = vmatprep.mubr.msk.bf16.mxu1 %vm358_vm0, %v930_v31 }
  0x71   :  { %440 = vmatmul.mubr.bf16.gmra.mrb[12].mxu0 %v931_v32  ;;  %858 = vmatmul.mubr.msk.bf16.gmra.mrb[12].mxu1 %vm358_vm0, %v932_v33 }
  0x72   :  { %447 = vmatprep.mubr.bf16.mxu0 %v933_v34  ;;  %861 = vmatprep.mubr.msk.bf16.mxu1 %vm358_vm0, %v935_v35 }
  0x79   :  { %448 = vmatmul.mubr.bf16.gmra.mrb[16].mxu0 %v936_v36  ;;  %862 = vmatmul.mubr.msk.bf16.gmra.mrb[16].mxu1 %vm358_vm0, %v937_v37 }
  0x7a   :  { %455 = vmatprep.mubr.bf16.mxu0 %v938_v38  ;;  %865 = vmatprep.mubr.msk.bf16.mxu1 %vm358_vm0, %v940_v39 }
  0x81   :  { %456 = vmatmul.mubr.bf16.gmra.mrb[20].mxu0 %v941_v40  ;;  %866 = vmatmul.mubr.msk.bf16.gmra.mrb[20].mxu1 %vm358_vm0, %v942_v41 }
 0x12c   :  { %v791_v42 = vpop.f32.mrb[0].mxu0  ;;  %v827_v43 = vpop.f32.mrb[0].mxu1 }
 0x12d   :  { %v792_v44 = vpop.f32.mrb[1].mxu0  ;;  %v828_v45 = vpop.f32.mrb[1].mxu1 }
 0x12e   :  { %v793_v46 = vadd.f32 %v792_v44, %v791_v42  ;;  %v794_v47 = vpop.f32.mrb[2].mxu0  ;;  %v1112_v48 = vadd.f32 %v828_v45, %v827_v43  ;;  %v830_v49 = vpop.f32.mrb[2].mxu1 }
 0x12f   :  { %v795_v50 = vpop.f32.mrb[3].mxu0  ;;  %v831_v51 = vpop.f32.mrb[3].mxu1 }
 0x130   :  { %v796_v52 = vadd.f32 %v795_v50, %v794_v47  ;;  %v1114_v53 = vadd.f32 %v831_v51, %v830_v49  ;;  %v418_v6 = vadd.f32 %v793_v46, %v1120_v2 }
 0x132   :  { %v421_v15 = vadd.f32 %v796_v52, %v1120_v2 }
 0x134   :  { %v797_v54 = vpop.f32.mrb[4].mxu0  ;;  %v833_v55 = vpop.f32.mrb[4].mxu1 }
 0x135   :  { %v798_v56 = vpop.f32.mrb[5].mxu0  ;;  %v834_v57 = vpop.f32.mrb[5].mxu1 }
 0x136   :  { %v799_v58 = vadd.f32 %v798_v56, %v797_v54  ;;  %v800_v59 = vpop.f32.mrb[6].mxu0  ;;  %v1116_v60 = vadd.f32 %v834_v57, %v833_v55  ;;  %v836_v61 = vpop.f32.mrb[6].mxu1 }
 0x137   :  { %v801_v62 = vpop.f32.mrb[7].mxu0  ;;  %v837_v63 = vpop.f32.mrb[7].mxu1 }
 0x138   :  { %v802_v0 = vadd.f32 %v801_v62, %v800_v59  ;;  %v1118_v1 = vadd.f32 %v837_v63, %v836_v61  ;;  %v426_v3 = vadd.f32 %v799_v58, %v1120_v2 }
 0x13a   :  { %v429_v10 = vadd.f32 %v802_v0, %v1120_v2 }
 0x13c   :  { %v803_v4 = vpop.f32.mrb[8].mxu0  ;;  %v855_v5 = vpop.f32.mrb[8].mxu1 }
 0x13d   :  { %v523_v7 = vadd.f32 %v855_v5, %v426_v3  ;;  %v804_v8 = vpop.f32.mrb[9].mxu0  ;;  %v514_v9 = vpop.f32.mrb[9].mxu1 }
 0x13e   :  { %v805_v11 = vadd.f32 %v804_v8, %v803_v4  ;;  %v515_v12 = vadd.f32 %v514_v9, %v418_v6  ;;  %v806_v13 = vpop.f32.mrb[10].mxu0  ;;  %v856_v14 = vpop.f32.mrb[10].mxu1  ;;  %v474_v9 = vadd.f32 %v1116_v60, %v1120_v2 }
 0x13f   :  { %v579_v16 = vmax.f32 %v523_v7, 0.0  ;;  %v526_v17 = vadd.f32 %v856_v14, %v429_v10  ;;  %v807_v18 = vpop.f32.mrb[11].mxu0  ;;  %v517_v19 = vpop.f32.mrb[11].mxu1  ;;  %v466_v14 = vadd.f32 %v1112_v48, %v1120_v2 }
 0x140   :  { %v577_v20 = vmax.f32 %v515_v12, 0.0  ;;  %v808_v21 = vadd.f32 %v807_v18, %v806_v13  ;;  %v518_v22 = vadd.f32 %v517_v19, %v421_v15  ;;  %v434_v31 = vadd.f32 %v805_v11, %v1120_v2 }
 0x141   :  { %v761_v23 = vpack.c.bf16 %v579_v16, %v579_v16  ;;  %v580_v24 = vmax.f32 %v526_v17, 0.0  ;;  %v477_v18 = vadd.f32 %v1118_v1, %v1120_v2 }
 0x142   :  { %v759_v25 = vpack.c.bf16 %v577_v20, %v577_v20  ;;  %v578_v26 = vmax.f32 %v518_v22, 0.0  ;;  %v437_v38 = vadd.f32 %v808_v21, %v1120_v2 }
 0x143   :  { %660 = vst.msk [vmem:[#allocation8 + $0x8] sm:$0xf] %vm657_vm1, %v761_v23  ;;  %v762_v27 = vpack.c.bf16 %v580_v24, %v580_v24 }
 0x144   :  { %658 = vst.msk [vmem:[#allocation8] sm:$0xf] %vm657_vm1, %v759_v25  ;;  %v760_v28 = vpack.c.bf16 %v578_v26, %v578_v26  ;;  %v809_v29 = vpop.f32.mrb[12].mxu0  ;;  %v859_v30 = vpop.f32.mrb[12].mxu1 }
 0x145   :  { %661 = vst.msk [vmem:[#allocation8 + $0xc] sm:$0xf] %vm657_vm1, %v762_v27  ;;  %v810_v32 = vpop.f32.mrb[13].mxu0  ;;  %v530_v33 = vpop.f32.mrb[13].mxu1  ;;  %v469_v27 = vadd.f32 %v1114_v53, %v1120_v2 }
 0x146   :  { %659 = vst.msk [vmem:[#allocation8 + $0x4] sm:$0xf] %vm657_vm1, %v760_v28  ;;  %v811_v34 = vadd.f32 %v810_v32, %v809_v29  ;;  %v531_v35 = vadd.f32 %v530_v33, %v434_v31  ;;  %v812_v36 = vpop.f32.mrb[14].mxu0  ;;  %v860_v37 = vpop.f32.mrb[14].mxu1 }
 0x147   :  { %v813_v39 = vpop.f32.mrb[15].mxu0  ;;  %v533_v40 = vpop.f32.mrb[15].mxu1 }
 0x148   :  { %v442_v41 = vadd.f32 %v811_v34, %v1120_v2  ;;  %v581_v42 = vmax.f32 %v531_v35, 0.0  ;;  %v814_v43 = vadd.f32 %v813_v39, %v812_v36  ;;  %v534_v44 = vadd.f32 %v533_v40, %v437_v38 }
 0x14a   :  { %v539_v45 = vadd.f32 %v859_v30, %v442_v41  ;;  %v763_v46 = vpack.c.bf16 %v581_v42, %v581_v42  ;;  %v445_v47 = vadd.f32 %v814_v43, %v1120_v2  ;;  %v582_v49 = vmax.f32 %v534_v44, 0.0 }
 0x14c   :  { %v583_v50 = vmax.f32 %v539_v45, 0.0  ;;  %662 = vst.msk [vmem:[#allocation8 + $0x10] sm:$0xf] %vm657_vm1, %v763_v46  ;;  %v542_v51 = vadd.f32 %v860_v37, %v445_v47  ;;  %v764_v52 = vpack.c.bf16 %v582_v49, %v582_v49  ;;  %v815_v54 = vpop.f32.mrb[16].mxu0  ;;  %v863_v55 = vpop.f32.mrb[16].mxu1 }
 0x14d   :  { %v816_v56 = vpop.f32.mrb[17].mxu0  ;;  %v546_v57 = vpop.f32.mrb[17].mxu1 }
 0x14e   :  { %v765_v58 = vpack.c.bf16 %v583_v50, %v583_v50  ;;  %v584_v59 = vmax.f32 %v542_v51, 0.0  ;;  %663 = vst.msk [vmem:[#allocation8 + $0x14] sm:$0xf] %vm657_vm1, %v764_v52  ;;  %v817_v61 = vadd.f32 %v816_v56, %v815_v54  ;;  %v818_v62 = vpop.f32.mrb[18].mxu0  ;;  %v864_v63 = vpop.f32.mrb[18].mxu1 }
 0x14f   :  { %v819_v0 = vpop.f32.mrb[19].mxu0  ;;  %v549_v3 = vpop.f32.mrb[19].mxu1 }
 0x150   :  { %664 = vst.msk [vmem:[#allocation8 + $0x18] sm:$0xf] %vm657_vm1, %v765_v58  ;;  %v766_v4 = vpack.c.bf16 %v584_v59, %v584_v59  ;;  %v450_v5 = vadd.f32 %v817_v61, %v1120_v2  ;;  %v820_v6 = vadd.f32 %v819_v0, %v818_v62 }
 0x152   :  { %665 = vst.msk [vmem:[#allocation8 + $0x1c] sm:$0xf] %vm657_vm1, %v766_v4  ;;  %v547_v7 = vadd.f32 %v546_v57, %v450_v5  ;;  %v453_v8 = vadd.f32 %v820_v6, %v1120_v2 }
 0x154   :  { %v585_v10 = vmax.f32 %v547_v7, 0.0  ;;  %v550_v11 = vadd.f32 %v549_v3, %v453_v8  ;;  %v821_v12 = vpop.f32.mrb[20].mxu0  ;;  %v867_v13 = vpop.f32.mrb[20].mxu1 }
 0x155   :  { %v571_v15 = vadd.f32 %v867_v13, %v474_v9  ;;  %v822_v16 = vpop.f32.mrb[21].mxu0  ;;  %v562_v17 = vpop.f32.mrb[21].mxu1 }
 0x156   :  { %v767_v19 = vpack.c.bf16 %v585_v10, %v585_v10  ;;  %v586_v20 = vmax.f32 %v550_v11, 0.0  ;;  %v823_v21 = vadd.f32 %v822_v16, %v821_v12  ;;  %v563_v22 = vadd.f32 %v562_v17, %v466_v14  ;;  %v824_v23 = vpop.f32.mrb[22].mxu0  ;;  %v868_v24 = vpop.f32.mrb[22].mxu1 }
 0x157   :  { %v591_v60 = vmax.f32 %v571_v15, 0.0  ;;  %v574_v25 = vadd.f32 %v868_v24, %v477_v18  ;;  %v825_v26 = vpop.f32.mrb[23].mxu0  ;;  %v565_v28 = vpop.f32.mrb[23].mxu1 }
 0x158   :  { %666 = vst.msk [vmem:[#allocation8 + $0x20] sm:$0xf] %vm657_vm1, %v767_v19  ;;  %v768_v48 = vpack.c.bf16 %v586_v20, %v586_v20  ;;  %v458_v29 = vadd.f32 %v823_v21, %v1120_v2  ;;  %v589_v30 = vmax.f32 %v563_v22, 0.0  ;;  %v826_v1 = vadd.f32 %v825_v26, %v824_v23 }
 0x159   :  { %v773_v31 = vpack.c.bf16 %v591_v60, %v591_v60  ;;  %v592_v32 = vmax.f32 %v574_v25, 0.0  ;;  %v566_v33 = vadd.f32 %v565_v28, %v469_v27 }
 0x15a   :  { %667 = vst.msk [vmem:[#allocation8 + $0x24] sm:$0xf] %vm657_vm1, %v768_v48  ;;  %v555_v34 = vadd.f32 %v863_v55, %v458_v29  ;;  %v771_v35 = vpack.c.bf16 %v589_v30, %v589_v30  ;;  %v461_v36 = vadd.f32 %v826_v1, %v1120_v2 }
 0x15b   :  { %672 = vst.msk [vmem:[#allocation8 + $0x38] sm:$0xf] %vm657_vm1, %v773_v31  ;;  %v774_v53 = vpack.c.bf16 %v592_v32, %v592_v32  ;;  %v590_v37 = vmax.f32 %v566_v33, 0.0 }
 0x15c   :  { %v587_v38 = vmax.f32 %v555_v34, 0.0  ;;  %670 = vst.msk [vmem:[#allocation8 + $0x30] sm:$0xf] %vm657_vm1, %v771_v35  ;;  %v558_v39 = vadd.f32 %v864_v63, %v461_v36 }
 0x15d   :  { %673 = vst.msk [vmem:[#allocation8 + $0x3c] sm:$0xf] %vm657_vm1, %v774_v53  ;;  %v772_v40 = vpack.c.bf16 %v590_v37, %v590_v37 }
 0x15e   :  { %v769_v41 = vpack.c.bf16 %v587_v38, %v587_v38  ;;  %v588_v42 = vmax.f32 %v558_v39, 0.0 }
 0x15f   :  { %671 = vst.msk [vmem:[#allocation8 + $0x34] sm:$0xf] %vm657_vm1, %v772_v40 }
 0x160   :  { %668 = vst.msk [vmem:[#allocation8 + $0x28] sm:$0xf] %vm657_vm1, %v769_v41  ;;  %v770_v2 = vpack.c.bf16 %v588_v42, %v588_v42 }
 0x162   :  { %669 = vst.msk [vmem:[#allocation8 + $0x2c] sm:$0xf] %vm657_vm1, %v770_v2 }
 0x163   :  { %1020 = shalt.err (!%p1017_p0)
}
 0x164   :  { %s1021_s30 = scalar_lea.hbm %s1176_s3, 1024 }
 0x165   :  { %p1022_p1 = scmp.ne.s32.totalorder %s1176_s3, %s1021_s30  ;;  %p1025_p2 = scmp.lt.u32.totalorder %s1021_s30, %s1176_s3 }
 0x167   :  { %p1027_p3 = pnand %p1025_p2, %p1022_p1 }
 0x169   :  { %1030 = shalt.err (!%p1027_p3)
}
 0x16a   :  { %685 = dma.vmem_to_hbm [thread:$0]  %s680_s26, 1024, %s1176_s3, [#allocation4], %s1038_s22, %s1038_s22, %s1039_s23  }
 0x16b   :  { %1035 = dma.done.wait [#allocation4], 1024  }
 0x16c   :  { %1036 = vsyncadd [#allocation4], 4294966272 }
 0x16d   :  { %689 = vsyncpa [#allocation3], 1 }
 0x16e   :  { %690 = vsyncpa [#allocation6], 1 }
 0x16f   :  { %691 = vsyncpa [#allocation4], 1 }

// kernel: vggnet_modified_forward.23
= control target key start
LH: loop header
LB: loop body
LE: loop exit
PB: predicated region body
PF: predicated region fallthrough
CT: control target
= control target key end

     0   :  { %8 = vsyncpa [#allocation3], 0  ;;  %s681_s0 = inlined_call_operand.hbm [shape: bf16[32,288], index: 0, kind: input, shape index: {}]   ;;  %s682_s1 = inlined_call_operand.hbm [shape: bf16[288,32], index: 1, kind: input, shape index: {}]   ;;  %s683_s2 = inlined_call_operand.hbm [shape: f32[1,32], index: 2, kind: input, shape index: {}]   ;;  %s684_s3 = inlined_call_operand.hbm [shape: bf16[32,32], index: 3, kind: output, shape index: {}]  }
   0x1   :  { %9 = vsyncpa [#allocation6], 0 }
   0x2   :  { %10 = vsyncpa [#allocation4], 0  ;;  %s595_s12 = smov [#allocation5]   ;;  %s501_s16 = scalar_lea.hbm %s682_s1, 2304 }
   0x3   :  { %s28_s13 = sshll.u32 %s595_s12, 4  ;;  %p502_p0 = scmp.ne.s32.totalorder %s682_s1, %s501_s16  ;;  %s29_s13 = int_to_ptr.vmem [resolvable:$true] %s28_s13 }
   0x4   :  { %p505_p1 = scmp.lt.u32.totalorder %s501_s16, %s682_s1 }
   0x6   :  { %p507_p2 = pnand %p505_p1, %p502_p0 }
   0x8   :  { %510 = shalt.err (!%p507_p2)
}
   0x9   :  { %s511_s21 = scalar_lea.vmem %s29_s13, 2304  ;;  %p516_p4 = scmp.lt.s32.totalorder %s29_s13, %s29_s13 }
   0xa   :  { %p512_p3 = scmp.ne.s32.totalorder %s29_s13, %s511_s21  ;;  %p517_p5 = scmp.lt.s32.totalorder %s511_s21, %s511_s21 }
   0xc   :  { %p518_p6 = por %p517_p5, %p516_p4 }
   0xe   :  { %p519_p7 = pnand %p518_p6, %p512_p3 }
  0x10   :  { %522 = shalt.err (!%p519_p7)
}
  0x11   :  { %s596_s22 = smov 64   ;;  %s597_s23 = smov 4  }
  0x12   :  { %34 = dma.hbm_to_vmem [thread:$0]  %s682_s1, 2304, %s29_s13, [#allocation6], %s596_s22, %s596_s22, %s597_s23  }
  0x13   :  { %s598_s26 = smov [#allocation2]   ;;  %s523_s30 = scalar_lea.hbm %s681_s0, 768 }
  0x14   :  { %s16_s27 = sshll.u32 %s598_s26, 4  ;;  %p524_p8 = scmp.ne.s32.totalorder %s681_s0, %s523_s30  ;;  %s17_s27 = int_to_ptr.vmem [resolvable:$true] %s16_s27 }
  0x15   :  { %p527_p9 = scmp.lt.u32.totalorder %s523_s30, %s681_s0 }
  0x17   :  { %p529_p10 = pnand %p527_p9, %p524_p8 }
  0x19   :  { %532 = shalt.err (!%p529_p10)
}
  0x1a   :  { %s533_s8 = scalar_lea.vmem %s17_s27, 768  ;;  %p538_p12 = scmp.lt.s32.totalorder %s17_s27, %s17_s27 }
  0x1b   :  { %p534_p11 = scmp.ne.s32.totalorder %s17_s27, %s533_s8  ;;  %p539_p13 = scmp.lt.s32.totalorder %s533_s8, %s533_s8 }
  0x1d   :  { %p540_p0 = por %p539_p13, %p538_p12 }
  0x1f   :  { %p541_p1 = pnand %p540_p0, %p534_p11 }
  0x21   :  { %544 = shalt.err (!%p541_p1)
}
  0x22   :  { %s599_s1 = smov 192   ;;  %s600_s9 = smov 12  }
  0x23   :  { %22 = dma.hbm_to_vmem [thread:$0]  %s681_s0, 768, %s17_s27, [#allocation3], %s599_s1, %s599_s1, %s600_s9  }
  0x24   :  { %s601_s12 = smov [#allocation7]   ;;  %s545_s16 = scalar_lea.hbm %s683_s2, 16 }
  0x25   :  { %s41_s13 = sshll.u32 %s601_s12, 4  ;;  %p546_p2 = scmp.ne.s32.totalorder %s683_s2, %s545_s16  ;;  %s42_s13 = int_to_ptr.vmem [resolvable:$true] %s41_s13 }
  0x26   :  { %p549_p3 = scmp.lt.u32.totalorder %s545_s16, %s683_s2 }
  0x28   :  { %p551_p4 = pnand %p549_p3, %p546_p2 }
  0x2a   :  { %554 = shalt.err (!%p551_p4)
}
  0x2b   :  { %s555_s21 = scalar_lea.vmem %s42_s13, 16  ;;  %s559_s0 = scalar_lea.vmem %s42_s13, 32 }
  0x2c   :  { %p556_p5 = scmp.ne.s32.totalorder %s42_s13, %s555_s21  ;;  %p560_p6 = scmp.lt.s32.totalorder %s42_s13, %s42_s13 }
  0x2d   :  { %p561_p7 = scmp.lt.s32.totalorder %s559_s0, %s555_s21 }
  0x2f   :  { %p562_p8 = por %p561_p7, %p560_p6 }
  0x31   :  { %p563_p9 = pnand %p562_p8, %p556_p5 }
  0x33   :  { %566 = shalt.err (!%p563_p9)
}
  0x34   :  { %44 = dma.hbm_to_vmem [thread:$0]  %s683_s2, 16, %s42_s13, [#allocation6]  }
  0x35   :  { %589 = dma.done.wait [#allocation3], 768  }
  0x36   :  { %590 = vsyncadd [#allocation3], 4294966528 }
  0x37   :  { %591 = dma.done.wait [#allocation6], 2320  }
  0x38   :  { %592 = vsyncadd [#allocation6], 4294964976  ;;  %v475_v0 = vld [vmem:[#allocation5 + $0x40] sm:$0xff]   ;;  %v477_v2 = vld [vmem:[#allocation5 + $0x48] sm:$0xff]   ;;  %vm244_vm0 = vcmask 261120   ;;  %vm369_vm1 = vcmask 257024  }
  0x39   :  { %v476_v1 = vld [vmem:[#allocation5] sm:$0xff]   ;;  %427 = vmatprep.subr.bf16.mxu0 %v475_v0  ;;  %v478_v3 = vld [vmem:[#allocation5 + $0x8] sm:$0xff]   ;;  %v479_v4 = vld [vmem:[#allocation5 + $0x50] sm:$0xff]   ;;  %s602_s2 = smov [#allocation8]  }
  0x3a   :  { %428 = vmatpush3.bf16.msra.mxu0 %v476_v1  ;;  %v480_v5 = vld [vmem:[#allocation5 + $0x10] sm:$0xff]   ;;  %v481_v6 = vld [vmem:[#allocation5 + $0x58] sm:$0xff]   ;;  %v483_v8 = vld [vmem:[#allocation5 + $0x60] sm:$0xff]   ;;  %s379_s26 = sshll.u32 %s602_s2, 4  ;;  %s380_s26 = int_to_ptr.vmem [resolvable:$true] %s379_s26 }
  0x3b   :  { %429 = vmatprep.subr.bf16.mxu0 %v477_v2  ;;  %v482_v7 = vld [vmem:[#allocation5 + $0x18] sm:$0xff]   ;;  %v484_v9 = vld [vmem:[#allocation5 + $0x20] sm:$0xff]   ;;  %v485_v11 = vld [vmem:[#allocation5 + $0x68] sm:$0xff]   ;;  %s567_s27 = scalar_lea.vmem %s380_s26, 256  ;;  %p572_p11 = scmp.lt.s32.totalorder %s380_s26, %s380_s26 }
  0x3c   :  { %v490_v10 = vld [vmem:[#allocation5 + $0x80] sm:$0xff]   ;;  %v486_v12 = vld [vmem:[#allocation5 + $0x28] sm:$0xff]   ;;  %v487_v13 = vld [vmem:[#allocation5 + $0x70] sm:$0xff]   ;;  %p568_p10 = scmp.ne.s32.totalorder %s380_s26, %s567_s27  ;;  %p573_p12 = scmp.lt.s32.totalorder %s567_s27, %s567_s27 }
  0x3d   :  { %459 = vmatprep.subr.bf16.mxu1 %v490_v10  ;;  %v494_v14 = vld [vmem:[#allocation2 + $0x4] ss:$12 sps:$4 sm:$0xff]   ;;  %v495_v15 = vld [vmem:[#allocation5 + $0x88] sm:$0xff]   ;;  %v496_v16 = vld [vmem:[#allocation2 + $0x8] ss:$12 sps:$4 sm:$0xff]  }
  0x3e   :  { %430 = vmatpush3.bf16.msra.mxu0 %v478_v3  ;;  %460 = vmatpush3.bf16.msra.mxu1 %v490_v10  ;;  %v497_v17 = vld [vmem:[#allocation2 + $0x20] ss:$12 sps:$4 sm:$0xff]   ;;  %v498_v22 = vld [vmem:[#allocation2 + $0x1c] ss:$12 sps:$4 sm:$0xff]   ;;  %v500_v23 = vld [vmem:[#allocation2 + $0x18] ss:$12 sps:$4 sm:$0xff]   ;;  %p574_p13 = por %p573_p12, %p572_p11 }
  0x3f   :  { %431 = vmatprep.subr.bf16.mxu0 %v479_v4  ;;  %283 = vmatprep.mubr.bf16.mxu0 %v494_v14  ;;  %v488_v18 = vld [vmem:[#allocation5 + $0x30] sm:$0xff]   ;;  %v489_v19 = vld [vmem:[#allocation5 + $0x78] sm:$0xff]  }
  0x40   :  { %461 = vmatprep.subr.bf16.mxu1 %v495_v15  ;;  %463 = vmatprep.mubr.msk.bf16.mxu1 %vm244_vm0, %v496_v16  ;;  %v491_v20 = vld [vmem:[#allocation5 + $0x38] sm:$0xff]   ;;  %v392_v30 = vld [vmem:[#allocation7] ss:$0 sm:$0xff]  ;;  %p575_p0 = pnand %p574_p13, %p568_p10 }
  0x41   :  { %v492_v21 = vld [vmem:[#allocation2] ss:$12 sps:$4 sm:$0xff]  }
  0x42   :  { %432 = vmatpush3.bf16.msra.mxu0 %v480_v5  ;;  %462 = vmatpush3.bf16.msra.mxu1 %v495_v15 }
  0x43   :  { %433 = vmatprep.subr.bf16.mxu0 %v481_v6 }
  0x45   :  { %464 = vmatmul.mubr.msk.bf16.vlgmr.msra.gmra.mrb[0].mxu1 %vm244_vm0, %v497_v17 }
  0x46   :  { %434 = vmatpush3.bf16.msra.mxu0 %v482_v7 }
  0x47   :  { %435 = vmatprep.subr.bf16.mxu0 %v483_v8 }
  0x4a   :  { %436 = vmatpush3.bf16.msra.mxu0 %v484_v9 }
  0x4b   :  { %437 = vmatprep.subr.bf16.mxu0 %v485_v11 }
  0x4e   :  { %438 = vmatpush3.bf16.msra.mxu0 %v486_v12 }
  0x4f   :  { %439 = vmatprep.subr.bf16.mxu0 %v487_v13 }
  0x52   :  { %440 = vmatpush3.bf16.msra.mxu0 %v488_v18 }
  0x53   :  { %441 = vmatprep.subr.bf16.mxu0 %v489_v19 }
  0x56   :  { %442 = vmatpush3.bf16.msra.mxu0 %v491_v20 }
  0x59   :  { %284 = vmatmul.mubr.bf16.vlgmr.msra.gmra.mrb[0].mxu0 %v492_v21 }
  0x5a   :  { %291 = vmatprep.mubr.bf16.mxu0 %v498_v22 }
  0x61   :  { %292 = vmatmul.mubr.bf16.gmra.mrb[4].mxu0 %v500_v23 }
 0x118   :  { %v465_v24 = vpop.f32.mrb[0].mxu1 }
 0x119   :  { %v334_v25 = vpop.f32.mrb[1].mxu1 }
 0x11a   :  { %v466_v26 = vpop.f32.mrb[2].mxu1 }
 0x11b   :  { %v337_v27 = vpop.f32.mrb[3].mxu1 }
 0x12c   :  { %v443_v28 = vpop.f32.mrb[0].mxu0 }
 0x12d   :  { %v444_v29 = vpop.f32.mrb[1].mxu0 }
 0x12e   :  { %v445_v31 = vadd.f32 %v444_v29, %v443_v28  ;;  %v446_v32 = vpop.f32.mrb[2].mxu0 }
 0x12f   :  { %v447_v33 = vpop.f32.mrb[3].mxu0 }
 0x130   :  { %v448_v34 = vadd.f32 %v447_v33, %v446_v32  ;;  %v286_v35 = vadd.f32 %v445_v31, %v392_v30 }
 0x132   :  { %v335_v36 = vadd.f32 %v334_v25, %v286_v35  ;;  %v289_v37 = vadd.f32 %v448_v34, %v392_v30 }
 0x134   :  { %v349_v38 = vmax.f32 %v335_v36, 0.0  ;;  %v338_v39 = vadd.f32 %v337_v27, %v289_v37  ;;  %v449_v40 = vpop.f32.mrb[4].mxu0 }
 0x135   :  { %v450_v41 = vpop.f32.mrb[5].mxu0 }
 0x136   :  { %v423_v42 = vpack.c.bf16 %v349_v38, %v349_v38  ;;  %v350_v43 = vmax.f32 %v338_v39, 0.0  ;;  %v451_v44 = vadd.f32 %v450_v41, %v449_v40  ;;  %v452_v45 = vpop.f32.mrb[6].mxu0 }
 0x137   :  { %v453_v46 = vpop.f32.mrb[7].mxu0 }
 0x138   :  { %370 = vst.msk [vmem:[#allocation8] sm:$0xf] %vm369_vm1, %v423_v42  ;;  %v424_v47 = vpack.c.bf16 %v350_v43, %v350_v43  ;;  %v294_v48 = vadd.f32 %v451_v44, %v392_v30  ;;  %v454_v49 = vadd.f32 %v453_v46, %v452_v45 }
 0x13a   :  { %371 = vst.msk [vmem:[#allocation8 + $0x4] sm:$0xf] %vm369_vm1, %v424_v47  ;;  %v343_v50 = vadd.f32 %v465_v24, %v294_v48  ;;  %v297_v51 = vadd.f32 %v454_v49, %v392_v30 }
 0x13c   :  { %v351_v52 = vmax.f32 %v343_v50, 0.0  ;;  %v346_v53 = vadd.f32 %v466_v26, %v297_v51 }
 0x13e   :  { %v425_v54 = vpack.c.bf16 %v351_v52, %v351_v52  ;;  %v352_v55 = vmax.f32 %v346_v53, 0.0 }
 0x140   :  { %372 = vst.msk [vmem:[#allocation8 + $0x8] sm:$0xf] %vm369_vm1, %v425_v54  ;;  %v426_v56 = vpack.c.bf16 %v352_v55, %v352_v55 }
 0x142   :  { %373 = vst.msk [vmem:[#allocation8 + $0xc] sm:$0xf] %vm369_vm1, %v426_v56 }
 0x143   :  { %578 = shalt.err (!%p575_p0)
}
 0x144   :  { %s579_s30 = scalar_lea.hbm %s684_s3, 256 }
 0x145   :  { %p580_p1 = scmp.ne.s32.totalorder %s684_s3, %s579_s30  ;;  %p583_p2 = scmp.lt.u32.totalorder %s579_s30, %s684_s3 }
 0x147   :  { %p585_p3 = pnand %p583_p2, %p580_p1 }
 0x149   :  { %588 = shalt.err (!%p585_p3)
}
 0x14a   :  { %385 = dma.vmem_to_hbm [thread:$0]  %s380_s26, 256, %s684_s3, [#allocation4], %s596_s22, %s596_s22, %s597_s23  }
 0x14b   :  { %593 = dma.done.wait [#allocation4], 256  }
 0x14c   :  { %594 = vsyncadd [#allocation4], 4294967040 }
 0x14d   :  { %389 = vsyncpa [#allocation3], 1 }
 0x14e   :  { %390 = vsyncpa [#allocation6], 1 }
 0x14f   :  { %391 = vsyncpa [#allocation4], 1 }

// kernel: vggnet_modified_forward.26
= control target key start
LH: loop header
LB: loop body
LE: loop exit
PB: predicated region body
PF: predicated region fallthrough
CT: control target
= control target key end

     0   :  { %8 = vsyncpa [#allocation3], 0  ;;  %s612_s0 = inlined_call_operand.hbm [shape: bf16[16,288], index: 0, kind: input, shape index: {}]   ;;  %s613_s1 = inlined_call_operand.hbm [shape: bf16[288,32], index: 1, kind: input, shape index: {}]   ;;  %s614_s2 = inlined_call_operand.hbm [shape: f32[1,32], index: 2, kind: input, shape index: {}]   ;;  %s615_s3 = inlined_call_operand.hbm [shape: bf16[16,32], index: 3, kind: output, shape index: {}]  }
   0x1   :  { %9 = vsyncpa [#allocation6], 0 }
   0x2   :  { %10 = vsyncpa [#allocation4], 0  ;;  %s528_s12 = smov [#allocation5]   ;;  %s434_s16 = scalar_lea.hbm %s613_s1, 2304 }
   0x3   :  { %s28_s13 = sshll.u32 %s528_s12, 4  ;;  %p435_p0 = scmp.ne.s32.totalorder %s613_s1, %s434_s16  ;;  %s29_s13 = int_to_ptr.vmem [resolvable:$true] %s28_s13 }
   0x4   :  { %p438_p1 = scmp.lt.u32.totalorder %s434_s16, %s613_s1 }
   0x6   :  { %p440_p2 = pnand %p438_p1, %p435_p0 }
   0x8   :  { %443 = shalt.err (!%p440_p2)
}
   0x9   :  { %s444_s21 = scalar_lea.vmem %s29_s13, 2304  ;;  %p449_p4 = scmp.lt.s32.totalorder %s29_s13, %s29_s13 }
   0xa   :  { %p445_p3 = scmp.ne.s32.totalorder %s29_s13, %s444_s21  ;;  %p450_p5 = scmp.lt.s32.totalorder %s444_s21, %s444_s21 }
   0xc   :  { %p451_p6 = por %p450_p5, %p449_p4 }
   0xe   :  { %p452_p7 = pnand %p451_p6, %p445_p3 }
  0x10   :  { %455 = shalt.err (!%p452_p7)
}
  0x11   :  { %s529_s22 = smov 64   ;;  %s530_s23 = smov 4  }
  0x12   :  { %34 = dma.hbm_to_vmem [thread:$0]  %s613_s1, 2304, %s29_s13, [#allocation6], %s529_s22, %s529_s22, %s530_s23  }
  0x13   :  { %s531_s26 = smov [#allocation2]   ;;  %s456_s30 = scalar_lea.hbm %s612_s0, 384 }
  0x14   :  { %s16_s27 = sshll.u32 %s531_s26, 4  ;;  %p457_p8 = scmp.ne.s32.totalorder %s612_s0, %s456_s30  ;;  %s17_s27 = int_to_ptr.vmem [resolvable:$true] %s16_s27 }
  0x15   :  { %p460_p9 = scmp.lt.u32.totalorder %s456_s30, %s612_s0 }
  0x17   :  { %p462_p10 = pnand %p460_p9, %p457_p8 }
  0x19   :  { %465 = shalt.err (!%p462_p10)
}
  0x1a   :  { %s466_s8 = scalar_lea.vmem %s17_s27, 384  ;;  %p471_p12 = scmp.lt.s32.totalorder %s17_s27, %s17_s27 }
  0x1b   :  { %p467_p11 = scmp.ne.s32.totalorder %s17_s27, %s466_s8  ;;  %p472_p13 = scmp.lt.s32.totalorder %s466_s8, %s466_s8 }
  0x1d   :  { %p473_p0 = por %p472_p13, %p471_p12 }
  0x1f   :  { %p474_p1 = pnand %p473_p0, %p467_p11 }
  0x21   :  { %477 = shalt.err (!%p474_p1)
}
  0x22   :  { %s532_s1 = smov 192   ;;  %s533_s9 = smov 12  }
  0x23   :  { %22 = dma.hbm_to_vmem [thread:$0]  %s612_s0, 384, %s17_s27, [#allocation3], %s532_s1, %s532_s1, %s533_s9  }
  0x24   :  { %s534_s12 = smov [#allocation7]   ;;  %s478_s16 = scalar_lea.hbm %s614_s2, 16 }
  0x25   :  { %s41_s13 = sshll.u32 %s534_s12, 4  ;;  %p479_p2 = scmp.ne.s32.totalorder %s614_s2, %s478_s16  ;;  %s42_s13 = int_to_ptr.vmem [resolvable:$true] %s41_s13 }
  0x26   :  { %p482_p3 = scmp.lt.u32.totalorder %s478_s16, %s614_s2 }
  0x28   :  { %p484_p4 = pnand %p482_p3, %p479_p2 }
  0x2a   :  { %487 = shalt.err (!%p484_p4)
}
  0x2b   :  { %s488_s21 = scalar_lea.vmem %s42_s13, 16  ;;  %s492_s0 = scalar_lea.vmem %s42_s13, 32 }
  0x2c   :  { %p489_p5 = scmp.ne.s32.totalorder %s42_s13, %s488_s21  ;;  %p493_p6 = scmp.lt.s32.totalorder %s42_s13, %s42_s13 }
  0x2d   :  { %p494_p7 = scmp.lt.s32.totalorder %s492_s0, %s488_s21 }
  0x2f   :  { %p495_p8 = por %p494_p7, %p493_p6 }
  0x31   :  { %p496_p9 = pnand %p495_p8, %p489_p5 }
  0x33   :  { %499 = shalt.err (!%p496_p9)
}
  0x34   :  { %44 = dma.hbm_to_vmem [thread:$0]  %s614_s2, 16, %s42_s13, [#allocation6]  }
  0x35   :  { %522 = dma.done.wait [#allocation3], 384  }
  0x36   :  { %523 = vsyncadd [#allocation3], 4294966912 }
  0x37   :  { %524 = dma.done.wait [#allocation6], 2320  }
  0x38   :  { %525 = vsyncadd [#allocation6], 4294964976  ;;  %v535_v0 = vmov 0.0   ;;  %vm536_vm0 = vmmov 0   ;;  %v412_v1 = vld [vmem:[#allocation5 + $0x40] sm:$0xff]   ;;  %v414_v3 = vld [vmem:[#allocation5 + $0x48] sm:$0xff]  }
  0x39   :  { %394 = vmatprep.subr.bf16.mxu1 %v535_v0  ;;  %398 = vmatprep.mubr.msk.bf16.mxu1 %vm536_vm0, %v535_v0  ;;  %v413_v2 = vld [vmem:[#allocation5] sm:$0xff]   ;;  %v415_v4 = vld [vmem:[#allocation5 + $0x8] sm:$0xff]   ;;  %v416_v5 = vld [vmem:[#allocation5 + $0x50] sm:$0xff]   ;;  %vm225_vm1 = vcmask 261120   ;;  %vm321_vm2 = vcmask 257024   ;;  %s537_s2 = smov [#allocation8]  }
  0x3a   :  { %369 = vmatprep.subr.bf16.mxu0 %v412_v1  ;;  %v417_v6 = vld [vmem:[#allocation5 + $0x10] sm:$0xff]   ;;  %v418_v7 = vld [vmem:[#allocation5 + $0x58] sm:$0xff]   ;;  %v420_v9 = vld [vmem:[#allocation5 + $0x60] sm:$0xff]   ;;  %s329_s26 = sshll.u32 %s537_s2, 4  ;;  %s330_s26 = int_to_ptr.vmem [resolvable:$true] %s329_s26 }
  0x3b   :  { %370 = vmatpush3.bf16.msra.mxu0 %v413_v2  ;;  %v419_v8 = vld [vmem:[#allocation5 + $0x18] sm:$0xff]   ;;  %v426_v10 = vld [vmem:[#allocation5 + $0x80] sm:$0xff]   ;;  %v422_v12 = vld [vmem:[#allocation5 + $0x68] sm:$0xff]   ;;  %s500_s27 = scalar_lea.vmem %s330_s26, 128  ;;  %p505_p11 = scmp.lt.s32.totalorder %s330_s26, %s330_s26 }
  0x3c   :  { %371 = vmatprep.subr.bf16.mxu0 %v414_v3  ;;  %v421_v11 = vld [vmem:[#allocation5 + $0x20] sm:$0xff]   ;;  %395 = vmatpush3.bf16.msra.mxu1 %v426_v10  ;;  %v423_v13 = vld [vmem:[#allocation5 + $0x28] sm:$0xff]   ;;  %v424_v16 = vld [vmem:[#allocation5 + $0x70] sm:$0xff]   ;;  %p501_p10 = scmp.ne.s32.totalorder %s330_s26, %s500_s27  ;;  %p506_p12 = scmp.lt.s32.totalorder %s500_s27, %s500_s27 }
  0x3d   :  { %396 = vmatprep.subr.bf16.mxu1 %v535_v0  ;;  %v431_v14 = vld [vmem:[#allocation2 + $0x4] ss:$12 sps:$4 sm:$0xff]   ;;  %v433_v17 = vld [vmem:[#allocation2 + $0x8] ss:$12 sps:$4 sm:$0xff]   ;;  %v429_v21 = vld [vmem:[#allocation2] ss:$12 sps:$4 sm:$0xff]  }
  0x3e   :  { %v432_v15 = vld [vmem:[#allocation5 + $0x88] sm:$0xff]   ;;  %261 = vmatprep.mubr.bf16.mxu0 %v431_v14  ;;  %v425_v18 = vld [vmem:[#allocation5 + $0x30] sm:$0xff]   ;;  %v427_v19 = vld [vmem:[#allocation5 + $0x78] sm:$0xff]   ;;  %p507_p13 = por %p506_p12, %p505_p11 }
  0x3f   :  { %372 = vmatpush3.bf16.msra.mxu0 %v415_v4  ;;  %v428_v20 = vld [vmem:[#allocation5 + $0x38] sm:$0xff]   ;;  %v342_v28 = vld [vmem:[#allocation7] ss:$0 sm:$0xff] }
  0x40   :  { %373 = vmatprep.subr.bf16.mxu0 %v416_v5  ;;  %397 = vmatpush3.bf16.msra.mxu1 %v432_v15  ;;  %p508_p0 = pnand %p507_p13, %p501_p10 }
  0x43   :  { %374 = vmatpush3.bf16.msra.mxu0 %v417_v6  ;;  %399 = vmatmul.mubr.msk.bf16.vlgmr.msra.gmra.mrb[0].mxu1 %vm225_vm1, %v433_v17 }
  0x44   :  { %375 = vmatprep.subr.bf16.mxu0 %v418_v7 }
  0x47   :  { %376 = vmatpush3.bf16.msra.mxu0 %v419_v8 }
  0x48   :  { %377 = vmatprep.subr.bf16.mxu0 %v420_v9 }
  0x4b   :  { %378 = vmatpush3.bf16.msra.mxu0 %v421_v11 }
  0x4c   :  { %379 = vmatprep.subr.bf16.mxu0 %v422_v12 }
  0x4f   :  { %380 = vmatpush3.bf16.msra.mxu0 %v423_v13 }
  0x50   :  { %381 = vmatprep.subr.bf16.mxu0 %v424_v16 }
  0x53   :  { %382 = vmatpush3.bf16.msra.mxu0 %v425_v18 }
  0x54   :  { %383 = vmatprep.subr.bf16.mxu0 %v427_v19 }
  0x57   :  { %384 = vmatpush3.bf16.msra.mxu0 %v428_v20 }
  0x5a   :  { %262 = vmatmul.mubr.bf16.vlgmr.msra.gmra.mrb[0].mxu0 %v429_v21 }
 0x116   :  { %v304_v22 = vpop.f32.mrb[0].mxu1 }
 0x117   :  { %v400_v23 = vpop.f32.mrb[1].mxu1 }
 0x118   :  { %v307_v24 = vpop.f32.mrb[2].mxu1 }
 0x119   :  { %v401_v25 = vpop.f32.mrb[3].mxu1 }
 0x12d   :  { %v385_v26 = vpop.f32.mrb[0].mxu0 }
 0x12e   :  { %v386_v27 = vpop.f32.mrb[1].mxu0 }
 0x12f   :  { %v387_v29 = vadd.f32 %v386_v27, %v385_v26  ;;  %v388_v30 = vpop.f32.mrb[2].mxu0 }
 0x130   :  { %v389_v31 = vpop.f32.mrb[3].mxu0 }
 0x131   :  { %v264_v32 = vadd.f32 %v387_v29, %v342_v28  ;;  %v390_v33 = vadd.f32 %v389_v31, %v388_v30 }
 0x133   :  { %v305_v34 = vadd.f32 %v304_v22, %v264_v32  ;;  %v267_v35 = vadd.f32 %v390_v33, %v342_v28 }
 0x135   :  { %v311_v36 = vmax.f32 %v305_v34, 0.0  ;;  %v308_v37 = vadd.f32 %v307_v24, %v267_v35 }
 0x137   :  { %v367_v38 = vpack.c.bf16 %v311_v36, %v311_v36  ;;  %v312_v39 = vmax.f32 %v308_v37, 0.0 }
 0x139   :  { %v368_v40 = vpack.c.bf16 %v312_v39, %v312_v39  ;;  %322 = vst.msk [vmem:[#allocation8] sm:$0xf] %vm321_vm2, %v367_v38 }
 0x13b   :  { %323 = vst.msk [vmem:[#allocation8 + $0x4] sm:$0xf] %vm321_vm2, %v368_v40 }
 0x13c   :  { %511 = shalt.err (!%p508_p0)
}
 0x13d   :  { %s512_s30 = scalar_lea.hbm %s615_s3, 128 }
 0x13e   :  { %p513_p1 = scmp.ne.s32.totalorder %s615_s3, %s512_s30  ;;  %p516_p2 = scmp.lt.u32.totalorder %s512_s30, %s615_s3 }
 0x140   :  { %p518_p3 = pnand %p516_p2, %p513_p1 }
 0x142   :  { %521 = shalt.err (!%p518_p3)
}
 0x143   :  { %335 = dma.vmem_to_hbm [thread:$0]  %s330_s26, 128, %s615_s3, [#allocation4], %s529_s22, %s529_s22, %s530_s23  }
 0x144   :  { %526 = dma.done.wait [#allocation4], 128  }
 0x145   :  { %527 = vsyncadd [#allocation4], 4294967168 }
 0x146   :  { %339 = vsyncpa [#allocation3], 1 }
 0x147   :  { %340 = vsyncpa [#allocation6], 1 }
 0x148   :  { %341 = vsyncpa [#allocation4], 1 }

// kernel: vggnet_modified_forward.29
= control target key start
LH: loop header
LB: loop body
LE: loop exit
PB: predicated region body
PF: predicated region fallthrough
CT: control target
= control target key end

     0   :  { %8 = vsyncpa [#allocation3], 0  ;;  %s378_s0 = inlined_call_operand.hbm [shape: bf16[16,32], index: 0, kind: input, shape index: {}]   ;;  %s379_s1 = inlined_call_operand.hbm [shape: bf16[32,64], index: 1, kind: input, shape index: {}]   ;;  %s380_s2 = inlined_call_operand.hbm [shape: f32[1,64], index: 2, kind: input, shape index: {}]   ;;  %s381_s3 = inlined_call_operand.hbm [shape: bf16[16,64], index: 3, kind: output, shape index: {}]  }
   0x1   :  { %9 = vsyncpa [#allocation6], 0 }
   0x2   :  { %10 = vsyncpa [#allocation4], 0  ;;  %s286_s12 = smov [#allocation5]   ;;  %s287_s14 = smov [#allocation2]  }
   0x3   :  { %s28_s13 = sshll.u32 %s286_s12, 4  ;;  %s16_s15 = sshll.u32 %s287_s14, 4  ;;  %s29_s13 = int_to_ptr.vmem [resolvable:$true] %s28_s13  ;;  %s314_s15 = int_to_ptr.vmem [resolvable:$true] %s16_s15 }
   0x4   :  { %s192_s18 = scalar_lea.hbm %s379_s1, 256 }
   0x5   :  { %p193_p0 = scmp.ne.s32.totalorder %s379_s1, %s192_s18  ;;  %p196_p1 = scmp.lt.u32.totalorder %s192_s18, %s379_s1 }
   0x7   :  { %p198_p2 = pnand %p196_p1, %p193_p0 }
   0x9   :  { %201 = shalt.err (!%p198_p2)
}
   0xa   :  { %s202_s23 = scalar_lea.vmem %s29_s13, 256  ;;  %p207_p4 = scmp.lt.s32.totalorder %s29_s13, %s29_s13 }
   0xb   :  { %p203_p3 = scmp.ne.s32.totalorder %s29_s13, %s202_s23  ;;  %p208_p5 = scmp.lt.s32.totalorder %s202_s23, %s202_s23 }
   0xd   :  { %p209_p6 = por %p208_p5, %p207_p4 }
   0xf   :  { %p210_p7 = pnand %p209_p6, %p203_p3 }
  0x11   :  { %213 = shalt.err (!%p210_p7)
}
  0x12   :  { %s288_s24 = smov 64   ;;  %s289_s25 = smov 4  }
  0x13   :  { %34 = dma.hbm_to_vmem [thread:$0]  %s379_s1, 256, %s29_s13, [#allocation6], %s288_s24, %s288_s24, %s289_s25  }
  0x14   :  { %s214_s30 = scalar_lea.hbm %s378_s0, 128 }
  0x15   :  { %p215_p8 = scmp.ne.s32.totalorder %s378_s0, %s214_s30  ;;  %p218_p9 = scmp.lt.u32.totalorder %s214_s30, %s378_s0 }
  0x17   :  { %p220_p10 = pnand %p218_p9, %p215_p8 }
  0x19   :  { %223 = shalt.err (!%p220_p10)
}
  0x1a   :  { %s224_s8 = scalar_lea.vmem %s314_s15, 128  ;;  %p229_p12 = scmp.lt.s32.totalorder %s314_s15, %s314_s15 }
  0x1b   :  { %p225_p11 = scmp.ne.s32.totalorder %s314_s15, %s224_s8  ;;  %p230_p13 = scmp.lt.s32.totalorder %s224_s8, %s224_s8 }
  0x1d   :  { %p231_p0 = por %p230_p13, %p229_p12 }
  0x1f   :  { %p232_p1 = pnand %p231_p0, %p225_p11 }
  0x21   :  { %235 = shalt.err (!%p232_p1)
}
  0x22   :  { %22 = dma.hbm_to_vmem [thread:$0]  %s378_s0, 128, %s314_s15, [#allocation3], %s288_s24, %s288_s24, %s289_s25  }
  0x23   :  { %s290_s10 = smov [#allocation7]   ;;  %s236_s14 = scalar_lea.hbm %s380_s2, 16 }
  0x24   :  { %s41_s11 = sshll.u32 %s290_s10, 4  ;;  %p237_p2 = scmp.ne.s32.totalorder %s380_s2, %s236_s14  ;;  %s42_s11 = int_to_ptr.vmem [resolvable:$true] %s41_s11 }
  0x25   :  { %p240_p3 = scmp.lt.u32.totalorder %s236_s14, %s380_s2 }
  0x27   :  { %p242_p4 = pnand %p240_p3, %p237_p2 }
  0x29   :  { %245 = shalt.err (!%p242_p4)
}
  0x2a   :  { %s246_s20 = scalar_lea.vmem %s42_s11, 16  ;;  %s250_s0 = scalar_lea.vmem %s42_s11, 32 }
  0x2b   :  { %p247_p5 = scmp.ne.s32.totalorder %s42_s11, %s246_s20  ;;  %p251_p6 = scmp.lt.s32.totalorder %s42_s11, %s42_s11 }
  0x2c   :  { %p252_p7 = scmp.lt.s32.totalorder %s250_s0, %s246_s20 }
  0x2e   :  { %p253_p8 = por %p252_p7, %p251_p6 }
  0x30   :  { %p254_p9 = pnand %p253_p8, %p247_p5 }
  0x32   :  { %257 = shalt.err (!%p254_p9)
}
  0x33   :  { %44 = dma.hbm_to_vmem [thread:$0]  %s380_s2, 16, %s42_s11, [#allocation6]  }
  0x34   :  { %280 = dma.done.wait [#allocation3], 128  }
  0x35   :  { %281 = vsyncadd [#allocation3], 4294967168 }
  0x36   :  { %282 = dma.done.wait [#allocation6], 272  }
  0x37   :  { %283 = vsyncadd [#allocation6], 4294967024  ;;  %v291_v0 = vmov 0.0   ;;  %vm292_vm0 = vmmov 0   ;;  %v189_v1 = vld [vmem:[#allocation5] sm:$0xff]   ;;  %v190_v2 = vld [vmem:[#allocation5 + $0x8] sm:$0xff]  }
  0x38   :  { %173 = vmatprep.subr.bf16.mxu0 %v291_v0  ;;  %177 = vmatprep.mubr.msk.bf16.mxu0 %vm292_vm0, %v291_v0  ;;  %v191_v3 = vld [vmem:[#allocation2] sm:$0xff]   ;;  %vm85_vm1 = vcmask 261120   ;;  %v161_v4 = vld [vmem:[#allocation7] ss:$0 sm:$0xff]  ;;  %vm140_vm2 = vcmask 519168   ;;  %s293_s2 = smov [#allocation8]  }
  0x39   :  { %174 = vmatpush3.bf16.msra.mxu0 %v189_v1  ;;  %s148_s22 = sshll.u32 %s293_s2, 4  ;;  %s149_s22 = int_to_ptr.vmem [resolvable:$true] %s148_s22 }
  0x3a   :  { %175 = vmatprep.subr.bf16.mxu0 %v291_v0  ;;  %s258_s23 = scalar_lea.vmem %s149_s22, 128  ;;  %p263_p11 = scmp.lt.s32.totalorder %s149_s22, %s149_s22 }
  0x3b   :  { %p259_p10 = scmp.ne.s32.totalorder %s149_s22, %s258_s23  ;;  %p264_p12 = scmp.lt.s32.totalorder %s258_s23, %s258_s23 }
  0x3d   :  { %176 = vmatpush3.bf16.msra.mxu0 %v190_v2  ;;  %p265_p13 = por %p264_p12, %p263_p11 }
  0x3f   :  { %p266_p0 = pnand %p265_p13, %p259_p10 }
  0x40   :  { %178 = vmatmul.mubr.msk.bf16.vlgmr.msra.gmra.mrb[0].mxu0 %vm85_vm1, %v191_v3 }
 0x113   :  { %v123_v5 = vpop.f32.mrb[0].mxu0 }
 0x114   :  { %v124_v6 = vadd.f32 %v161_v4, %v123_v5  ;;  %v179_v7 = vpop.f32.mrb[1].mxu0 }
 0x115   :  { %v126_v8 = vpop.f32.mrb[2].mxu0 }
 0x116   :  { %v130_v9 = vmax.f32 %v124_v6, 0.0  ;;  %v127_v10 = vadd.f32 %v161_v4, %v126_v8  ;;  %v180_v11 = vpop.f32.mrb[3].mxu0 }
 0x118   :  { %v168_v12 = vpack.c.bf16 %v130_v9, %v130_v9  ;;  %v131_v13 = vmax.f32 %v127_v10, 0.0 }
 0x11a   :  { %v169_v14 = vpack.c.bf16 %v131_v13, %v131_v13  ;;  %141 = vst.msk [vmem:[#allocation8] sm:$0xf] %vm140_vm2, %v168_v12 }
 0x11c   :  { %142 = vst.msk [vmem:[#allocation8 + $0x4] sm:$0xf] %vm140_vm2, %v169_v14 }
 0x11d   :  { %269 = shalt.err (!%p266_p0)
}
 0x11e   :  { %s270_s28 = scalar_lea.hbm %s381_s3, 128 }
 0x11f   :  { %p271_p1 = scmp.ne.s32.totalorder %s381_s3, %s270_s28  ;;  %p274_p2 = scmp.lt.u32.totalorder %s270_s28, %s381_s3 }
 0x121   :  { %p276_p3 = pnand %p274_p2, %p271_p1 }
 0x123   :  { %279 = shalt.err (!%p276_p3)
}
 0x124   :  { %154 = dma.vmem_to_hbm [thread:$0]  %s149_s22, 128, %s381_s3, [#allocation4], %s288_s24, %s288_s24, %s289_s25  }
 0x125   :  { %284 = dma.done.wait [#allocation4], 128  }
 0x126   :  { %285 = vsyncadd [#allocation4], 4294967168 }
 0x127   :  { %158 = vsyncpa [#allocation3], 1 }
 0x128   :  { %159 = vsyncpa [#allocation6], 1 }
 0x129   :  { %160 = vsyncpa [#allocation4], 1 }

// kernel: vggnet_modified_forward.30
= control target key start
LH: loop header
LB: loop body
LE: loop exit
PB: predicated region body
PF: predicated region fallthrough
CT: control target
= control target key end

     0   :  { %8 = vsyncpa [#allocation3], 0  ;;  %s404_s0 = inlined_call_operand.hbm [shape: bf16[16,64], index: 0, kind: input, shape index: {}]   ;;  %s405_s1 = inlined_call_operand.hbm [shape: bf16[64,64], index: 1, kind: input, shape index: {}]   ;;  %s406_s2 = inlined_call_operand.hbm [shape: f32[1,64], index: 2, kind: input, shape index: {}]   ;;  %s407_s3 = inlined_call_operand.hbm [shape: bf16[16,64], index: 3, kind: output, shape index: {}]  }
   0x1   :  { %9 = vsyncpa [#allocation6], 0 }
   0x2   :  { %10 = vsyncpa [#allocation4], 0  ;;  %s312_s12 = smov [#allocation5]   ;;  %s313_s14 = smov [#allocation2]  }
   0x3   :  { %s28_s13 = sshll.u32 %s312_s12, 4  ;;  %s16_s15 = sshll.u32 %s313_s14, 4  ;;  %s29_s13 = int_to_ptr.vmem [resolvable:$true] %s28_s13  ;;  %s340_s15 = int_to_ptr.vmem [resolvable:$true] %s16_s15 }
   0x4   :  { %s218_s18 = scalar_lea.hbm %s405_s1, 512 }
   0x5   :  { %p219_p0 = scmp.ne.s32.totalorder %s405_s1, %s218_s18  ;;  %p222_p1 = scmp.lt.u32.totalorder %s218_s18, %s405_s1 }
   0x7   :  { %p224_p2 = pnand %p222_p1, %p219_p0 }
   0x9   :  { %227 = shalt.err (!%p224_p2)
}
   0xa   :  { %s228_s23 = scalar_lea.vmem %s29_s13, 512  ;;  %p233_p4 = scmp.lt.s32.totalorder %s29_s13, %s29_s13 }
   0xb   :  { %p229_p3 = scmp.ne.s32.totalorder %s29_s13, %s228_s23  ;;  %p234_p5 = scmp.lt.s32.totalorder %s228_s23, %s228_s23 }
   0xd   :  { %p235_p6 = por %p234_p5, %p233_p4 }
   0xf   :  { %p236_p7 = pnand %p235_p6, %p229_p3 }
  0x11   :  { %239 = shalt.err (!%p236_p7)
}
  0x12   :  { %s314_s24 = smov 64   ;;  %s315_s25 = smov 4  }
  0x13   :  { %34 = dma.hbm_to_vmem [thread:$0]  %s405_s1, 512, %s29_s13, [#allocation6], %s314_s24, %s314_s24, %s315_s25  }
  0x14   :  { %s240_s30 = scalar_lea.hbm %s404_s0, 128 }
  0x15   :  { %p241_p8 = scmp.ne.s32.totalorder %s404_s0, %s240_s30  ;;  %p244_p9 = scmp.lt.u32.totalorder %s240_s30, %s404_s0 }
  0x17   :  { %p246_p10 = pnand %p244_p9, %p241_p8 }
  0x19   :  { %249 = shalt.err (!%p246_p10)
}
  0x1a   :  { %s250_s8 = scalar_lea.vmem %s340_s15, 128  ;;  %p255_p12 = scmp.lt.s32.totalorder %s340_s15, %s340_s15 }
  0x1b   :  { %p251_p11 = scmp.ne.s32.totalorder %s340_s15, %s250_s8  ;;  %p256_p13 = scmp.lt.s32.totalorder %s250_s8, %s250_s8 }
  0x1d   :  { %p257_p0 = por %p256_p13, %p255_p12 }
  0x1f   :  { %p258_p1 = pnand %p257_p0, %p251_p11 }
  0x21   :  { %261 = shalt.err (!%p258_p1)
}
  0x22   :  { %22 = dma.hbm_to_vmem [thread:$0]  %s404_s0, 128, %s340_s15, [#allocation3], %s314_s24, %s314_s24, %s315_s25  }
  0x23   :  { %s316_s10 = smov [#allocation7]   ;;  %s262_s14 = scalar_lea.hbm %s406_s2, 16 }
  0x24   :  { %s41_s11 = sshll.u32 %s316_s10, 4  ;;  %p263_p2 = scmp.ne.s32.totalorder %s406_s2, %s262_s14  ;;  %s42_s11 = int_to_ptr.vmem [resolvable:$true] %s41_s11 }
  0x25   :  { %p266_p3 = scmp.lt.u32.totalorder %s262_s14, %s406_s2 }
  0x27   :  { %p268_p4 = pnand %p266_p3, %p263_p2 }
  0x29   :  { %271 = shalt.err (!%p268_p4)
}
  0x2a   :  { %s272_s20 = scalar_lea.vmem %s42_s11, 16  ;;  %s276_s0 = scalar_lea.vmem %s42_s11, 32 }
  0x2b   :  { %p273_p5 = scmp.ne.s32.totalorder %s42_s11, %s272_s20  ;;  %p277_p6 = scmp.lt.s32.totalorder %s42_s11, %s42_s11 }
  0x2c   :  { %p278_p7 = scmp.lt.s32.totalorder %s276_s0, %s272_s20 }
  0x2e   :  { %p279_p8 = por %p278_p7, %p277_p6 }
  0x30   :  { %p280_p9 = pnand %p279_p8, %p273_p5 }
  0x32   :  { %283 = shalt.err (!%p280_p9)
}
  0x33   :  { %44 = dma.hbm_to_vmem [thread:$0]  %s406_s2, 16, %s42_s11, [#allocation6]  }
  0x34   :  { %306 = dma.done.wait [#allocation3], 128  }
  0x35   :  { %307 = vsyncadd [#allocation3], 4294967168 }
  0x36   :  { %308 = dma.done.wait [#allocation6], 528  }
  0x37   :  { %309 = vsyncadd [#allocation6], 4294966768  ;;  %v317_v0 = vmov 0.0   ;;  %vm318_vm0 = vmmov 0   ;;  %v213_v1 = vld [vmem:[#allocation5] sm:$0xff]   ;;  %v214_v2 = vld [vmem:[#allocation5 + $0x8] sm:$0xff]  }
  0x38   :  { %193 = vmatprep.subr.bf16.mxu0 %v317_v0  ;;  %201 = vmatprep.mubr.msk.bf16.mxu0 %vm318_vm0, %v317_v0  ;;  %v215_v3 = vld [vmem:[#allocation5 + $0x10] sm:$0xff]   ;;  %v216_v4 = vld [vmem:[#allocation5 + $0x18] sm:$0xff]   ;;  %vm101_vm1 = vcmask 523264   ;;  %v177_v6 = vld [vmem:[#allocation7] ss:$0 sm:$0xff]  ;;  %vm156_vm2 = vcmask 519168  }
  0x39   :  { %194 = vmatpush3.bf16.msra.mxu0 %v213_v1  ;;  %v217_v5 = vld [vmem:[#allocation2] sm:$0xff]   ;;  %s319_s2 = smov [#allocation8]  }
  0x3a   :  { %195 = vmatprep.subr.bf16.mxu0 %v317_v0  ;;  %s164_s22 = sshll.u32 %s319_s2, 4  ;;  %s165_s22 = int_to_ptr.vmem [resolvable:$true] %s164_s22 }
  0x3b   :  { %s284_s23 = scalar_lea.vmem %s165_s22, 128  ;;  %p289_p11 = scmp.lt.s32.totalorder %s165_s22, %s165_s22 }
  0x3c   :  { %p285_p10 = scmp.ne.s32.totalorder %s165_s22, %s284_s23  ;;  %p290_p12 = scmp.lt.s32.totalorder %s284_s23, %s284_s23 }
  0x3d   :  { %196 = vmatpush3.bf16.msra.mxu0 %v214_v2 }
  0x3e   :  { %197 = vmatprep.subr.bf16.mxu0 %v317_v0  ;;  %p291_p13 = por %p290_p12, %p289_p11 }
  0x40   :  { %p292_p0 = pnand %p291_p13, %p285_p10 }
  0x41   :  { %198 = vmatpush3.bf16.msra.mxu0 %v215_v3 }
  0x42   :  { %199 = vmatprep.subr.bf16.mxu0 %v317_v0 }
  0x45   :  { %200 = vmatpush3.bf16.msra.mxu0 %v216_v4 }
  0x48   :  { %202 = vmatmul.mubr.msk.bf16.vlgmr.msra.gmra.mrb[0].mxu0 %vm101_vm1, %v217_v5 }
 0x11b   :  { %v139_v7 = vpop.f32.mrb[0].mxu0 }
 0x11c   :  { %v140_v8 = vadd.f32 %v177_v6, %v139_v7  ;;  %v203_v9 = vpop.f32.mrb[1].mxu0 }
 0x11d   :  { %v142_v10 = vpop.f32.mrb[2].mxu0 }
 0x11e   :  { %v146_v11 = vmax.f32 %v140_v8, 0.0  ;;  %v143_v12 = vadd.f32 %v177_v6, %v142_v10  ;;  %v204_v13 = vpop.f32.mrb[3].mxu0 }
 0x120   :  { %v186_v14 = vpack.c.bf16 %v146_v11, %v146_v11  ;;  %v147_v15 = vmax.f32 %v143_v12, 0.0 }
 0x122   :  { %v187_v16 = vpack.c.bf16 %v147_v15, %v147_v15  ;;  %157 = vst.msk [vmem:[#allocation8] sm:$0xf] %vm156_vm2, %v186_v14 }
 0x124   :  { %158 = vst.msk [vmem:[#allocation8 + $0x4] sm:$0xf] %vm156_vm2, %v187_v16 }
 0x125   :  { %295 = shalt.err (!%p292_p0)
}
 0x126   :  { %s296_s28 = scalar_lea.hbm %s407_s3, 128 }
 0x127   :  { %p297_p1 = scmp.ne.s32.totalorder %s407_s3, %s296_s28  ;;  %p300_p2 = scmp.lt.u32.totalorder %s296_s28, %s407_s3 }
 0x129   :  { %p302_p3 = pnand %p300_p2, %p297_p1 }
 0x12b   :  { %305 = shalt.err (!%p302_p3)
}
 0x12c   :  { %170 = dma.vmem_to_hbm [thread:$0]  %s165_s22, 128, %s407_s3, [#allocation4], %s314_s24, %s314_s24, %s315_s25  }
 0x12d   :  { %310 = dma.done.wait [#allocation4], 128  }
 0x12e   :  { %311 = vsyncadd [#allocation4], 4294967168 }
 0x12f   :  { %174 = vsyncpa [#allocation3], 1 }
 0x130   :  { %175 = vsyncpa [#allocation6], 1 }
 0x131   :  { %176 = vsyncpa [#allocation4], 1 }

// kernel: vggnet_modified_forward.31
= control target key start
LH: loop header
LB: loop body
LE: loop exit
PB: predicated region body
PF: predicated region fallthrough
CT: control target
= control target key end

     0   :  { %8 = vsyncpa [#allocation3], 0  ;;  %s385_s0 = inlined_call_operand.hbm [shape: bf16[16,64], index: 0, kind: input, shape index: {}]   ;;  %s386_s1 = inlined_call_operand.hbm [shape: bf16[64,100], index: 1, kind: input, shape index: {}]   ;;  %s387_s2 = inlined_call_operand.hbm [shape: f32[1,100], index: 2, kind: input, shape index: {}]   ;;  %s388_s3 = inlined_call_operand.hbm [shape: f32[16,100], index: 3, kind: output, shape index: {}]  }
   0x1   :  { %9 = vsyncpa [#allocation6], 0 }
   0x2   :  { %10 = vsyncpa [#allocation4], 0  ;;  %s300_s12 = smov [#allocation5]   ;;  %s301_s14 = smov [#allocation2]  }
   0x3   :  { %s28_s13 = sshll.u32 %s300_s12, 4  ;;  %s16_s15 = sshll.u32 %s301_s14, 4  ;;  %s29_s13 = int_to_ptr.vmem [resolvable:$true] %s28_s13  ;;  %s330_s15 = int_to_ptr.vmem [resolvable:$true] %s16_s15 }
   0x4   :  { %s206_s18 = scalar_lea.hbm %s386_s1, 512 }
   0x5   :  { %p207_p0 = scmp.ne.s32.totalorder %s386_s1, %s206_s18  ;;  %p210_p1 = scmp.lt.u32.totalorder %s206_s18, %s386_s1 }
   0x7   :  { %p212_p2 = pnand %p210_p1, %p207_p0 }
   0x9   :  { %215 = shalt.err (!%p212_p2)
}
   0xa   :  { %s216_s23 = scalar_lea.vmem %s29_s13, 512  ;;  %p221_p4 = scmp.lt.s32.totalorder %s29_s13, %s29_s13 }
   0xb   :  { %p217_p3 = scmp.ne.s32.totalorder %s29_s13, %s216_s23  ;;  %p222_p5 = scmp.lt.s32.totalorder %s216_s23, %s216_s23 }
   0xd   :  { %p223_p6 = por %p222_p5, %p221_p4 }
   0xf   :  { %p224_p7 = pnand %p223_p6, %p217_p3 }
  0x11   :  { %227 = shalt.err (!%p224_p7)
}
  0x12   :  { %s302_s24 = smov 64   ;;  %s303_s25 = smov 4  }
  0x13   :  { %34 = dma.hbm_to_vmem [thread:$0]  %s386_s1, 512, %s29_s13, [#allocation6], %s302_s24, %s302_s24, %s303_s25  }
  0x14   :  { %s228_s30 = scalar_lea.hbm %s385_s0, 128 }
  0x15   :  { %p229_p8 = scmp.ne.s32.totalorder %s385_s0, %s228_s30  ;;  %p232_p9 = scmp.lt.u32.totalorder %s228_s30, %s385_s0 }
  0x17   :  { %p234_p10 = pnand %p232_p9, %p229_p8 }
  0x19   :  { %237 = shalt.err (!%p234_p10)
}
  0x1a   :  { %s238_s8 = scalar_lea.vmem %s330_s15, 128  ;;  %p243_p12 = scmp.lt.s32.totalorder %s330_s15, %s330_s15 }
  0x1b   :  { %p239_p11 = scmp.ne.s32.totalorder %s330_s15, %s238_s8  ;;  %p244_p13 = scmp.lt.s32.totalorder %s238_s8, %s238_s8 }
  0x1d   :  { %p245_p0 = por %p244_p13, %p243_p12 }
  0x1f   :  { %p246_p1 = pnand %p245_p0, %p239_p11 }
  0x21   :  { %249 = shalt.err (!%p246_p1)
}
  0x22   :  { %22 = dma.hbm_to_vmem [thread:$0]  %s385_s0, 128, %s330_s15, [#allocation3], %s302_s24, %s302_s24, %s303_s25  }
  0x23   :  { %s304_s10 = smov [#allocation7]   ;;  %s250_s14 = scalar_lea.hbm %s387_s2, 16 }
  0x24   :  { %s41_s11 = sshll.u32 %s304_s10, 4  ;;  %p251_p2 = scmp.ne.s32.totalorder %s387_s2, %s250_s14  ;;  %s42_s11 = int_to_ptr.vmem [resolvable:$true] %s41_s11 }
  0x25   :  { %p254_p3 = scmp.lt.u32.totalorder %s250_s14, %s387_s2 }
  0x27   :  { %p256_p4 = pnand %p254_p3, %p251_p2 }
  0x29   :  { %259 = shalt.err (!%p256_p4)
}
  0x2a   :  { %s260_s20 = scalar_lea.vmem %s42_s11, 16  ;;  %s264_s0 = scalar_lea.vmem %s42_s11, 32 }
  0x2b   :  { %p261_p5 = scmp.ne.s32.totalorder %s42_s11, %s260_s20  ;;  %p265_p6 = scmp.lt.s32.totalorder %s42_s11, %s42_s11 }
  0x2c   :  { %p266_p7 = scmp.lt.s32.totalorder %s264_s0, %s260_s20 }
  0x2e   :  { %p267_p8 = por %p266_p7, %p265_p6 }
  0x30   :  { %p268_p9 = pnand %p267_p8, %p261_p5 }
  0x32   :  { %271 = shalt.err (!%p268_p9)
}
  0x33   :  { %44 = dma.hbm_to_vmem [thread:$0]  %s387_s2, 16, %s42_s11, [#allocation6]  }
  0x34   :  { %294 = dma.done.wait [#allocation3], 128  }
  0x35   :  { %295 = vsyncadd [#allocation3], 4294967168 }
  0x36   :  { %296 = dma.done.wait [#allocation6], 528  }
  0x37   :  { %297 = vsyncadd [#allocation6], 4294966768  ;;  %v305_v0 = vmov 0.0   ;;  %vm306_vm0 = vmmov 0   ;;  %v201_v1 = vld [vmem:[#allocation5] sm:$0xff]   ;;  %v202_v2 = vld [vmem:[#allocation5 + $0x8] sm:$0xff]  }
  0x38   :  { %179 = vmatprep.subr.bf16.mxu0 %v305_v0  ;;  %187 = vmatprep.mubr.msk.bf16.mxu0 %vm306_vm0, %v305_v0  ;;  %v203_v3 = vld [vmem:[#allocation5 + $0x10] sm:$0xff]   ;;  %v204_v4 = vld [vmem:[#allocation5 + $0x18] sm:$0xff]   ;;  %vm101_vm1 = vcmask 523264   ;;  %v167_v6 = vld [vmem:[#allocation7] ss:$0 sm:$0xff]  ;;  %s307_s2 = smov [#allocation8]  }
  0x39   :  { %180 = vmatpush3.bf16.msra.mxu0 %v201_v1  ;;  %v205_v5 = vld [vmem:[#allocation2] sm:$0xff]   ;;  %s154_s22 = sshll.u32 %s307_s2, 4  ;;  %vm146_vm2 = vcmask 818176   ;;  %s155_s22 = int_to_ptr.vmem [resolvable:$true] %s154_s22 }
  0x3a   :  { %181 = vmatprep.subr.bf16.mxu0 %v305_v0  ;;  %s272_s23 = scalar_lea.vmem %s155_s22, 256  ;;  %p277_p11 = scmp.lt.s32.totalorder %s155_s22, %s155_s22 }
  0x3b   :  { %p273_p10 = scmp.ne.s32.totalorder %s155_s22, %s272_s23  ;;  %p278_p12 = scmp.lt.s32.totalorder %s272_s23, %s272_s23 }
  0x3d   :  { %182 = vmatpush3.bf16.msra.mxu0 %v202_v2  ;;  %p279_p13 = por %p278_p12, %p277_p11 }
  0x3e   :  { %183 = vmatprep.subr.bf16.mxu0 %v305_v0 }
  0x3f   :  { %p280_p0 = pnand %p279_p13, %p273_p10 }
  0x41   :  { %184 = vmatpush3.bf16.msra.mxu0 %v203_v3 }
  0x42   :  { %185 = vmatprep.subr.bf16.mxu0 %v305_v0 }
  0x45   :  { %186 = vmatpush3.bf16.msra.mxu0 %v204_v4 }
  0x48   :  { %188 = vmatmul.mubr.msk.bf16.vlgmr.msra.gmra.mrb[0].mxu0 %vm101_vm1, %v205_v5 }
 0x11b   :  { %v139_v7 = vpop.f32.mrb[0].mxu0 }
 0x11c   :  { %v140_v8 = vadd.f32 %v167_v6, %v139_v7  ;;  %v189_v9 = vpop.f32.mrb[1].mxu0 }
 0x11d   :  { %v142_v10 = vpop.f32.mrb[2].mxu0 }
 0x11e   :  { %147 = vst.msk [vmem:[#allocation8] sm:$0xff] %vm146_vm2, %v140_v8  ;;  %v143_v11 = vadd.f32 %v167_v6, %v142_v10  ;;  %v190_v12 = vpop.f32.mrb[3].mxu0 }
 0x120   :  { %148 = vst.msk [vmem:[#allocation8 + $0x8] sm:$0xff] %vm146_vm2, %v143_v11 }
 0x121   :  { %283 = shalt.err (!%p280_p0)
}
 0x122   :  { %s284_s26 = scalar_lea.hbm %s388_s3, 256 }
 0x123   :  { %p285_p1 = scmp.ne.s32.totalorder %s388_s3, %s284_s26  ;;  %p288_p2 = scmp.lt.u32.totalorder %s284_s26, %s388_s3 }
 0x125   :  { %p290_p3 = pnand %p288_p2, %p285_p1 }
 0x127   :  { %293 = shalt.err (!%p290_p3)
}
 0x128   :  { %s308_s4 = smov 128   ;;  %s309_s5 = smov 8  }
 0x129   :  { %160 = dma.vmem_to_hbm [thread:$0]  %s155_s22, 256, %s388_s3, [#allocation4], %s308_s4, %s308_s4, %s309_s5  }
 0x12a   :  { %298 = dma.done.wait [#allocation4], 256  }
 0x12b   :  { %299 = vsyncadd [#allocation4], 4294967040 }
 0x12c   :  { %164 = vsyncpa [#allocation3], 1 }
 0x12d   :  { %165 = vsyncpa [#allocation6], 1 }
 0x12e   :  { %166 = vsyncpa [#allocation4], 1 }

</bundles_post_ra>
